<compile_context>
chip_gen: v6e
topology: v6e:2x2x1
jax: 0.10.0
libtpu: 0.0.40
codegen_flags: <defaults>
</compile_context>

<pallas_src>
import jax
import jax.numpy as jnp
from jax.experimental import pallas as pl
from jax.experimental.pallas import tpu as pltpu

Z_DIM = 20
Z_P = 128       # padded latent / eps width (one full vreg lane group)
D_IN = 784
D_IN_P = 896    # 784 -> 7*128
H1_P = 512      # 500 -> 512
H2_P = 384      # 300 -> 384
H3_P = 256      # 200 -> 256
HEAD_P = 256    # fused head: mu in lanes [0,20), logvar in lanes [128,148)


def _round_up(n, m):
    return ((n + m - 1) // m) * m


def _cdiv(a, b):
    return (a + b - 1) // b


def _vae_kernel(
    x_ref, eps_ref,
    w1, b1, w2, b2, w3, b3,                    # encoder trunk (padded)
    wh, bh,                                    # fused mu|logvar head (256 lanes)
    dw1, db1, dw2, db2, dw3, db3, dw4, db4,    # decoder
    head_ref, recon_ref,
):
    f32 = jnp.float32
    bf16 = jnp.bfloat16

    def lin(h, w_ref, b_ref):
        # bf16 MXU inputs, f32 accumulate, f32 bias.
        return jnp.dot(h.astype(bf16), w_ref[...],
                       preferred_element_type=f32) + b_ref[...]

    def relu(h):
        return jnp.maximum(h, 0.0)

    # ----- encoder -----
    h = relu(lin(x_ref[...], w1, b1))     # (TB, 512)
    h = relu(lin(h, w2, b2))              # (TB, 384)
    h = relu(lin(h, w3, b3))              # (TB, 256)

    head = lin(h, wh, bh)                 # (TB, 256): [mu | 0.. | logvar | 0..]
    head_ref[...] = head                  # lane-dense f32 store; wrapper slices

    # ----- reparameterize (f32, vreg-aligned slices) -----
    mu_blk = head[:, :Z_P]                # lanes 0..127 (mu in 0..19, zeros after)
    logvar_blk = head[:, Z_P:2 * Z_P]     # lanes 128..255 (logvar in 0..19)
    std = jnp.exp(0.5 * logvar_blk)       # padded lanes: exp(0) = 1
    z = mu_blk + eps_ref[...] * std       # eps padded lanes are 0 -> z padded = 0

    # ----- decoder -----
    d = relu(lin(z, dw1, db1))            # (TB, 256)
    d = relu(lin(d, dw2, db2))            # (TB, 384)
    d = relu(lin(d, dw3, db3))            # (TB, 512)
    logits = lin(d, dw4, db4)             # (TB, 896)
    # Exact sigmoid via a single EUP tanh (cheaper than exp + reciprocal).
    recon_ref[...] = (0.5 * jnp.tanh(0.5 * logits) + 0.5).astype(recon_ref.dtype)


def pack_params(params):
    """Pad to 128-lane multiples, fuse the mu/logvar heads, cast weights to bf16."""
    bf16 = jnp.bfloat16

    def pw(w, rows, cols):
        w = jnp.asarray(w, jnp.float32)
        return jnp.pad(w, ((0, rows - w.shape[0]), (0, cols - w.shape[1]))).astype(bf16)

    def pb(b, cols):
        b = jnp.asarray(b, jnp.float32)
        return jnp.pad(b, ((0, 0), (0, cols - b.shape[1])))

    # Fused head: mu weights in lanes [0, Z_DIM), logvar weights in lanes
    # [Z_P, Z_P + Z_DIM) so both reparam slices land on vreg boundaries.
    wh = jnp.zeros((params["w71"].shape[0], HEAD_P), jnp.float32)
    wh = wh.at[:, :Z_DIM].set(jnp.asarray(params["w71"], jnp.float32))
    wh = wh.at[:, Z_P:Z_P + Z_DIM].set(jnp.asarray(params["w72"], jnp.float32))
    bh = jnp.zeros((1, HEAD_P), jnp.float32)
    bh = bh.at[:, :Z_DIM].set(jnp.asarray(params["b71"], jnp.float32))
    bh = bh.at[:, Z_P:Z_P + Z_DIM].set(jnp.asarray(params["b72"], jnp.float32))

    return (
        pw(params["w1"], D_IN_P, H1_P),  pb(params["b1"], H1_P),
        pw(params["w2"], H1_P, H2_P),    pb(params["b2"], H2_P),
        pw(params["w3"], H2_P, H3_P),    pb(params["b3"], H3_P),
        pw(wh, H3_P, HEAD_P),            pb(bh, HEAD_P),
        pw(params["dw1"], Z_P, H3_P),    pb(params["db1"], H3_P),
        pw(params["dw2"], H3_P, H2_P),   pb(params["db2"], H2_P),
        pw(params["dw3"], H2_P, H1_P),   pb(params["db3"], H1_P),
        pw(params["dw4"], H1_P, D_IN_P), pb(params["db4"], D_IN_P),
    )


def vae1cm_forward(x, eps, packed):
    """x: (B, 1, 28, 28) or (B, 784); eps: (B, Z_DIM). Returns (recon, mu, logvar)."""
    B = x.shape[0]
    x2d = x.reshape(B, D_IN)

    # Batch tile: cap at 512 rows (VMEM-safe on v7x's 64 MiB) but pick a value
    # that yields >= 2 grid steps whenever the batch allows, so both v7x
    # TensorCores get work under dimension_semantics=("parallel",).
    # On v5e/v6e (128 MiB VMEM) this cap can be raised to 1024-2048 (with a
    # larger vmem_limit_bytes) to amortize per-grid-step overhead.
    TB = min(512, _round_up(_cdiv(B, 2), 8))
    nb = _cdiv(B, TB)
    B_pad = nb * TB

    # jnp.pad fuses with the cast (no extra zeros + dynamic_update_slice buffer).
    xp = jnp.pad(x2d.astype(jnp.bfloat16),
                 ((0, B_pad - B), (0, D_IN_P - D_IN)))
    ep = jnp.pad(eps.astype(jnp.float32),
                 ((0, B_pad - B), (0, Z_P - Z_DIM)))

    def batch_spec(cols):
        return pl.BlockSpec((TB, cols), lambda i: (i, 0))

    def resident_spec(a):
        # Same block every grid step -> weights stay resident in VMEM.
        return pl.BlockSpec(a.shape, lambda i: (0, 0))

    grid_spec = pltpu.PrefetchScalarGridSpec(
        num_scalar_prefetch=0,
        grid=(nb,),
        in_specs=[batch_spec(D_IN_P), batch_spec(Z_P)]
                + [resident_spec(a) for a in packed],
        out_specs=(batch_spec(HEAD_P), batch_spec(D_IN_P)),
    )

    head, recon_pad = pl.pallas_call(
        _vae_kernel,
        out_shape=(
            jax.ShapeDtypeStruct((B_pad, HEAD_P), jnp.float32),
            jax.ShapeDtypeStruct((B_pad, D_IN_P), jnp.bfloat16),  # bf16 writeback
        ),
        grid_spec=grid_spec,
        compiler_params=pltpu.CompilerParams(
            dimension_semantics=("parallel",),
            vmem_limit_bytes=32 << 20,
        ),
    )(xp, ep, *packed)

    recon = recon_pad[:B, :D_IN]
    mu = head[:B, :Z_DIM]
    logvar = head[:B, Z_P:Z_P + Z_DIM]
    return recon, mu, logvar


def _init_linear(key, fan_in, fan_out):
    # PyTorch nn.Linear default init: U(-1/sqrt(fan_in), 1/sqrt(fan_in)).
    kw, kb = jax.random.split(key)
    bound = 1.0 / jnp.sqrt(jnp.float32(fan_in))
    # Stored as (in, out) so the kernel computes x @ W directly.
    w = jax.random.uniform(kw, (fan_in, fan_out), jnp.float32, -bound, bound)
    b = jax.random.uniform(kb, (1, fan_out), jnp.float32, -bound, bound)
    return w, b


def init_params(key, z_dim=Z_DIM):
    keys = jax.random.split(key, 9)
    p = {}
    p["w1"], p["b1"] = _init_linear(keys[0], 784, 500)
    p["w2"], p["b2"] = _init_linear(keys[1], 500, 300)
    p["w3"], p["b3"] = _init_linear(keys[2], 300, 200)
    p["w71"], p["b71"] = _init_linear(keys[3], 200, z_dim)
    p["w72"], p["b72"] = _init_linear(keys[4], 200, z_dim)
    p["dw1"], p["db1"] = _init_linear(keys[5], z_dim, 200)
    p["dw2"], p["db2"] = _init_linear(keys[6], 200, 300)
    p["dw3"], p["db3"] = _init_linear(keys[7], 300, 500)
    p["dw4"], p["db4"] = _init_linear(keys[8], 500, 784)
    return p


def _reference_forward(x, eps, params):
    """Pure-JAX reference emulating the kernel's bf16-matmul / f32-accumulate."""
    bf16 = jnp.bfloat16

    def lin(h, w, b):
        return jnp.dot(h.astype(bf16), w.astype(bf16),
                       preferred_element_type=jnp.float32) + b

    B = x.shape[0]
    h = x.reshape(B, 784).astype(jnp.float32)
    h = jnp.maximum(lin(h, params["w1"], params["b1"]), 0.0)
    h = jnp.maximum(lin(h, params["w2"], params["b2"]), 0.0)
    h = jnp.maximum(lin(h, params["w3"], params["b3"]), 0.0)
    mu = lin(h, params["w71"], params["b71"])
    logvar = lin(h, params["w72"], params["b72"])
    z = mu + eps * jnp.exp(0.5 * logvar)
    d = jnp.maximum(lin(z, params["dw1"], params["db1"]), 0.0)
    d = jnp.maximum(lin(d, params["dw2"], params["db2"]), 0.0)
    d = jnp.maximum(lin(d, params["dw3"], params["db3"]), 0.0)
    recon = jax.nn.sigmoid(lin(d, params["dw4"], params["db4"]))
    return recon, mu, logvar


if __name__ == "__main__":
    key = jax.random.PRNGKey(0)
    k_param, k_x, k_eps = jax.random.split(key, 3)

    B = 2
    x = jax.random.uniform(k_x, (B, 1, 28, 28), jnp.float32)   # MNIST-like NCHW
    # eps plays the role of torch.randn_like(std) in reparameterize.
    eps = jax.random.normal(k_eps, (B, Z_DIM), jnp.float32)

    params = init_params(k_param, Z_DIM)
    packed = pack_params(params)   # pad / fuse / bf16-cast once, outside jit

    fwd = jax.jit(vae1cm_forward)
    recon, mu, logvar = fwd(x, eps, packed)
    jax.block_until_ready((recon, mu, logvar))

    # Correctness check against a pure-JAX reference (bf16 matmuls like kernel).
    r_ref, mu_ref, lv_ref = _reference_forward(x, eps, params)
    assert recon.shape == (B, 784) and mu.shape == (B, Z_DIM) and logvar.shape == (B, Z_DIM)
    # bf16 matmuls + bf16 recon storage -> relaxed tolerances.
    assert jnp.allclose(recon.astype(jnp.float32), r_ref, atol=2e-2)
    assert jnp.allclose(mu, mu_ref, atol=1e-2)
    assert jnp.allclose(logvar, lv_ref, atol=1e-2)

    print("KERNEL_OK")
</pallas_src>

<mosaic_0001>
module attributes {stable_mosaic.version = 11 : i64} {
  func.func @_vae_kernel(%arg0: i32, %arg1: memref<8x896xbf16, #tpu.memory_space<vmem>>, %arg2: memref<8x128xf32, #tpu.memory_space<vmem>>, %arg3: memref<896x512xbf16, #tpu.memory_space<vmem>>, %arg4: memref<1x512xf32, #tpu.memory_space<vmem>>, %arg5: memref<512x384xbf16, #tpu.memory_space<vmem>>, %arg6: memref<1x384xf32, #tpu.memory_space<vmem>>, %arg7: memref<384x256xbf16, #tpu.memory_space<vmem>>, %arg8: memref<1x256xf32, #tpu.memory_space<vmem>>, %arg9: memref<256x256xbf16, #tpu.memory_space<vmem>>, %arg10: memref<1x256xf32, #tpu.memory_space<vmem>>, %arg11: memref<128x256xbf16, #tpu.memory_space<vmem>>, %arg12: memref<1x256xf32, #tpu.memory_space<vmem>>, %arg13: memref<256x384xbf16, #tpu.memory_space<vmem>>, %arg14: memref<1x384xf32, #tpu.memory_space<vmem>>, %arg15: memref<384x512xbf16, #tpu.memory_space<vmem>>, %arg16: memref<1x512xf32, #tpu.memory_space<vmem>>, %arg17: memref<512x896xbf16, #tpu.memory_space<vmem>>, %arg18: memref<1x896xf32, #tpu.memory_space<vmem>>, %arg19: memref<8x256xf32, #tpu.memory_space<vmem>>, %arg20: memref<8x896xbf16, #tpu.memory_space<vmem>>) attributes {dimension_semantics = [#tpu.dimension_semantics<parallel>], iteration_bounds = array<i64: 1>, scalar_prefetch = 0 : i64, scratch_operands = 0 : i64, tpu.core_type = #tpu.core_type<tc>, window_params = [{transform_indices = @transform_0, window_bounds = array<i64: 8, 896>}, {transform_indices = @transform_1, window_bounds = array<i64: 8, 128>}, {pipeline_mode = #tpu.pipeline_mode<synchronous>, transform_indices = @transform_2, window_bounds = array<i64: 896, 512>}, {pipeline_mode = #tpu.pipeline_mode<synchronous>, transform_indices = @transform_3, window_bounds = array<i64: 1, 512>}, {pipeline_mode = #tpu.pipeline_mode<synchronous>, transform_indices = @transform_4, window_bounds = array<i64: 512, 384>}, {pipeline_mode = #tpu.pipeline_mode<synchronous>, transform_indices = @transform_5, window_bounds = array<i64: 1, 384>}, {pipeline_mode = #tpu.pipeline_mode<synchronous>, transform_indices = @transform_6, window_bounds = array<i64: 384, 256>}, {pipeline_mode = #tpu.pipeline_mode<synchronous>, transform_indices = @transform_7, window_bounds = array<i64: 1, 256>}, {pipeline_mode = #tpu.pipeline_mode<synchronous>, transform_indices = @transform_8, window_bounds = array<i64: 256, 256>}, {pipeline_mode = #tpu.pipeline_mode<synchronous>, transform_indices = @transform_9, window_bounds = array<i64: 1, 256>}, {pipeline_mode = #tpu.pipeline_mode<synchronous>, transform_indices = @transform_10, window_bounds = array<i64: 128, 256>}, {pipeline_mode = #tpu.pipeline_mode<synchronous>, transform_indices = @transform_11, window_bounds = array<i64: 1, 256>}, {pipeline_mode = #tpu.pipeline_mode<synchronous>, transform_indices = @transform_12, window_bounds = array<i64: 256, 384>}, {pipeline_mode = #tpu.pipeline_mode<synchronous>, transform_indices = @transform_13, window_bounds = array<i64: 1, 384>}, {pipeline_mode = #tpu.pipeline_mode<synchronous>, transform_indices = @transform_14, window_bounds = array<i64: 384, 512>}, {pipeline_mode = #tpu.pipeline_mode<synchronous>, transform_indices = @transform_15, window_bounds = array<i64: 1, 512>}, {pipeline_mode = #tpu.pipeline_mode<synchronous>, transform_indices = @transform_16, window_bounds = array<i64: 512, 896>}, {pipeline_mode = #tpu.pipeline_mode<synchronous>, transform_indices = @transform_17, window_bounds = array<i64: 1, 896>}, {transform_indices = @transform_18, window_bounds = array<i64: 8, 256>}, {transform_indices = @transform_19, window_bounds = array<i64: 8, 896>}]} {
    %c0 = arith.constant 0 : index
    %c0_0 = arith.constant 0 : index
    %0 = vector.load %arg1[%c0, %c0_0] : memref<8x896xbf16, #tpu.memory_space<vmem>>, vector<8x896xbf16>
    %c0_1 = arith.constant 0 : index
    %c0_2 = arith.constant 0 : index
    %1 = vector.load %arg3[%c0_1, %c0_2] : memref<896x512xbf16, #tpu.memory_space<vmem>>, vector<896x512xbf16>
    %cst = arith.constant dense<0.000000e+00> : vector<8x512xf32>
    %2 = tpu.matmul %0, %1, %cst {dimension_numbers = #tpu.dot_dimension_numbers<[1], [0], [0], [1], [0, 0, 1, 1], [], []>} : vector<8x896xbf16>, vector<896x512xbf16>, vector<8x512xf32> -> vector<8x512xf32>
    %c0_3 = arith.constant 0 : index
    %c0_4 = arith.constant 0 : index
    %3 = vector.load %arg4[%c0_3, %c0_4] : memref<1x512xf32, #tpu.memory_space<vmem>>, vector<1x512xf32>
    %4 = vector.broadcast %3 : vector<1x512xf32> to vector<8x512xf32>
    %5 = arith.addf %2, %4 : vector<8x512xf32>
    %cst_5 = arith.constant 0.000000e+00 : f32
    %6 = vector.broadcast %cst_5 : f32 to vector<8x512xf32>
    %7 = arith.maximumf %5, %6 : vector<8x512xf32>
    %8 = arith.truncf %7 : vector<8x512xf32> to vector<8x512xbf16>
    %c0_6 = arith.constant 0 : index
    %c0_7 = arith.constant 0 : index
    %9 = vector.load %arg5[%c0_6, %c0_7] : memref<512x384xbf16, #tpu.memory_space<vmem>>, vector<512x384xbf16>
    %cst_8 = arith.constant dense<0.000000e+00> : vector<8x384xf32>
    %10 = tpu.matmul %8, %9, %cst_8 {dimension_numbers = #tpu.dot_dimension_numbers<[1], [0], [0], [1], [0, 0, 1, 1], [], []>} : vector<8x512xbf16>, vector<512x384xbf16>, vector<8x384xf32> -> vector<8x384xf32>
    %c0_9 = arith.constant 0 : index
    %c0_10 = arith.constant 0 : index
    %11 = vector.load %arg6[%c0_9, %c0_10] : memref<1x384xf32, #tpu.memory_space<vmem>>, vector<1x384xf32>
    %12 = vector.broadcast %11 : vector<1x384xf32> to vector<8x384xf32>
    %13 = arith.addf %10, %12 : vector<8x384xf32>
    %cst_11 = arith.constant 0.000000e+00 : f32
    %14 = vector.broadcast %cst_11 : f32 to vector<8x384xf32>
    %15 = arith.maximumf %13, %14 : vector<8x384xf32>
    %16 = arith.truncf %15 : vector<8x384xf32> to vector<8x384xbf16>
    %c0_12 = arith.constant 0 : index
    %c0_13 = arith.constant 0 : index
    %17 = vector.load %arg7[%c0_12, %c0_13] : memref<384x256xbf16, #tpu.memory_space<vmem>>, vector<384x256xbf16>
    %cst_14 = arith.constant dense<0.000000e+00> : vector<8x256xf32>
    %18 = tpu.matmul %16, %17, %cst_14 {dimension_numbers = #tpu.dot_dimension_numbers<[1], [0], [0], [1], [0, 0, 1, 1], [], []>} : vector<8x384xbf16>, vector<384x256xbf16>, vector<8x256xf32> -> vector<8x256xf32>
    %c0_15 = arith.constant 0 : index
    %c0_16 = arith.constant 0 : index
    %19 = vector.load %arg8[%c0_15, %c0_16] : memref<1x256xf32, #tpu.memory_space<vmem>>, vector<1x256xf32>
    %20 = vector.broadcast %19 : vector<1x256xf32> to vector<8x256xf32>
    %21 = arith.addf %18, %20 : vector<8x256xf32>
    %cst_17 = arith.constant 0.000000e+00 : f32
    %22 = vector.broadcast %cst_17 : f32 to vector<8x256xf32>
    %23 = arith.maximumf %21, %22 : vector<8x256xf32>
    %24 = arith.truncf %23 : vector<8x256xf32> to vector<8x256xbf16>
    %c0_18 = arith.constant 0 : index
    %c0_19 = arith.constant 0 : index
    %25 = vector.load %arg9[%c0_18, %c0_19] : memref<256x256xbf16, #tpu.memory_space<vmem>>, vector<256x256xbf16>
    %cst_20 = arith.constant dense<0.000000e+00> : vector<8x256xf32>
    %26 = tpu.matmul %24, %25, %cst_20 {dimension_numbers = #tpu.dot_dimension_numbers<[1], [0], [0], [1], [0, 0, 1, 1], [], []>} : vector<8x256xbf16>, vector<256x256xbf16>, vector<8x256xf32> -> vector<8x256xf32>
    %c0_21 = arith.constant 0 : index
    %c0_22 = arith.constant 0 : index
    %27 = vector.load %arg10[%c0_21, %c0_22] : memref<1x256xf32, #tpu.memory_space<vmem>>, vector<1x256xf32>
    %28 = vector.broadcast %27 : vector<1x256xf32> to vector<8x256xf32>
    %29 = arith.addf %26, %28 : vector<8x256xf32>
    %c0_23 = arith.constant 0 : index
    %c0_24 = arith.constant 0 : index
    %30 = vector.load %arg19[%c0_23, %c0_24] : memref<8x256xf32, #tpu.memory_space<vmem>>, vector<8x256xf32>
    tpu.vector_store %arg19[%c0_23, %c0_24], %29 {strides = array<i32>} : memref<8x256xf32, #tpu.memory_space<vmem>>, vector<8x256xf32>,
    %31 = vector.extract_strided_slice %29 {offsets = [0, 0], sizes = [8, 128], strides = [1, 1]} : vector<8x256xf32> to vector<8x128xf32>
    %32 = vector.extract_strided_slice %29 {offsets = [0, 128], sizes = [8, 128], strides = [1, 1]} : vector<8x256xf32> to vector<8x128xf32>
    %cst_25 = arith.constant 5.000000e-01 : f32
    %33 = vector.broadcast %cst_25 : f32 to vector<8x128xf32>
    %34 = arith.mulf %33, %32 : vector<8x128xf32>
    %35 = math.exp %34 : vector<8x128xf32>
    %c0_26 = arith.constant 0 : index
    %c0_27 = arith.constant 0 : index
    %36 = vector.load %arg2[%c0_26, %c0_27] : memref<8x128xf32, #tpu.memory_space<vmem>>, vector<8x128xf32>
    %37 = arith.mulf %36, %35 : vector<8x128xf32>
    %38 = arith.addf %31, %37 : vector<8x128xf32>
    %39 = arith.truncf %38 : vector<8x128xf32> to vector<8x128xbf16>
    %c0_28 = arith.constant 0 : index
    %c0_29 = arith.constant 0 : index
    %40 = vector.load %arg11[%c0_28, %c0_29] : memref<128x256xbf16, #tpu.memory_space<vmem>>, vector<128x256xbf16>
    %cst_30 = arith.constant dense<0.000000e+00> : vector<8x256xf32>
    %41 = tpu.matmul %39, %40, %cst_30 {dimension_numbers = #tpu.dot_dimension_numbers<[1], [0], [0], [1], [0, 0, 1, 1], [], []>} : vector<8x128xbf16>, vector<128x256xbf16>, vector<8x256xf32> -> vector<8x256xf32>
    %c0_31 = arith.constant 0 : index
    %c0_32 = arith.constant 0 : index
    %42 = vector.load %arg12[%c0_31, %c0_32] : memref<1x256xf32, #tpu.memory_space<vmem>>, vector<1x256xf32>
    %43 = vector.broadcast %42 : vector<1x256xf32> to vector<8x256xf32>
    %44 = arith.addf %41, %43 : vector<8x256xf32>
    %cst_33 = arith.constant 0.000000e+00 : f32
    %45 = vector.broadcast %cst_33 : f32 to vector<8x256xf32>
    %46 = arith.maximumf %44, %45 : vector<8x256xf32>
    %47 = arith.truncf %46 : vector<8x256xf32> to vector<8x256xbf16>
    %c0_34 = arith.constant 0 : index
    %c0_35 = arith.constant 0 : index
    %48 = vector.load %arg13[%c0_34, %c0_35] : memref<256x384xbf16, #tpu.memory_space<vmem>>, vector<256x384xbf16>
    %cst_36 = arith.constant dense<0.000000e+00> : vector<8x384xf32>
    %49 = tpu.matmul %47, %48, %cst_36 {dimension_numbers = #tpu.dot_dimension_numbers<[1], [0], [0], [1], [0, 0, 1, 1], [], []>} : vector<8x256xbf16>, vector<256x384xbf16>, vector<8x384xf32> -> vector<8x384xf32>
    %c0_37 = arith.constant 0 : index
    %c0_38 = arith.constant 0 : index
    %50 = vector.load %arg14[%c0_37, %c0_38] : memref<1x384xf32, #tpu.memory_space<vmem>>, vector<1x384xf32>
    %51 = vector.broadcast %50 : vector<1x384xf32> to vector<8x384xf32>
    %52 = arith.addf %49, %51 : vector<8x384xf32>
    %cst_39 = arith.constant 0.000000e+00 : f32
    %53 = vector.broadcast %cst_39 : f32 to vector<8x384xf32>
    %54 = arith.maximumf %52, %53 : vector<8x384xf32>
    %55 = arith.truncf %54 : vector<8x384xf32> to vector<8x384xbf16>
    %c0_40 = arith.constant 0 : index
    %c0_41 = arith.constant 0 : index
    %56 = vector.load %arg15[%c0_40, %c0_41] : memref<384x512xbf16, #tpu.memory_space<vmem>>, vector<384x512xbf16>
    %cst_42 = arith.constant dense<0.000000e+00> : vector<8x512xf32>
    %57 = tpu.matmul %55, %56, %cst_42 {dimension_numbers = #tpu.dot_dimension_numbers<[1], [0], [0], [1], [0, 0, 1, 1], [], []>} : vector<8x384xbf16>, vector<384x512xbf16>, vector<8x512xf32> -> vector<8x512xf32>
    %c0_43 = arith.constant 0 : index
    %c0_44 = arith.constant 0 : index
    %58 = vector.load %arg16[%c0_43, %c0_44] : memref<1x512xf32, #tpu.memory_space<vmem>>, vector<1x512xf32>
    %59 = vector.broadcast %58 : vector<1x512xf32> to vector<8x512xf32>
    %60 = arith.addf %57, %59 : vector<8x512xf32>
    %cst_45 = arith.constant 0.000000e+00 : f32
    %61 = vector.broadcast %cst_45 : f32 to vector<8x512xf32>
    %62 = arith.maximumf %60, %61 : vector<8x512xf32>
    %63 = arith.truncf %62 : vector<8x512xf32> to vector<8x512xbf16>
    %c0_46 = arith.constant 0 : index
    %c0_47 = arith.constant 0 : index
    %64 = vector.load %arg17[%c0_46, %c0_47] : memref<512x896xbf16, #tpu.memory_space<vmem>>, vector<512x896xbf16>
    %cst_48 = arith.constant dense<0.000000e+00> : vector<8x896xf32>
    %65 = tpu.matmul %63, %64, %cst_48 {dimension_numbers = #tpu.dot_dimension_numbers<[1], [0], [0], [1], [0, 0, 1, 1], [], []>} : vector<8x512xbf16>, vector<512x896xbf16>, vector<8x896xf32> -> vector<8x896xf32>
    %c0_49 = arith.constant 0 : index
    %c0_50 = arith.constant 0 : index
    %66 = vector.load %arg18[%c0_49, %c0_50] : memref<1x896xf32, #tpu.memory_space<vmem>>, vector<1x896xf32>
    %67 = vector.broadcast %66 : vector<1x896xf32> to vector<8x896xf32>
    %68 = arith.addf %65, %67 : vector<8x896xf32>
    %cst_51 = arith.constant 5.000000e-01 : f32
    %69 = vector.broadcast %cst_51 : f32 to vector<8x896xf32>
    %70 = arith.mulf %69, %68 : vector<8x896xf32>
    %71 = math.tanh %70 : vector<8x896xf32>
    %cst_52 = arith.constant 5.000000e-01 : f32
    %72 = vector.broadcast %cst_52 : f32 to vector<8x896xf32>
    %73 = arith.mulf %72, %71 : vector<8x896xf32>
    %cst_53 = arith.constant 5.000000e-01 : f32
    %74 = vector.broadcast %cst_53 : f32 to vector<8x896xf32>
    %75 = arith.addf %73, %74 : vector<8x896xf32>
    %76 = arith.truncf %75 : vector<8x896xf32> to vector<8x896xbf16>
    %c0_54 = arith.constant 0 : index
    %c0_55 = arith.constant 0 : index
    %77 = vector.load %arg20[%c0_54, %c0_55] : memref<8x896xbf16, #tpu.memory_space<vmem>>, vector<8x896xbf16>
    tpu.vector_store %arg20[%c0_54, %c0_55], %76 {strides = array<i32>} : memref<8x896xbf16, #tpu.memory_space<vmem>>, vector<8x896xbf16>,
    return
  }
  func.func @transform_0(%arg0: i32) -> (i32, i32) {
    %c0_i32 = arith.constant 0 : i32
    %c0_i32_0 = arith.constant 0 : i32
    return %arg0, %c0_i32 : i32, i32
  }
  func.func @transform_1(%arg0: i32) -> (i32, i32) {
    %c0_i32 = arith.constant 0 : i32
    %c0_i32_0 = arith.constant 0 : i32
    return %arg0, %c0_i32 : i32, i32
  }
  func.func @transform_2(%arg0: i32) -> (i32, i32) {
    %c0_i32 = arith.constant 0 : i32
    %c0_i32_0 = arith.constant 0 : i32
    %c0_i32_1 = arith.constant 0 : i32
    return %c0_i32, %c0_i32_0 : i32, i32
  }
  func.func @transform_3(%arg0: i32) -> (i32, i32) {
    %c0_i32 = arith.constant 0 : i32
    %c0_i32_0 = arith.constant 0 : i32
    %c0_i32_1 = arith.constant 0 : i32
    return %c0_i32, %c0_i32_0 : i32, i32
  }
  func.func @transform_4(%arg0: i32) -> (i32, i32) {
    %c0_i32 = arith.constant 0 : i32
    %c0_i32_0 = arith.constant 0 : i32
    %c0_i32_1 = arith.constant 0 : i32
    return %c0_i32, %c0_i32_0 : i32, i32
  }
  func.func @transform_5(%arg0: i32) -> (i32, i32) {
    %c0_i32 = arith.constant 0 : i32
    %c0_i32_0 = arith.constant 0 : i32
    %c0_i32_1 = arith.constant 0 : i32
    return %c0_i32, %c0_i32_0 : i32, i32
  }
  func.func @transform_6(%arg0: i32) -> (i32, i32) {
    %c0_i32 = arith.constant 0 : i32
    %c0_i32_0 = arith.constant 0 : i32
    %c0_i32_1 = arith.constant 0 : i32
    return %c0_i32, %c0_i32_0 : i32, i32
  }
  func.func @transform_7(%arg0: i32) -> (i32, i32) {
    %c0_i32 = arith.constant 0 : i32
    %c0_i32_0 = arith.constant 0 : i32
    %c0_i32_1 = arith.constant 0 : i32
    return %c0_i32, %c0_i32_0 : i32, i32
  }
  func.func @transform_8(%arg0: i32) -> (i32, i32) {
    %c0_i32 = arith.constant 0 : i32
    %c0_i32_0 = arith.constant 0 : i32
    %c0_i32_1 = arith.constant 0 : i32
    return %c0_i32, %c0_i32_0 : i32, i32
  }
  func.func @transform_9(%arg0: i32) -> (i32, i32) {
    %c0_i32 = arith.constant 0 : i32
    %c0_i32_0 = arith.constant 0 : i32
    %c0_i32_1 = arith.constant 0 : i32
    return %c0_i32, %c0_i32_0 : i32, i32
  }
  func.func @transform_10(%arg0: i32) -> (i32, i32) {
    %c0_i32 = arith.constant 0 : i32
    %c0_i32_0 = arith.constant 0 : i32
    %c0_i32_1 = arith.constant 0 : i32
    return %c0_i32, %c0_i32_0 : i32, i32
  }
  func.func @transform_11(%arg0: i32) -> (i32, i32) {
    %c0_i32 = arith.constant 0 : i32
    %c0_i32_0 = arith.constant 0 : i32
    %c0_i32_1 = arith.constant 0 : i32
    return %c0_i32, %c0_i32_0 : i32, i32
  }
  func.func @transform_12(%arg0: i32) -> (i32, i32) {
    %c0_i32 = arith.constant 0 : i32
    %c0_i32_0 = arith.constant 0 : i32
    %c0_i32_1 = arith.constant 0 : i32
    return %c0_i32, %c0_i32_0 : i32, i32
  }
  func.func @transform_13(%arg0: i32) -> (i32, i32) {
    %c0_i32 = arith.constant 0 : i32
    %c0_i32_0 = arith.constant 0 : i32
    %c0_i32_1 = arith.constant 0 : i32
    return %c0_i32, %c0_i32_0 : i32, i32
  }
  func.func @transform_14(%arg0: i32) -> (i32, i32) {
    %c0_i32 = arith.constant 0 : i32
    %c0_i32_0 = arith.constant 0 : i32
    %c0_i32_1 = arith.constant 0 : i32
    return %c0_i32, %c0_i32_0 : i32, i32
  }
  func.func @transform_15(%arg0: i32) -> (i32, i32) {
    %c0_i32 = arith.constant 0 : i32
    %c0_i32_0 = arith.constant 0 : i32
    %c0_i32_1 = arith.constant 0 : i32
    return %c0_i32, %c0_i32_0 : i32, i32
  }
  func.func @transform_16(%arg0: i32) -> (i32, i32) {
    %c0_i32 = arith.constant 0 : i32
    %c0_i32_0 = arith.constant 0 : i32
    %c0_i32_1 = arith.constant 0 : i32
    return %c0_i32, %c0_i32_0 : i32, i32
  }
  func.func @transform_17(%arg0: i32) -> (i32, i32) {
    %c0_i32 = arith.constant 0 : i32
    %c0_i32_0 = arith.constant 0 : i32
    %c0_i32_1 = arith.constant 0 : i32
    return %c0_i32, %c0_i32_0 : i32, i32
  }
  func.func @transform_18(%arg0: i32) -> (i32, i32) {
    %c0_i32 = arith.constant 0 : i32
    %c0_i32_0 = arith.constant 0 : i32
    return %arg0, %c0_i32 : i32, i32
  }
  func.func @transform_19(%arg0: i32) -> (i32, i32) {
    %c0_i32 = arith.constant 0 : i32
    %c0_i32_0 = arith.constant 0 : i32
    return %arg0, %c0_i32 : i32, i32
  }
}

</mosaic_0001>

<bundles_post_ra>
// kernel: vae1cm_forward.1
= control target key start
LH: loop header
LB: loop body
LE: loop exit
PB: predicated region body
PF: predicated region fallthrough
CT: control target
= control target key end

     0   :  { %s9176_s0 = inlined_call_operand.vmem [shape: bf16[8,896], index: 0, kind: input, shape index: {}]   ;;  %s9177_s1 = inlined_call_operand.vmem [shape: f32[8,128], index: 1, kind: input, shape index: {}]   ;;  %s9178_s2 = inlined_call_operand.hbm [shape: bf16[896,512], index: 2, kind: input, shape index: {}]   ;;  %s9179_s3 = inlined_call_operand.vmem [shape: f32[1,512], index: 3, kind: input, shape index: {}]   ;;  %s9180_s4 = inlined_call_operand.hbm [shape: bf16[512,384], index: 4, kind: input, shape index: {}]   ;;  %s9181_s5 = inlined_call_operand.vmem [shape: f32[1,384], index: 5, kind: input, shape index: {}]   ;;  %s9182_s6 = inlined_call_operand.hbm [shape: bf16[384,256], index: 6, kind: input, shape index: {}]   ;;  %s9183_s7 = inlined_call_operand.vmem [shape: f32[1,256], index: 7, kind: input, shape index: {}]   ;;  %s9184_s8 = inlined_call_operand.hbm [shape: bf16[256,256], index: 8, kind: input, shape index: {}]   ;;  %s9185_s9 = inlined_call_operand.vmem [shape: f32[1,256], index: 9, kind: input, shape index: {}]   ;;  %s9186_s10 = inlined_call_operand.vmem [shape: bf16[128,256], index: 10, kind: input, shape index: {}]   ;;  %s9187_s11 = inlined_call_operand.vmem [shape: f32[1,256], index: 11, kind: input, shape index: {}]   ;;  %s9188_s12 = inlined_call_operand.hbm [shape: bf16[256,384], index: 12, kind: input, shape index: {}]   ;;  %s9189_s13 = inlined_call_operand.vmem [shape: f32[1,384], index: 13, kind: input, shape index: {}]   ;;  %s9190_s14 = inlined_call_operand.hbm [shape: bf16[384,512], index: 14, kind: input, shape index: {}]   ;;  %s9191_s15 = inlined_call_operand.vmem [shape: f32[1,512], index: 15, kind: input, shape index: {}]   ;;  %s9192_s16 = inlined_call_operand.hbm [shape: bf16[512,896], index: 16, kind: input, shape index: {}]   ;;  %s9193_s17 = inlined_call_operand.vmem [shape: f32[1,896], index: 17, kind: input, shape index: {}]   ;;  %s9194_s18 = inlined_call_operand.vmem [shape: f32[8,256], index: 18, kind: output, shape index: {0}]   ;;  %s9195_s19 = inlined_call_operand.vmem [shape: bf16[8,896], index: 19, kind: output, shape index: {1}]  }
   0x1   :  { %9199 = sst [smem:[#allocation17_spill]] %s9176_s0 }
   0x2   :  { %9200 = sst [smem:[#allocation18_spill]] %s9177_s1 }
   0x3   :  { %9201 = sst [smem:[#allocation19_spill]] %s9178_s2 }
   0x4   :  { %9202 = sst [smem:[#allocation20_spill]] %s9179_s3 }
   0x5   :  { %25 = vsyncpa [#allocation3], 0 }
   0x6   :  { %26 = vsyncpa [#allocation5], 0 }
   0x7   :  { %27 = vsyncpa [#allocation8], 0 }
   0x8   :  { %28 = vsyncpa [#allocation11], 0  ;;  %s8777_s0 = smov [#allocation4]  }
   0x9   :  { %s52_s30 = sshll.u32 %s8777_s0, 4  ;;  %s53_s30 = int_to_ptr.vmem [resolvable:$true] %s52_s30 }
   0xa   :  { %s8637_s20 = scalar_lea.vmem %s53_s30, 12288  ;;  %p8642_p1 = scmp.lt.s32.totalorder %s53_s30, %s53_s30 }
   0xb   :  { %p8638_p0 = scmp.ne.s32.totalorder %s53_s30, %s8637_s20  ;;  %p8643_p2 = scmp.lt.s32.totalorder %s8637_s20, %s8637_s20 }
   0xd   :  { %p8644_p3 = por %p8643_p2, %p8642_p1 }
   0xf   :  { %p8645_p4 = pnand %p8644_p3, %p8638_p0 }
  0x11   :  { %8648 = shalt.err (!%p8645_p4)
}
  0x12   :  { %s9197_s21 = smov 192   ;;  %s9198_s1 = smov 12  }
  0x13   :  { %58 = dma.hbm_to_vmem [thread:$0]  %s9180_s4, 12288, %s53_s30, [#allocation5], %s9197_s21, %s9197_s21, %s9198_s1  }
  0x14   :  { %s8780_s23 = smov [#allocation7]  }
  0x15   :  { %s80_s24 = sshll.u32 %s8780_s23, 4  ;;  %s81_s24 = int_to_ptr.vmem [resolvable:$true] %s80_s24 }
  0x16   :  { %s8657_s25 = scalar_lea.vmem %s81_s24, 4096  ;;  %p8662_p6 = scmp.lt.s32.totalorder %s81_s24, %s81_s24 }
  0x17   :  { %p8658_p5 = scmp.ne.s32.totalorder %s81_s24, %s8657_s25  ;;  %p8663_p7 = scmp.lt.s32.totalorder %s8657_s25, %s8657_s25 }
  0x19   :  { %p8664_p8 = por %p8663_p7, %p8662_p6 }
  0x1b   :  { %p8665_p9 = pnand %p8664_p8, %p8658_p5 }
  0x1d   :  { %8668 = shalt.err (!%p8665_p9)
}
  0x1e   :  { %s8781_s3 = smov 128   ;;  %s8782_s26 = smov 8  }
  0x1f   :  { %86 = dma.hbm_to_vmem [thread:$0]  %s9184_s8, 4096, %s81_s24, [#allocation8], %s8781_s3, %s8781_s3, %s8782_s26  }
  0x20   :  { %s8783_s4 = smov [#allocation10]   ;;  %s8784_s0 = smov [#allocation2]  }
  0x21   :  { %s112_s29 = sshll.u32 %s8783_s4, 4  ;;  %s38_s30 = sshll.u32 %s8784_s0, 4  ;;  %s113_s29 = int_to_ptr.vmem [resolvable:$true] %s112_s29  ;;  %s39_s30 = int_to_ptr.vmem [resolvable:$true] %s38_s30 }
  0x22   :  { %s8677_s20 = scalar_lea.vmem %s113_s29, 12288  ;;  %p8682_p11 = scmp.lt.s32.totalorder %s113_s29, %s113_s29 }
  0x23   :  { %p8678_p10 = scmp.ne.s32.totalorder %s113_s29, %s8677_s20  ;;  %p8683_p12 = scmp.lt.s32.totalorder %s8677_s20, %s8677_s20 }
  0x25   :  { %p8684_p13 = por %p8683_p12, %p8682_p11 }
  0x27   :  { %p8685_p0 = pnand %p8684_p13, %p8678_p10 }
  0x29   :  { %8688 = shalt.err (!%p8685_p0)
}
  0x2a   :  { %s8785_s22 = smov 256   ;;  %s8786_s2 = smov 16  }
  0x2b   :  { %118 = dma.hbm_to_vmem [thread:$0]  %s9190_s14, 12288, %s113_s29, [#allocation11], %s8785_s22, %s8785_s22, %s8786_s2  }
  0x2c   :  { %s8697_s8 = scalar_lea.vmem %s39_s30, 28672  ;;  %p8702_p2 = scmp.lt.s32.totalorder %s39_s30, %s39_s30 }
  0x2d   :  { %p8698_p1 = scmp.ne.s32.totalorder %s39_s30, %s8697_s8  ;;  %p8703_p3 = scmp.lt.s32.totalorder %s8697_s8, %s8697_s8 }
  0x2f   :  { %p8704_p4 = por %p8703_p3, %p8702_p2 }
  0x31   :  { %p8705_p5 = pnand %p8704_p4, %p8698_p1 }
  0x33   :  { %8708 = shalt.err (!%p8705_p5)
}
  0x34   :  { %s9203_s28 = sld [smem:[#allocation19_spill]]  ;;  %s8787_s4 = smov [#allocation6]  }
  0x35   :  { %s66_s0 = sshll.u32 %s8787_s4, 4  ;;  %s8788_s20 = smov [#allocation9]   ;;  %s67_s0 = int_to_ptr.vmem [resolvable:$true] %s66_s0 }
  0x36   :  { %s98_s21 = sshll.u32 %s8788_s20, 4  ;;  %s8717_s1 = scalar_lea.vmem %s67_s0, 6144  ;;  %s99_s21 = int_to_ptr.vmem [resolvable:$true] %s98_s21 }
  0x37   :  { %p8718_p6 = scmp.ne.s32.totalorder %s67_s0, %s8717_s1  ;;  %p8722_p7 = scmp.lt.s32.totalorder %s67_s0, %s67_s0 }
  0x38   :  { %p8723_p8 = scmp.lt.s32.totalorder %s8717_s1, %s8717_s1 }
  0x3a   :  { %44 = dma.hbm_to_vmem [thread:$0]  %s9203_s28, 28672, %s39_s30, [#allocation3], %s8785_s22, %s8785_s22, %s8786_s2  }
  0x3b   :  { %p8724_p9 = por %p8723_p8, %p8722_p7 }
  0x3d   :  { %p8725_p10 = pnand %p8724_p9, %p8718_p6 }
  0x3f   :  { %8728 = shalt.err (!%p8725_p10)
}
  0x40   :  { %72 = dma.hbm_to_vmem [thread:$0]  %s9182_s6, 6144, %s67_s0, [#allocation5], %s8781_s3, %s8781_s3, %s8782_s26  }
  0x41   :  { %s8737_s30 = scalar_lea.vmem %s99_s21, 6144  ;;  %p8742_p12 = scmp.lt.s32.totalorder %s99_s21, %s99_s21 }
  0x42   :  { %p8738_p11 = scmp.ne.s32.totalorder %s99_s21, %s8737_s30  ;;  %p8743_p13 = scmp.lt.s32.totalorder %s8737_s30, %s8737_s30 }
  0x44   :  { %p8744_p0 = por %p8743_p13, %p8742_p12 }
  0x46   :  { %p8745_p1 = pnand %p8744_p0, %p8738_p11 }
  0x48   :  { %8748 = shalt.err (!%p8745_p1)
}
  0x49   :  { %s9204_s22 = smov 12   ;;  %s9205_s2 = smov 192  }
  0x4a   :  { %104 = dma.hbm_to_vmem [thread:$0]  %s9188_s12, 6144, %s99_s21, [#allocation8], %s9205_s2, %s9205_s2, %s9204_s22  }
  0x4b   :  { %s8789_s25 = smov [#allocation12]  }
  0x4c   :  { %s126_s8 = sshll.u32 %s8789_s25, 4  ;;  %s127_s8 = int_to_ptr.vmem [resolvable:$true] %s126_s8 }
  0x4d   :  { %s8757_s24 = scalar_lea.vmem %s127_s8, 28672  ;;  %p8762_p3 = scmp.lt.s32.totalorder %s127_s8, %s127_s8 }
  0x4e   :  { %p8758_p2 = scmp.ne.s32.totalorder %s127_s8, %s8757_s24  ;;  %p8763_p4 = scmp.lt.s32.totalorder %s8757_s24, %s8757_s24 }
  0x50   :  { %p8764_p5 = por %p8763_p4, %p8762_p3 }
  0x52   :  { %p8765_p6 = pnand %p8764_p5, %p8758_p2 }
  0x54   :  { %8768 = shalt.err (!%p8765_p6)
}
  0x55   :  { %s8790_s6 = smov 448   ;;  %s8791_s3 = smov 28  }
  0x56   :  { %132 = dma.hbm_to_vmem [thread:$0]  %s9192_s16, 28672, %s127_s8, [#allocation11], %s8790_s6, %s8790_s6, %s8791_s3  }
  0x57   :  { %8769 = dma.done.wait [#allocation3], 28672  }
  0x58   :  { %8770 = vsyncadd [#allocation3], 4294938624 }
  0x59   :  { %8771 = dma.done.wait [#allocation5], 18432  }
  0x5a   :  { %8772 = vsyncadd [#allocation5], 4294948864 }
  0x5b   :  { %8773 = dma.done.wait [#allocation8], 10240  }
  0x5c   :  { %8774 = vsyncadd [#allocation8], 4294957056 }
  0x5d   :  { %8775 = dma.done.wait [#allocation11], 40960  }
  0x5e   :  { %8776 = vsyncadd [#allocation11], 4294926336  ;;  %v7469_v0 = vld [vmem:[#allocation2 + $0xe4] ss:$16 sps:$4 sm:$0xff]   ;;  %v7473_v2 = vld [vmem:[#allocation2 + $0xe0] ss:$16 sps:$4 sm:$0xff]  }
  0x5f   :  { %v7471_v1 = vld [vmem:[#allocation2 + $0x2e4] ss:$16 sps:$4 sm:$0xff]   ;;  %1552 = vmatprep.subr.bf16.mxu0 %v7469_v0  ;;  %v7474_v3 = vld [vmem:[#allocation2 + $0x2e0] ss:$16 sps:$4 sm:$0xff]   ;;  %s9206_s21 = sld [smem:[#allocation17_spill]] }
  0x60   :  { %1593 = vmatprep.subr.bf16.mxu1 %v7471_v1  ;;  %v7475_v4 = vld [vmem:[#allocation2 + $0xc4] ss:$16 sps:$4 sm:$0xff]   ;;  %1553 = vmatpush1.bf16.msra.mxu0 %v7473_v2  ;;  %v7479_v6 = vld [vmem:[#allocation2 + $0xc0] ss:$16 sps:$4 sm:$0xff]   ;;  %s9207_s23 = sld [smem:[#allocation20_spill]] }
  0x61   :  { %1594 = vmatpush1.bf16.msra.mxu1 %v7474_v3  ;;  %v7477_v5 = vld [vmem:[#allocation2 + $0x2c4] ss:$16 sps:$4 sm:$0xff]   ;;  %1554 = vmatprep.subr.bf16.mxu0 %v7475_v4  ;;  %v7480_v7 = vld [vmem:[#allocation2 + $0x2c0] ss:$16 sps:$4 sm:$0xff]   ;;  %s9208_s22 = sld [smem:[#allocation18_spill]] }
  0x62   :  { %1595 = vmatprep.subr.bf16.mxu1 %v7477_v5  ;;  %v7481_v8 = vld [vmem:[#allocation2 + $0xa4] ss:$16 sps:$4 sm:$0xff]   ;;  %v7485_v10 = vld [vmem:[#allocation2 + $0xa0] ss:$16 sps:$4 sm:$0xff]  }
  0x63   :  { %v7483_v9 = vld [vmem:[#allocation2 + $0x2a4] ss:$16 sps:$4 sm:$0xff]   ;;  %v7486_v11 = vld [vmem:[#allocation2 + $0x2a0] ss:$16 sps:$4 sm:$0xff]  }
  0x64   :  { %1555 = vmatpush1.bf16.msra.mxu0 %v7479_v6  ;;  %v7487_v12 = vld [vmem:[#allocation2 + $0x84] ss:$16 sps:$4 sm:$0xff]   ;;  %v7491_v14 = vld [vmem:[#allocation2 + $0x80] ss:$16 sps:$4 sm:$0xff]  }
  0x65   :  { %1596 = vmatpush1.bf16.msra.mxu1 %v7480_v7  ;;  %1556 = vmatprep.subr.bf16.mxu0 %v7481_v8  ;;  %v7489_v13 = vld [vmem:[#allocation2 + $0x284] ss:$16 sps:$4 sm:$0xff]   ;;  %v7492_v15 = vld [vmem:[#allocation2 + $0x280] ss:$16 sps:$4 sm:$0xff]   ;;  %v158_v48 = vld [vmem:[%s9206_s21 + $0x8] sm:$0xff] }
  0x66   :  { %1597 = vmatprep.subr.bf16.mxu1 %v7483_v9  ;;  %v7493_v16 = vld [vmem:[#allocation2 + $0x64] ss:$16 sps:$4 sm:$0xff]   ;;  %v7497_v18 = vld [vmem:[#allocation2 + $0x60] ss:$16 sps:$4 sm:$0xff]   ;;  %v8934_v51 = vcombine.high %v158_v48, %v158_v48  ;;  %v8940_v7 = vcombine.low %v158_v48, %v158_v48  ;;  %v7629_v48 = vld [vmem:[#allocation2 + $0xcc] ss:$16 sps:$4 sm:$0xff]  }
  0x67   :  { %v7495_v17 = vld [vmem:[#allocation2 + $0x264] ss:$16 sps:$4 sm:$0xff]   ;;  %v7498_v19 = vld [vmem:[#allocation2 + $0x260] ss:$16 sps:$4 sm:$0xff]  }
  0x68   :  { %1557 = vmatpush1.bf16.msra.mxu0 %v7485_v10  ;;  %v7499_v20 = vld [vmem:[#allocation2 + $0x44] ss:$16 sps:$4 sm:$0xff]   ;;  %v7503_v22 = vld [vmem:[#allocation2 + $0x40] ss:$16 sps:$4 sm:$0xff]   ;;  %1625 = vmatprep.mubr.bf16.mxu1 %v8934_v51 }
  0x69   :  { %1598 = vmatpush1.bf16.msra.mxu1 %v7486_v11  ;;  %1558 = vmatprep.subr.bf16.mxu0 %v7487_v12  ;;  %v7501_v21 = vld [vmem:[#allocation2 + $0x244] ss:$16 sps:$4 sm:$0xff]   ;;  %v7504_v23 = vld [vmem:[#allocation2 + $0x240] ss:$16 sps:$4 sm:$0xff]  }
  0x6a   :  { %1599 = vmatprep.subr.bf16.mxu1 %v7489_v13  ;;  %v7505_v24 = vld [vmem:[#allocation2 + $0x24] ss:$16 sps:$4 sm:$0xff]   ;;  %v7509_v26 = vld [vmem:[#allocation2 + $0x20] ss:$16 sps:$4 sm:$0xff]  }
  0x6b   :  { %v7507_v25 = vld [vmem:[#allocation2 + $0x224] ss:$16 sps:$4 sm:$0xff]   ;;  %v7510_v27 = vld [vmem:[#allocation2 + $0x220] ss:$16 sps:$4 sm:$0xff]  }
  0x6c   :  { %1559 = vmatpush1.bf16.msra.mxu0 %v7491_v14  ;;  %v7511_v28 = vld [vmem:[#allocation2 + $0x4] ss:$16 sps:$4 sm:$0xff]   ;;  %v7515_v30 = vld [vmem:[#allocation2] ss:$16 sps:$4 sm:$0xff]  }
  0x6d   :  { %1600 = vmatpush1.bf16.msra.mxu1 %v7492_v15  ;;  %1560 = vmatprep.subr.bf16.mxu0 %v7493_v16  ;;  %v7513_v29 = vld [vmem:[#allocation2 + $0x204] ss:$16 sps:$4 sm:$0xff]   ;;  %v7516_v31 = vld [vmem:[#allocation2 + $0x200] ss:$16 sps:$4 sm:$0xff]   ;;  %v8792_v16 = vmov 0  }
  0x6e   :  { %1601 = vmatprep.subr.bf16.mxu1 %v7495_v17  ;;  %v7517_v32 = vld [vmem:[#allocation2 + $0x1e4] ss:$16 sps:$4 sm:$0xff]   ;;  %v7521_v34 = vld [vmem:[#allocation2 + $0x1e0] ss:$16 sps:$4 sm:$0xff]  }
  0x6f   :  { %v7519_v33 = vld [vmem:[#allocation2 + $0x3e4] ss:$16 sps:$4 sm:$0xff]   ;;  %v7522_v35 = vld [vmem:[#allocation2 + $0x3e0] ss:$16 sps:$4 sm:$0xff]  }
  0x70   :  { %1561 = vmatpush1.bf16.msra.mxu0 %v7497_v18  ;;  %v7523_v36 = vld [vmem:[#allocation2 + $0x1c4] ss:$16 sps:$4 sm:$0xff]   ;;  %v7527_v38 = vld [vmem:[#allocation2 + $0x1c0] ss:$16 sps:$4 sm:$0xff]  }
  0x71   :  { %1602 = vmatpush1.bf16.msra.mxu1 %v7498_v19  ;;  %1562 = vmatprep.subr.bf16.mxu0 %v7499_v20  ;;  %v7525_v37 = vld [vmem:[#allocation2 + $0x3c4] ss:$16 sps:$4 sm:$0xff]   ;;  %v7528_v39 = vld [vmem:[#allocation2 + $0x3c0] ss:$16 sps:$4 sm:$0xff]  }
  0x72   :  { %1603 = vmatprep.subr.bf16.mxu1 %v7501_v21  ;;  %v7529_v40 = vld [vmem:[#allocation2 + $0x1a4] ss:$16 sps:$4 sm:$0xff]   ;;  %v7533_v42 = vld [vmem:[#allocation2 + $0x1a0] ss:$16 sps:$4 sm:$0xff]  }
  0x73   :  { %v7531_v41 = vld [vmem:[#allocation2 + $0x3a4] ss:$16 sps:$4 sm:$0xff]   ;;  %v7534_v43 = vld [vmem:[#allocation2 + $0x3a0] ss:$16 sps:$4 sm:$0xff]  }
  0x74   :  { %1563 = vmatpush1.bf16.msra.mxu0 %v7503_v22  ;;  %v7535_v44 = vld [vmem:[#allocation2 + $0x184] ss:$16 sps:$4 sm:$0xff]   ;;  %v7539_v49 = vld [vmem:[#allocation2 + $0x180] ss:$16 sps:$4 sm:$0xff]  }
  0x75   :  { %1604 = vmatpush1.bf16.msra.mxu1 %v7504_v23  ;;  %1564 = vmatprep.subr.bf16.mxu0 %v7505_v24  ;;  %v7537_v45 = vld [vmem:[#allocation2 + $0x384] ss:$16 sps:$4 sm:$0xff]   ;;  %v7540_v50 = vld [vmem:[#allocation2 + $0x380] ss:$16 sps:$4 sm:$0xff]  }
  0x76   :  { %1605 = vmatprep.subr.bf16.mxu1 %v7507_v25  ;;  %v157_v46 = vld [vmem:[%s9206_s21] sm:$0xff] }
  0x77   :  { %v8929_v47 = vcombine.high %v157_v46, %v157_v46  ;;  %v7541_v52 = vld [vmem:[#allocation2 + $0x164] ss:$16 sps:$4 sm:$0xff]   ;;  %v7545_v54 = vld [vmem:[#allocation2 + $0x160] ss:$16 sps:$4 sm:$0xff]   ;;  %v8938_v6 = vcombine.low %v157_v46, %v157_v46 }
  0x78   :  { %1565 = vmatpush1.bf16.msra.mxu0 %v7509_v26  ;;  %v7543_v53 = vld [vmem:[#allocation2 + $0x364] ss:$16 sps:$4 sm:$0xff]   ;;  %v7546_v55 = vld [vmem:[#allocation2 + $0x360] ss:$16 sps:$4 sm:$0xff]  }
  0x79   :  { %1606 = vmatpush1.bf16.msra.mxu1 %v7510_v27  ;;  %1566 = vmatprep.subr.bf16.mxu0 %v7511_v28  ;;  %v7547_v56 = vld [vmem:[#allocation2 + $0x144] ss:$16 sps:$4 sm:$0xff]   ;;  %v7551_v58 = vld [vmem:[#allocation2 + $0x140] ss:$16 sps:$4 sm:$0xff]  }
  0x7a   :  { %1607 = vmatprep.subr.bf16.mxu1 %v7513_v29  ;;  %1584 = vmatprep.mubr.bf16.mxu0 %v8929_v47  ;;  %v7549_v57 = vld [vmem:[#allocation2 + $0x344] ss:$16 sps:$4 sm:$0xff]   ;;  %v7552_v59 = vld [vmem:[#allocation2 + $0x340] ss:$16 sps:$4 sm:$0xff]  }
  0x7b   :  { %v7553_v60 = vld [vmem:[#allocation2 + $0x124] ss:$16 sps:$4 sm:$0xff]   ;;  %v7557_v62 = vld [vmem:[#allocation2 + $0x120] ss:$16 sps:$4 sm:$0xff]  }
  0x7c   :  { %1567 = vmatpush1.bf16.msra.mxu0 %v7515_v30  ;;  %v7555_v61 = vld [vmem:[#allocation2 + $0x324] ss:$16 sps:$4 sm:$0xff]   ;;  %v7558_v63 = vld [vmem:[#allocation2 + $0x320] ss:$16 sps:$4 sm:$0xff]  }
  0x7d   :  { %1608 = vmatpush1.bf16.msra.mxu1 %v7516_v31  ;;  %1568 = vmatprep.subr.bf16.mxu0 %v7517_v32  ;;  %v7559_v0 = vld [vmem:[#allocation2 + $0x104] ss:$16 sps:$4 sm:$0xff]   ;;  %v7563_v2 = vld [vmem:[#allocation2 + $0x100] ss:$16 sps:$4 sm:$0xff]  }
  0x7e   :  { %1609 = vmatprep.subr.bf16.mxu1 %v7519_v33  ;;  %v7561_v1 = vld [vmem:[#allocation2 + $0x304] ss:$16 sps:$4 sm:$0xff]   ;;  %v7564_v3 = vld [vmem:[#allocation2 + $0x300] ss:$16 sps:$4 sm:$0xff]  }
  0x7f   :  { %v7571_v4 = vld [vmem:[#allocation2 + $0x4e4] ss:$16 sps:$4 sm:$0xff]   ;;  %v7569_v8 = vld [vmem:[#allocation2 + $0x4e0] ss:$16 sps:$4 sm:$0xff]  }
  0x80   :  { %1569 = vmatpush2.bf16.msra.mxu0 %v7521_v34  ;;  %v7574_v5 = vld [vmem:[#allocation2 + $0x6e4] ss:$16 sps:$4 sm:$0xff]   ;;  %v7572_v9 = vld [vmem:[#allocation2 + $0x6e0] ss:$16 sps:$4 sm:$0xff]  }
  0x81   :  { %1610 = vmatpush2.bf16.msra.mxu1 %v7522_v35  ;;  %1570 = vmatprep.subr.bf16.mxu0 %v7523_v36  ;;  %v7577_v10 = vld [vmem:[#allocation2 + $0x4c4] ss:$16 sps:$4 sm:$0xff]   ;;  %v7575_v12 = vld [vmem:[#allocation2 + $0x4c0] ss:$16 sps:$4 sm:$0xff]  }
  0x82   :  { %1611 = vmatprep.subr.bf16.mxu1 %v7525_v37  ;;  %v7580_v11 = vld [vmem:[#allocation2 + $0x6c4] ss:$16 sps:$4 sm:$0xff]   ;;  %v7578_v13 = vld [vmem:[#allocation2 + $0x6c0] ss:$16 sps:$4 sm:$0xff]  }
  0x83   :  { %v7583_v14 = vld [vmem:[#allocation2 + $0x4a4] ss:$16 sps:$4 sm:$0xff]   ;;  %v7581_v17 = vld [vmem:[#allocation2 + $0x4a0] ss:$16 sps:$4 sm:$0xff]  }
  0x84   :  { %1571 = vmatpush2.bf16.msra.mxu0 %v7527_v38  ;;  %v7586_v15 = vld [vmem:[#allocation2 + $0x6a4] ss:$16 sps:$4 sm:$0xff]   ;;  %v7584_v18 = vld [vmem:[#allocation2 + $0x6a0] ss:$16 sps:$4 sm:$0xff]  }
  0x85   :  { %1612 = vmatpush2.bf16.msra.mxu1 %v7528_v39  ;;  %1572 = vmatprep.subr.bf16.mxu0 %v7529_v40  ;;  %v7589_v19 = vld [vmem:[#allocation2 + $0x484] ss:$16 sps:$4 sm:$0xff]   ;;  %v7587_v21 = vld [vmem:[#allocation2 + $0x480] ss:$16 sps:$4 sm:$0xff]  }
  0x86   :  { %1613 = vmatprep.subr.bf16.mxu1 %v7531_v41  ;;  %v7592_v20 = vld [vmem:[#allocation2 + $0x684] ss:$16 sps:$4 sm:$0xff]   ;;  %v7590_v22 = vld [vmem:[#allocation2 + $0x680] ss:$16 sps:$4 sm:$0xff]  }
  0x87   :  { %v7595_v23 = vld [vmem:[#allocation2 + $0x464] ss:$16 sps:$4 sm:$0xff]   ;;  %v7593_v25 = vld [vmem:[#allocation2 + $0x460] ss:$16 sps:$4 sm:$0xff]  }
  0x88   :  { %1573 = vmatpush2.bf16.msra.mxu0 %v7533_v42  ;;  %v7598_v24 = vld [vmem:[#allocation2 + $0x664] ss:$16 sps:$4 sm:$0xff]   ;;  %v7596_v26 = vld [vmem:[#allocation2 + $0x660] ss:$16 sps:$4 sm:$0xff]   ;;  %v7623_v42 = vld [vmem:[#allocation2 + $0xec] ss:$16 sps:$4 sm:$0xff]  }
  0x89   :  { %1614 = vmatpush2.bf16.msra.mxu1 %v7534_v43  ;;  %1574 = vmatprep.subr.bf16.mxu0 %v7535_v44  ;;  %v7601_v27 = vld [vmem:[#allocation2 + $0x444] ss:$16 sps:$4 sm:$0xff]   ;;  %v7599_v29 = vld [vmem:[#allocation2 + $0x440] ss:$16 sps:$4 sm:$0xff]   ;;  %v7620_v44 = vld [vmem:[%s9206_s21 + $0x18] ss:$0 sps:$4 sm:$0xff]  }
  0x8a   :  { %1615 = vmatprep.subr.bf16.mxu1 %v7537_v45  ;;  %v7604_v28 = vld [vmem:[#allocation2 + $0x644] ss:$16 sps:$4 sm:$0xff]   ;;  %v7602_v30 = vld [vmem:[#allocation2 + $0x640] ss:$16 sps:$4 sm:$0xff]   ;;  %v7621_v45 = vld [vmem:[#allocation2 + $0xe8] ss:$16 sps:$4 sm:$0xff]  }
  0x8b   :  { %v7607_v31 = vld [vmem:[#allocation2 + $0x424] ss:$16 sps:$4 sm:$0xff]   ;;  %v7605_v34 = vld [vmem:[#allocation2 + $0x420] ss:$16 sps:$4 sm:$0xff]  }
  0x8c   :  { %1575 = vmatpush2.bf16.msra.mxu0 %v7539_v49  ;;  %v7610_v32 = vld [vmem:[#allocation2 + $0x624] ss:$16 sps:$4 sm:$0xff]   ;;  %v7608_v36 = vld [vmem:[#allocation2 + $0x620] ss:$16 sps:$4 sm:$0xff]  }
  0x8d   :  { %1616 = vmatpush2.bf16.msra.mxu1 %v7540_v50  ;;  %1576 = vmatprep.subr.bf16.mxu0 %v7541_v52  ;;  %v8948_v33 = vld [vmem:[%s9206_s21 + $0x10] sm:$0xff]  ;;  %v7627_v50 = vld [vmem:[#allocation2 + $0xc8] ss:$16 sps:$4 sm:$0xff]  }
  0x8e   :  { %1617 = vmatprep.subr.bf16.mxu1 %v7543_v53  ;;  %v8952_v35 = vcombine.high %v8948_v33, %v8948_v33  ;;  %v7613_v37 = vld [vmem:[#allocation2 + $0x404] ss:$16 sps:$4 sm:$0xff]   ;;  %v7611_v39 = vld [vmem:[#allocation2 + $0x400] ss:$16 sps:$4 sm:$0xff]   ;;  %v7635_v53 = vld [vmem:[#allocation2 + $0xac] ss:$16 sps:$4 sm:$0xff]  }
  0x8f   :  { %v7616_v38 = vld [vmem:[#allocation2 + $0x604] ss:$16 sps:$4 sm:$0xff]   ;;  %v7614_v40 = vld [vmem:[#allocation2 + $0x600] ss:$16 sps:$4 sm:$0xff]  }
  0x90   :  { %1577 = vmatpush2.bf16.msra.mxu0 %v7545_v54  ;;  %v7619_v41 = vld [vmem:[#allocation2 + $0x5e4] ss:$16 sps:$4 sm:$0xff]   ;;  %v7617_v43 = vld [vmem:[#allocation2 + $0x5e0] ss:$16 sps:$4 sm:$0xff]  }
  0x91   :  { %1618 = vmatpush2.bf16.msra.mxu1 %v7546_v55  ;;  %1578 = vmatprep.subr.bf16.mxu0 %v7547_v56  ;;  %v7626_v46 = vld [vmem:[#allocation2 + $0x5c4] ss:$16 sps:$4 sm:$0xff]   ;;  %v7624_v49 = vld [vmem:[#allocation2 + $0x5c0] ss:$16 sps:$4 sm:$0xff]   ;;  %v7633_v55 = vld [vmem:[#allocation2 + $0xa8] ss:$16 sps:$4 sm:$0xff]  }
  0x92   :  { %1619 = vmatprep.subr.bf16.mxu1 %v7549_v57  ;;  %v7632_v52 = vld [vmem:[#allocation2 + $0x5a4] ss:$16 sps:$4 sm:$0xff]   ;;  %v7630_v54 = vld [vmem:[#allocation2 + $0x5a0] ss:$16 sps:$4 sm:$0xff]   ;;  %v7641_v57 = vld [vmem:[#allocation2 + $0x8c] ss:$16 sps:$4 sm:$0xff]  }
  0x93   :  { %v7638_v56 = vld [vmem:[#allocation2 + $0x584] ss:$16 sps:$4 sm:$0xff]  }
  0x94   :  { %1579 = vmatpush2.bf16.msra.mxu0 %v7551_v58  ;;  %v7636_v58 = vld [vmem:[#allocation2 + $0x580] ss:$16 sps:$4 sm:$0xff]  }
  0x95   :  { %1620 = vmatpush2.bf16.msra.mxu1 %v7552_v59  ;;  %1580 = vmatprep.subr.bf16.mxu0 %v7553_v60  ;;  %v7639_v59 = vld [vmem:[#allocation2 + $0x88] ss:$16 sps:$4 sm:$0xff]   ;;  %v7644_v60 = vld [vmem:[#allocation2 + $0x564] ss:$16 sps:$4 sm:$0xff]  }
  0x96   :  { %1621 = vmatprep.subr.bf16.mxu1 %v7555_v61  ;;  %v7647_v61 = vld [vmem:[#allocation2 + $0x6c] ss:$16 sps:$4 sm:$0xff]  }
  0x98   :  { %1581 = vmatpush2.bf16.msra.mxu0 %v7557_v62  ;;  %v7642_v62 = vld [vmem:[#allocation2 + $0x560] ss:$16 sps:$4 sm:$0xff]  }
  0x99   :  { %1622 = vmatpush2.bf16.msra.mxu1 %v7558_v63  ;;  %1582 = vmatprep.subr.bf16.mxu0 %v7559_v0  ;;  %v7650_v63 = vld [vmem:[#allocation2 + $0x544] ss:$16 sps:$4 sm:$0xff]   ;;  %v7653_v0 = vld [vmem:[#allocation2 + $0x4c] ss:$16 sps:$4 sm:$0xff]  }
  0x9a   :  { %1623 = vmatprep.subr.bf16.mxu1 %v7561_v1  ;;  %v7648_v1 = vld [vmem:[#allocation2 + $0x540] ss:$16 sps:$4 sm:$0xff]  }
  0x9c   :  { %1583 = vmatpush2.bf16.msra.mxu0 %v7563_v2  ;;  %v7651_v2 = vld [vmem:[#allocation2 + $0x48] ss:$16 sps:$4 sm:$0xff]  }
  0x9d   :  { %1624 = vmatpush2.bf16.msra.mxu1 %v7564_v3  ;;  %1634 = vmatprep.subr.bf16.mxu0 %v7571_v4  ;;  %v7656_v3 = vld [vmem:[#allocation2 + $0x524] ss:$16 sps:$4 sm:$0xff]   ;;  %v7659_v4 = vld [vmem:[#allocation2 + $0x2c] ss:$16 sps:$4 sm:$0xff]  }
  0x9e   :  { %1675 = vmatprep.subr.bf16.mxu1 %v7574_v5  ;;  %v7654_v5 = vld [vmem:[#allocation2 + $0x520] ss:$16 sps:$4 sm:$0xff]  }
  0x9f   :  { %1585 = vmatmul.mubr.bf16.vlgmr.msra.gmra.mxu0 %v8938_v6 }
  0xa0   :  { %1626 = vmatmul.mubr.bf16.vlgmr.msra.gmra.mxu1 %v8940_v7  ;;  %1635 = vmatpush1.bf16.msra.mxu0 %v7569_v8  ;;  %v7657_v8 = vld [vmem:[#allocation2 + $0x28] ss:$16 sps:$4 sm:$0xff]  }
  0xa1   :  { %1676 = vmatpush1.bf16.msra.mxu1 %v7572_v9  ;;  %1636 = vmatprep.subr.bf16.mxu0 %v7577_v10  ;;  %v7662_v9 = vld [vmem:[#allocation2 + $0x504] ss:$16 sps:$4 sm:$0xff]   ;;  %v7665_v10 = vld [vmem:[#allocation2 + $0xc] ss:$16 sps:$4 sm:$0xff]  }
  0xa2   :  { %1677 = vmatprep.subr.bf16.mxu1 %v7580_v11  ;;  %1707 = vmatprep.mubr.bf16.mxu1 %v8792_v16  ;;  %v7660_v11 = vld [vmem:[#allocation2 + $0x500] ss:$16 sps:$4 sm:$0xff]  }
  0xa3   :  { %1666 = vmatprep.mubr.bf16.mxu0 %v8952_v35 }
  0xa4   :  { %1637 = vmatpush1.bf16.msra.mxu0 %v7575_v12  ;;  %v7663_v12 = vld [vmem:[#allocation2 + $0x8] ss:$16 sps:$4 sm:$0xff]  }
  0xa5   :  { %1678 = vmatpush1.bf16.msra.mxu1 %v7578_v13  ;;  %1638 = vmatprep.subr.bf16.mxu0 %v7583_v14  ;;  %v7670_v13 = vld [vmem:[#allocation2 + $0x1ec] ss:$16 sps:$4 sm:$0xff]  }
  0xa6   :  { %1679 = vmatprep.subr.bf16.mxu1 %v7586_v15  ;;  %v7673_v14 = vld [vmem:[#allocation2 + $0x2ec] ss:$16 sps:$4 sm:$0xff]   ;;  %v8961_v15 = vcombine.low %v8948_v33, %v8948_v33  ;;  %v7692_v33 = vld [vmem:[#allocation2 + $0x168] ss:$16 sps:$4 sm:$0xff]  }
  0xa8   :  { %1639 = vmatpush1.bf16.msra.mxu0 %v7581_v17  ;;  %v7668_v17 = vld [vmem:[#allocation2 + $0x1e8] ss:$16 sps:$4 sm:$0xff]  }
  0xa9   :  { %1680 = vmatpush1.bf16.msra.mxu1 %v7584_v18  ;;  %1640 = vmatprep.subr.bf16.mxu0 %v7589_v19  ;;  %v7671_v18 = vld [vmem:[#allocation2 + $0x2e8] ss:$16 sps:$4 sm:$0xff]   ;;  %v7676_v19 = vld [vmem:[#allocation2 + $0x1cc] ss:$16 sps:$4 sm:$0xff]  }
  0xaa   :  { %1681 = vmatprep.subr.bf16.mxu1 %v7592_v20  ;;  %v7679_v20 = vld [vmem:[#allocation2 + $0x2cc] ss:$16 sps:$4 sm:$0xff]  }
  0xac   :  { %1641 = vmatpush1.bf16.msra.mxu0 %v7587_v21  ;;  %v7674_v21 = vld [vmem:[#allocation2 + $0x1c8] ss:$16 sps:$4 sm:$0xff]  }
  0xad   :  { %1682 = vmatpush1.bf16.msra.mxu1 %v7590_v22  ;;  %1642 = vmatprep.subr.bf16.mxu0 %v7595_v23  ;;  %v7677_v22 = vld [vmem:[#allocation2 + $0x2c8] ss:$16 sps:$4 sm:$0xff]   ;;  %v7682_v23 = vld [vmem:[#allocation2 + $0x1ac] ss:$16 sps:$4 sm:$0xff]  }
  0xae   :  { %1683 = vmatprep.subr.bf16.mxu1 %v7598_v24  ;;  %v7685_v24 = vld [vmem:[#allocation2 + $0x2ac] ss:$16 sps:$4 sm:$0xff]  }
  0xb0   :  { %1643 = vmatpush1.bf16.msra.mxu0 %v7593_v25  ;;  %v7680_v25 = vld [vmem:[#allocation2 + $0x1a8] ss:$16 sps:$4 sm:$0xff]  }
  0xb1   :  { %1684 = vmatpush1.bf16.msra.mxu1 %v7596_v26  ;;  %1644 = vmatprep.subr.bf16.mxu0 %v7601_v27  ;;  %v7683_v26 = vld [vmem:[#allocation2 + $0x2a8] ss:$16 sps:$4 sm:$0xff]   ;;  %v7688_v27 = vld [vmem:[#allocation2 + $0x18c] ss:$16 sps:$4 sm:$0xff]  }
  0xb2   :  { %1685 = vmatprep.subr.bf16.mxu1 %v7604_v28  ;;  %v7691_v28 = vld [vmem:[#allocation2 + $0x28c] ss:$16 sps:$4 sm:$0xff]  }
  0xb4   :  { %1645 = vmatpush1.bf16.msra.mxu0 %v7599_v29  ;;  %v7686_v29 = vld [vmem:[#allocation2 + $0x188] ss:$16 sps:$4 sm:$0xff]  }
  0xb5   :  { %1686 = vmatpush1.bf16.msra.mxu1 %v7602_v30  ;;  %1646 = vmatprep.subr.bf16.mxu0 %v7607_v31  ;;  %v7689_v30 = vld [vmem:[#allocation2 + $0x288] ss:$16 sps:$4 sm:$0xff]   ;;  %v7694_v31 = vld [vmem:[#allocation2 + $0x16c] ss:$16 sps:$4 sm:$0xff]  }
  0xb6   :  { %1687 = vmatprep.subr.bf16.mxu1 %v7610_v32  ;;  %v7697_v32 = vld [vmem:[#allocation2 + $0x26c] ss:$16 sps:$4 sm:$0xff]  }
  0xb8   :  { %1647 = vmatpush1.bf16.msra.mxu0 %v7605_v34  ;;  %v7700_v34 = vld [vmem:[#allocation2 + $0x14c] ss:$16 sps:$4 sm:$0xff]  }
  0xb9   :  { %1688 = vmatpush1.bf16.msra.mxu1 %v7608_v36  ;;  %1648 = vmatprep.subr.bf16.mxu0 %v7613_v37  ;;  %v7703_v36 = vld [vmem:[#allocation2 + $0x24c] ss:$16 sps:$4 sm:$0xff]   ;;  %v7698_v37 = vld [vmem:[#allocation2 + $0x148] ss:$16 sps:$4 sm:$0xff]  }
  0xba   :  { %1689 = vmatprep.subr.bf16.mxu1 %v7616_v38  ;;  %v7701_v38 = vld [vmem:[#allocation2 + $0x248] ss:$16 sps:$4 sm:$0xff]  }
  0xbc   :  { %1649 = vmatpush1.bf16.msra.mxu0 %v7611_v39  ;;  %v7706_v39 = vld [vmem:[#allocation2 + $0x12c] ss:$16 sps:$4 sm:$0xff]  }
  0xbd   :  { %1690 = vmatpush1.bf16.msra.mxu1 %v7614_v40  ;;  %1650 = vmatprep.subr.bf16.mxu0 %v7619_v41  ;;  %v7709_v40 = vld [vmem:[#allocation2 + $0x22c] ss:$16 sps:$4 sm:$0xff]   ;;  %v7704_v41 = vld [vmem:[#allocation2 + $0x128] ss:$16 sps:$4 sm:$0xff]  }
  0xbe   :  { %1716 = vmatprep.subr.bf16.mxu1 %v7623_v42  ;;  %v7707_v42 = vld [vmem:[#allocation2 + $0x228] ss:$16 sps:$4 sm:$0xff]  }
  0xc0   :  { %1708 = vmatmul.mubr.bf16.vlgmr.msra.gmra.mxu1 %v7620_v44  ;;  %1651 = vmatpush2.bf16.msra.mxu0 %v7617_v43  ;;  %v7712_v43 = vld [vmem:[#allocation2 + $0x10c] ss:$16 sps:$4 sm:$0xff]  }
  0xc1   :  { %1717 = vmatpush1.bf16.msra.mxu1 %v7621_v45  ;;  %1652 = vmatprep.subr.bf16.mxu0 %v7626_v46  ;;  %v7715_v44 = vld [vmem:[#allocation2 + $0x20c] ss:$16 sps:$4 sm:$0xff]   ;;  %v7710_v45 = vld [vmem:[#allocation2 + $0x108] ss:$16 sps:$4 sm:$0xff]  }
  0xc2   :  { %1718 = vmatprep.subr.bf16.mxu1 %v7629_v48  ;;  %1748 = vmatprep.mubr.bf16.mxu1 %v8929_v47  ;;  %v7645_v47 = vld [vmem:[#allocation2 + $0x68] ss:$16 sps:$4 sm:$0xff]   ;;  %v7718_v48 = vld [vmem:[#allocation2 + $0x3ec] ss:$16 sps:$4 sm:$0xff]  }
  0xc3   :  { %v7713_v46 = vld [vmem:[#allocation2 + $0x208] ss:$16 sps:$4 sm:$0xff]  }
  0xc4   :  { %1653 = vmatpush2.bf16.msra.mxu0 %v7624_v49  ;;  %v7721_v49 = vld [vmem:[#allocation2 + $0x4ec] ss:$16 sps:$4 sm:$0xff]  }
  0xc5   :  { %1719 = vmatpush1.bf16.msra.mxu1 %v7627_v50  ;;  %1654 = vmatprep.subr.bf16.mxu0 %v7632_v52  ;;  %v7716_v50 = vld [vmem:[#allocation2 + $0x3e8] ss:$16 sps:$4 sm:$0xff]  }
  0xc6   :  { %1720 = vmatprep.subr.bf16.mxu1 %v7635_v53  ;;  %v7719_v52 = vld [vmem:[#allocation2 + $0x4e8] ss:$16 sps:$4 sm:$0xff]   ;;  %v7724_v53 = vld [vmem:[#allocation2 + $0x3cc] ss:$16 sps:$4 sm:$0xff]  }
  0xc8   :  { %1655 = vmatpush2.bf16.msra.mxu0 %v7630_v54  ;;  %v7727_v54 = vld [vmem:[#allocation2 + $0x4cc] ss:$16 sps:$4 sm:$0xff]  }
  0xc9   :  { %1721 = vmatpush1.bf16.msra.mxu1 %v7633_v55  ;;  %1656 = vmatprep.subr.bf16.mxu0 %v7638_v56  ;;  %v7722_v55 = vld [vmem:[#allocation2 + $0x3c8] ss:$16 sps:$4 sm:$0xff]  }
  0xca   :  { %1722 = vmatprep.subr.bf16.mxu1 %v7641_v57  ;;  %v7725_v56 = vld [vmem:[#allocation2 + $0x4c8] ss:$16 sps:$4 sm:$0xff]   ;;  %v7730_v57 = vld [vmem:[#allocation2 + $0x3ac] ss:$16 sps:$4 sm:$0xff]  }
  0xcc   :  { %1657 = vmatpush2.bf16.msra.mxu0 %v7636_v58  ;;  %v7733_v58 = vld [vmem:[#allocation2 + $0x4ac] ss:$16 sps:$4 sm:$0xff]  }
  0xcd   :  { %1723 = vmatpush1.bf16.msra.mxu1 %v7639_v59  ;;  %1658 = vmatprep.subr.bf16.mxu0 %v7644_v60  ;;  %v7728_v59 = vld [vmem:[#allocation2 + $0x3a8] ss:$16 sps:$4 sm:$0xff]  }
  0xce   :  { %1724 = vmatprep.subr.bf16.mxu1 %v7647_v61  ;;  %v7731_v60 = vld [vmem:[#allocation2 + $0x4a8] ss:$16 sps:$4 sm:$0xff]   ;;  %v7736_v61 = vld [vmem:[#allocation2 + $0x38c] ss:$16 sps:$4 sm:$0xff]  }
  0xd0   :  { %1659 = vmatpush2.bf16.msra.mxu0 %v7642_v62  ;;  %v7739_v62 = vld [vmem:[#allocation2 + $0x48c] ss:$16 sps:$4 sm:$0xff]  }
  0xd1   :  { %1725 = vmatpush1.bf16.msra.mxu1 %v7645_v47  ;;  %1660 = vmatprep.subr.bf16.mxu0 %v7650_v63  ;;  %v7734_v47 = vld [vmem:[#allocation2 + $0x388] ss:$16 sps:$4 sm:$0xff]   ;;  %v7742_v63 = vld [vmem:[#allocation2 + $0x36c] ss:$16 sps:$4 sm:$0xff]  }
  0xd2   :  { %1726 = vmatprep.subr.bf16.mxu1 %v7653_v0  ;;  %v7745_v0 = vld [vmem:[#allocation2 + $0x46c] ss:$16 sps:$4 sm:$0xff]  }
  0xd4   :  { %1661 = vmatpush2.bf16.msra.mxu0 %v7648_v1  ;;  %v7740_v1 = vld [vmem:[#allocation2 + $0x368] ss:$16 sps:$4 sm:$0xff]  }
  0xd5   :  { %1727 = vmatpush1.bf16.msra.mxu1 %v7651_v2  ;;  %1662 = vmatprep.subr.bf16.mxu0 %v7656_v3  ;;  %v7743_v2 = vld [vmem:[#allocation2 + $0x468] ss:$16 sps:$4 sm:$0xff]   ;;  %v7748_v3 = vld [vmem:[#allocation2 + $0x34c] ss:$16 sps:$4 sm:$0xff]  }
  0xd6   :  { %1728 = vmatprep.subr.bf16.mxu1 %v7659_v4  ;;  %v7751_v4 = vld [vmem:[#allocation2 + $0x44c] ss:$16 sps:$4 sm:$0xff]  }
  0xd8   :  { %1663 = vmatpush2.bf16.msra.mxu0 %v7654_v5  ;;  %v7749_v5 = vld [vmem:[#allocation2 + $0x448] ss:$16 sps:$4 sm:$0xff]  }
  0xd9   :  { %1729 = vmatpush1.bf16.msra.mxu1 %v7657_v8  ;;  %1664 = vmatprep.subr.bf16.mxu0 %v7662_v9  ;;  %v7754_v8 = vld [vmem:[#allocation2 + $0x32c] ss:$16 sps:$4 sm:$0xff]  }
  0xda   :  { %1730 = vmatprep.subr.bf16.mxu1 %v7665_v10  ;;  %v7757_v9 = vld [vmem:[#allocation2 + $0x42c] ss:$16 sps:$4 sm:$0xff]   ;;  %v7752_v10 = vld [vmem:[#allocation2 + $0x328] ss:$16 sps:$4 sm:$0xff]  }
  0xdc   :  { %1665 = vmatpush2.bf16.msra.mxu0 %v7660_v11  ;;  %v7755_v11 = vld [vmem:[#allocation2 + $0x428] ss:$16 sps:$4 sm:$0xff]  }
  0xdd   :  { %1731 = vmatpush1.bf16.msra.mxu1 %v7663_v12  ;;  %1757 = vmatprep.subr.bf16.mxu0 %v7673_v14  ;;  %v7760_v12 = vld [vmem:[#allocation2 + $0x30c] ss:$16 sps:$4 sm:$0xff]   ;;  %v7758_v14 = vld [vmem:[#allocation2 + $0x308] ss:$16 sps:$4 sm:$0xff]  }
  0xde   :  { %1732 = vmatprep.subr.bf16.mxu1 %v7670_v13  ;;  %v7763_v13 = vld [vmem:[#allocation2 + $0x40c] ss:$16 sps:$4 sm:$0xff]  }
  0xdf   :  { %1667 = vmatmul.mubr.bf16.vlgmr.msra.gmra.mxu0 %v8961_v15 }
  0xe0   :  { %1758 = vmatpush1.bf16.msra.mxu0 %v7671_v18  ;;  %1789 = vmatprep.mubr.bf16.mxu0 %v8934_v51  ;;  %v7695_v51 = vld [vmem:[#allocation2 + $0x268] ss:$16 sps:$4 sm:$0xff]   ;;  %v7766_v18 = vld [vmem:[#allocation2 + $0x5ec] ss:$16 sps:$4 sm:$0xff]  }
  0xe1   :  { %1733 = vmatpush2.bf16.msra.mxu1 %v7668_v17  ;;  %1759 = vmatprep.subr.bf16.mxu0 %v7679_v20  ;;  %v7761_v17 = vld [vmem:[#allocation2 + $0x408] ss:$16 sps:$4 sm:$0xff]  }
  0xe2   :  { %1734 = vmatprep.subr.bf16.mxu1 %v7676_v19  ;;  %v7769_v19 = vld [vmem:[#allocation2 + $0x6ec] ss:$16 sps:$4 sm:$0xff]   ;;  %v7764_v20 = vld [vmem:[#allocation2 + $0x5e8] ss:$16 sps:$4 sm:$0xff]  }
  0xe4   :  { %1760 = vmatpush1.bf16.msra.mxu0 %v7677_v22  ;;  %v7772_v22 = vld [vmem:[#allocation2 + $0x5cc] ss:$16 sps:$4 sm:$0xff]  }
  0xe5   :  { %1735 = vmatpush2.bf16.msra.mxu1 %v7674_v21  ;;  %1761 = vmatprep.subr.bf16.mxu0 %v7685_v24  ;;  %v7767_v21 = vld [vmem:[#allocation2 + $0x6e8] ss:$16 sps:$4 sm:$0xff]  }
  0xe6   :  { %1736 = vmatprep.subr.bf16.mxu1 %v7682_v23  ;;  %v7775_v23 = vld [vmem:[#allocation2 + $0x6cc] ss:$16 sps:$4 sm:$0xff]   ;;  %v7770_v24 = vld [vmem:[#allocation2 + $0x5c8] ss:$16 sps:$4 sm:$0xff]  }
  0xe8   :  { %1762 = vmatpush1.bf16.msra.mxu0 %v7683_v26  ;;  %v7778_v26 = vld [vmem:[#allocation2 + $0x5ac] ss:$16 sps:$4 sm:$0xff]  }
  0xe9   :  { %1737 = vmatpush2.bf16.msra.mxu1 %v7680_v25  ;;  %1763 = vmatprep.subr.bf16.mxu0 %v7691_v28  ;;  %v7773_v25 = vld [vmem:[#allocation2 + $0x6c8] ss:$16 sps:$4 sm:$0xff]  }
  0xea   :  { %1738 = vmatprep.subr.bf16.mxu1 %v7688_v27  ;;  %v7781_v27 = vld [vmem:[#allocation2 + $0x6ac] ss:$16 sps:$4 sm:$0xff]   ;;  %v7776_v28 = vld [vmem:[#allocation2 + $0x5a8] ss:$16 sps:$4 sm:$0xff]  }
  0xec   :  { %1764 = vmatpush1.bf16.msra.mxu0 %v7689_v30  ;;  %v7784_v30 = vld [vmem:[#allocation2 + $0x58c] ss:$16 sps:$4 sm:$0xff]  }
  0xed   :  { %1739 = vmatpush2.bf16.msra.mxu1 %v7686_v29  ;;  %1765 = vmatprep.subr.bf16.mxu0 %v7697_v32  ;;  %v7779_v29 = vld [vmem:[#allocation2 + $0x6a8] ss:$16 sps:$4 sm:$0xff]  }
  0xee   :  { %1740 = vmatprep.subr.bf16.mxu1 %v7694_v31  ;;  %v7787_v31 = vld [vmem:[#allocation2 + $0x68c] ss:$16 sps:$4 sm:$0xff]   ;;  %v7782_v32 = vld [vmem:[#allocation2 + $0x588] ss:$16 sps:$4 sm:$0xff]  }
  0xf0   :  { %1766 = vmatpush1.bf16.msra.mxu0 %v7695_v51  ;;  %v7793_v51 = vld [vmem:[#allocation2 + $0x66c] ss:$16 sps:$4 sm:$0xff]  }
  0xf1   :  { %1741 = vmatpush2.bf16.msra.mxu1 %v7692_v33  ;;  %1767 = vmatprep.subr.bf16.mxu0 %v7703_v36  ;;  %v7785_v33 = vld [vmem:[#allocation2 + $0x688] ss:$16 sps:$4 sm:$0xff]  }
  0xf2   :  { %1742 = vmatprep.subr.bf16.mxu1 %v7700_v34  ;;  %v7788_v34 = vld [vmem:[#allocation2 + $0x568] ss:$16 sps:$4 sm:$0xff]  }
  0xf3   :  { %v7791_v36 = vld [vmem:[#allocation2 + $0x668] ss:$16 sps:$4 sm:$0xff]  }
  0xf4   :  { %1768 = vmatpush1.bf16.msra.mxu0 %v7701_v38  ;;  %v7799_v38 = vld [vmem:[#allocation2 + $0x64c] ss:$16 sps:$4 sm:$0xff]  }
  0xf5   :  { %1743 = vmatpush2.bf16.msra.mxu1 %v7698_v37  ;;  %1769 = vmatprep.subr.bf16.mxu0 %v7709_v40  ;;  %v7796_v37 = vld [vmem:[#allocation2 + $0x54c] ss:$16 sps:$4 sm:$0xff]   ;;  %v7797_v40 = vld [vmem:[#allocation2 + $0x648] ss:$16 sps:$4 sm:$0xff]  }
  0xf6   :  { %1744 = vmatprep.subr.bf16.mxu1 %v7706_v39  ;;  %v7794_v39 = vld [vmem:[#allocation2 + $0x548] ss:$16 sps:$4 sm:$0xff]  }
  0xf8   :  { %1770 = vmatpush1.bf16.msra.mxu0 %v7707_v42  ;;  %v7805_v42 = vld [vmem:[#allocation2 + $0x62c] ss:$16 sps:$4 sm:$0xff]  }
  0xf9   :  { %1745 = vmatpush2.bf16.msra.mxu1 %v7704_v41  ;;  %1771 = vmatprep.subr.bf16.mxu0 %v7715_v44  ;;  %v7802_v41 = vld [vmem:[#allocation2 + $0x52c] ss:$16 sps:$4 sm:$0xff]   ;;  %v7803_v44 = vld [vmem:[#allocation2 + $0x628] ss:$16 sps:$4 sm:$0xff]  }
  0xfa   :  { %1746 = vmatprep.subr.bf16.mxu1 %v7712_v43  ;;  %v7800_v43 = vld [vmem:[#allocation2 + $0x528] ss:$16 sps:$4 sm:$0xff]  }
  0xfc   :  { %1772 = vmatpush1.bf16.msra.mxu0 %v7713_v46  ;;  %v7811_v46 = vld [vmem:[#allocation2 + $0x60c] ss:$16 sps:$4 sm:$0xff]  }
  0xfd   :  { %1747 = vmatpush2.bf16.msra.mxu1 %v7710_v45  ;;  %1773 = vmatprep.subr.bf16.mxu0 %v7718_v48  ;;  %v7808_v45 = vld [vmem:[#allocation2 + $0x50c] ss:$16 sps:$4 sm:$0xff]   ;;  %v7806_v48 = vld [vmem:[#allocation2 + $0x508] ss:$16 sps:$4 sm:$0xff]  }
  0xfe   :  { %1798 = vmatprep.subr.bf16.mxu1 %v7721_v49  ;;  %v7809_v49 = vld [vmem:[#allocation2 + $0x608] ss:$16 sps:$4 sm:$0xff]  }
 0x100   :  { %1749 = vmatmul.mubr.bf16.vlgmr.msra.gmra.mxu1 %v8938_v6  ;;  %1774 = vmatpush2.bf16.msra.mxu0 %v7716_v50  ;;  %v7737_v6 = vld [vmem:[#allocation2 + $0x488] ss:$16 sps:$4 sm:$0xff]  }
 0x101   :  { %1799 = vmatpush1.bf16.msra.mxu1 %v7719_v52  ;;  %1775 = vmatprep.subr.bf16.mxu0 %v7724_v53  ;;  %v7814_v50 = vld [vmem:[#allocation4 + $0xac] ss:$12 sps:$4 sm:$0xff]   ;;  %v7812_v52 = vld [vmem:[#allocation4 + $0xa8] ss:$12 sps:$4 sm:$0xff]  }
 0x102   :  { %1800 = vmatprep.subr.bf16.mxu1 %v7727_v54  ;;  %1830 = vmatprep.mubr.bf16.mxu1 %v8952_v35  ;;  %v7746_v35 = vld [vmem:[#allocation2 + $0x348] ss:$16 sps:$4 sm:$0xff]   ;;  %v7817_v53 = vld [vmem:[#allocation4 + $0x94] ss:$12 sps:$4 sm:$0xff]   ;;  %v7815_v54 = vld [vmem:[#allocation4 + $0x90] ss:$12 sps:$4 sm:$0xff]  }
 0x104   :  { %1776 = vmatpush2.bf16.msra.mxu0 %v7722_v55  ;;  %v8628_v55 = vld [vmem:[%s9206_s21 + $0x18] ss:$0 sps:$4 sm:$0xff]  }
 0x105   :  { %1801 = vmatpush1.bf16.msra.mxu1 %v7725_v56  ;;  %1777 = vmatprep.subr.bf16.mxu0 %v7730_v57  ;;  %v7820_v56 = vld [vmem:[#allocation4 + $0x7c] ss:$12 sps:$4 sm:$0xff]   ;;  %v7818_v57 = vld [vmem:[#allocation4 + $0x78] ss:$12 sps:$4 sm:$0xff]  }
 0x106   :  { %1802 = vmatprep.subr.bf16.mxu1 %v7733_v58  ;;  %v7823_v58 = vld [vmem:[#allocation4 + $0x64] ss:$12 sps:$4 sm:$0xff]  }
 0x108   :  { %1778 = vmatpush2.bf16.msra.mxu0 %v7728_v59  ;;  %v7821_v59 = vld [vmem:[#allocation4 + $0x60] ss:$12 sps:$4 sm:$0xff]  }
 0x109   :  { %1803 = vmatpush1.bf16.msra.mxu1 %v7731_v60  ;;  %1779 = vmatprep.subr.bf16.mxu0 %v7736_v61  ;;  %v7826_v60 = vld [vmem:[#allocation4 + $0x4c] ss:$12 sps:$4 sm:$0xff]   ;;  %v7876_v61 = vld [vmem:[#allocation4 + $0x228] ss:$12 sps:$4 sm:$0xff]  }
 0x10a   :  { %1804 = vmatprep.subr.bf16.mxu1 %v7739_v62  ;;  %v7878_v62 = vld [vmem:[#allocation4 + $0x22c] ss:$12 sps:$4 sm:$0xff]  }
 0x10c   :  { %1780 = vmatpush2.bf16.msra.mxu0 %v7734_v47  ;;  %v7881_v47 = vld [vmem:[#allocation4 + $0x214] ss:$12 sps:$4 sm:$0xff]  }
 0x10d   :  { %1805 = vmatpush1.bf16.msra.mxu1 %v7737_v6  ;;  %1781 = vmatprep.subr.bf16.mxu0 %v7742_v63  ;;  %v7824_v6 = vld [vmem:[#allocation4 + $0x48] ss:$12 sps:$4 sm:$0xff]  }
 0x10e   :  { %1806 = vmatprep.subr.bf16.mxu1 %v7745_v0  ;;  %v7884_v63 = vld [vmem:[#allocation4 + $0x1fc] ss:$12 sps:$4 sm:$0xff]   ;;  %v7829_v0 = vld [vmem:[#allocation4 + $0x34] ss:$12 sps:$4 sm:$0xff]  }
 0x110   :  { %1782 = vmatpush2.bf16.msra.mxu0 %v7740_v1  ;;  %v7882_v1 = vld [vmem:[#allocation4 + $0x1f8] ss:$12 sps:$4 sm:$0xff]  }
 0x111   :  { %1807 = vmatpush1.bf16.msra.mxu1 %v7743_v2  ;;  %1783 = vmatprep.subr.bf16.mxu0 %v7748_v3  ;;  %v7827_v2 = vld [vmem:[#allocation4 + $0x30] ss:$12 sps:$4 sm:$0xff]  }
 0x112   :  { %1808 = vmatprep.subr.bf16.mxu1 %v7751_v4  ;;  %v7887_v3 = vld [vmem:[#allocation4 + $0x1e4] ss:$12 sps:$4 sm:$0xff]   ;;  %v7832_v4 = vld [vmem:[#allocation4 + $0x1c] ss:$12 sps:$4 sm:$0xff]  }
 0x114   :  { %1784 = vmatpush2.bf16.msra.mxu0 %v7746_v35  ;;  %v7885_v35 = vld [vmem:[#allocation4 + $0x1e0] ss:$12 sps:$4 sm:$0xff]  }
 0x115   :  { %1809 = vmatpush1.bf16.msra.mxu1 %v7749_v5  ;;  %1785 = vmatprep.subr.bf16.mxu0 %v7754_v8  ;;  %v7830_v5 = vld [vmem:[#allocation4 + $0x18] ss:$12 sps:$4 sm:$0xff]  }
 0x116   :  { %1810 = vmatprep.subr.bf16.mxu1 %v7757_v9  ;;  %v7890_v8 = vld [vmem:[#allocation4 + $0x1cc] ss:$12 sps:$4 sm:$0xff]   ;;  %v7835_v9 = vld [vmem:[#allocation4 + $0x4] ss:$12 sps:$4 sm:$0xff]  }
 0x118   :  { %1786 = vmatpush2.bf16.msra.mxu0 %v7752_v10  ;;  %v7888_v10 = vld [vmem:[#allocation4 + $0x1c8] ss:$12 sps:$4 sm:$0xff]  }
 0x119   :  { %1811 = vmatpush1.bf16.msra.mxu1 %v7755_v11  ;;  %1787 = vmatprep.subr.bf16.mxu0 %v7760_v12  ;;  %v7833_v11 = vld [vmem:[#allocation4] ss:$12 sps:$4 sm:$0xff]  }
 0x11a   :  { %1812 = vmatprep.subr.bf16.mxu1 %v7763_v13  ;;  %v7893_v12 = vld [vmem:[#allocation4 + $0x1b4] ss:$12 sps:$4 sm:$0xff]   ;;  %v7838_v13 = vld [vmem:[#allocation4 + $0x16c] ss:$12 sps:$4 sm:$0xff]  }
 0x11c   :  { %1788 = vmatpush2.bf16.msra.mxu0 %v7758_v14  ;;  %v7891_v14 = vld [vmem:[#allocation4 + $0x1b0] ss:$12 sps:$4 sm:$0xff]  }
 0x11d   :  { %1813 = vmatpush1.bf16.msra.mxu1 %v7761_v17  ;;  %1839 = vmatprep.subr.bf16.mxu0 %v7769_v19  ;;  %v7836_v17 = vld [vmem:[#allocation4 + $0x168] ss:$12 sps:$4 sm:$0xff]   ;;  %v7839_v19 = vld [vmem:[#allocation4 + $0x150] ss:$12 sps:$4 sm:$0xff]  }
 0x11e   :  { %1814 = vmatprep.subr.bf16.mxu1 %v7766_v18  ;;  %v7841_v18 = vld [vmem:[#allocation4 + $0x154] ss:$12 sps:$4 sm:$0xff]  }
 0x11f   :  { %1790 = vmatmul.mubr.bf16.vlgmr.msra.gmra.mxu0 %v8940_v7  ;;  %v7790_v7 = vld [vmem:[#allocation2 + $0x56c] ss:$16 sps:$4 sm:$0xff]  }
 0x120   :  { %1840 = vmatpush1.bf16.msra.mxu0 %v7767_v21  ;;  %1871 = vmatprep.mubr.bf16.mxu0 %v8792_v16 }
 0x121   :  { %1815 = vmatpush2.bf16.msra.mxu1 %v7764_v20  ;;  %1841 = vmatprep.subr.bf16.mxu0 %v7775_v23 }
 0x122   :  { %1816 = vmatprep.subr.bf16.mxu1 %v7772_v22  ;;  %v7844_v22 = vld [vmem:[#allocation4 + $0x13c] ss:$12 sps:$4 sm:$0xff]  }
 0x124   :  { %1842 = vmatpush1.bf16.msra.mxu0 %v7773_v25  ;;  %v7896_v25 = vld [vmem:[#allocation4 + $0x19c] ss:$12 sps:$4 sm:$0xff]  }
 0x125   :  { %1817 = vmatpush2.bf16.msra.mxu1 %v7770_v24  ;;  %1843 = vmatprep.subr.bf16.mxu0 %v7781_v27  ;;  %v7894_v27 = vld [vmem:[#allocation4 + $0x198] ss:$12 sps:$4 sm:$0xff]  }
 0x126   :  { %1818 = vmatprep.subr.bf16.mxu1 %v7778_v26  ;;  %v7842_v26 = vld [vmem:[#allocation4 + $0x138] ss:$12 sps:$4 sm:$0xff]  }
 0x128   :  { %1844 = vmatpush1.bf16.msra.mxu0 %v7779_v29 }
 0x129   :  { %1819 = vmatpush2.bf16.msra.mxu1 %v7776_v28  ;;  %1845 = vmatprep.subr.bf16.mxu0 %v7787_v31 }
 0x12a   :  { %1820 = vmatprep.subr.bf16.mxu1 %v7784_v30 }
 0x12c   :  { %1846 = vmatpush1.bf16.msra.mxu0 %v7785_v33  ;;  %v7897_v33 = vld [vmem:[#allocation4 + $0x180] ss:$12 sps:$4 sm:$0xff]  }
 0x12d   :  { %1821 = vmatpush2.bf16.msra.mxu1 %v7782_v32  ;;  %1847 = vmatprep.subr.bf16.mxu0 %v7793_v51  ;;  %v7847_v32 = vld [vmem:[#allocation4 + $0x124] ss:$12 sps:$4 sm:$0xff]   ;;  %v7902_v51 = vld [vmem:[#allocation4 + $0x2ec] ss:$12 sps:$4 sm:$0xff]  }
 0x12e   :  { %1822 = vmatprep.subr.bf16.mxu1 %v7790_v7  ;;  %v7899_v7 = vld [vmem:[#allocation4 + $0x184] ss:$12 sps:$4 sm:$0xff]  }
 0x130   :  { %1848 = vmatpush1.bf16.msra.mxu0 %v7791_v36  ;;  %v7900_v36 = vld [vmem:[#allocation4 + $0x2e8] ss:$12 sps:$4 sm:$0xff]  }
 0x131   :  { %1823 = vmatpush2.bf16.msra.mxu1 %v7788_v34  ;;  %1849 = vmatprep.subr.bf16.mxu0 %v7799_v38  ;;  %v7845_v34 = vld [vmem:[#allocation4 + $0x120] ss:$12 sps:$4 sm:$0xff]  }
 0x132   :  { %1824 = vmatprep.subr.bf16.mxu1 %v7796_v37  ;;  %v7850_v37 = vld [vmem:[#allocation4 + $0x10c] ss:$12 sps:$4 sm:$0xff]   ;;  %v7905_v38 = vld [vmem:[#allocation4 + $0x2d4] ss:$12 sps:$4 sm:$0xff]  }
 0x134   :  { %1850 = vmatpush1.bf16.msra.mxu0 %v7797_v40  ;;  %v7903_v40 = vld [vmem:[#allocation4 + $0x2d0] ss:$12 sps:$4 sm:$0xff]  }
 0x135   :  { %1825 = vmatpush2.bf16.msra.mxu1 %v7794_v39  ;;  %1851 = vmatprep.subr.bf16.mxu0 %v7805_v42  ;;  %v7848_v39 = vld [vmem:[#allocation4 + $0x108] ss:$12 sps:$4 sm:$0xff]  }
 0x136   :  { %1826 = vmatprep.subr.bf16.mxu1 %v7802_v41  ;;  %v7853_v41 = vld [vmem:[#allocation4 + $0xf4] ss:$12 sps:$4 sm:$0xff]   ;;  %v7908_v42 = vld [vmem:[#allocation4 + $0x2bc] ss:$12 sps:$4 sm:$0xff]  }
 0x138   :  { %1852 = vmatpush1.bf16.msra.mxu0 %v7803_v44  ;;  %v7906_v44 = vld [vmem:[#allocation4 + $0x2b8] ss:$12 sps:$4 sm:$0xff]  }
 0x139   :  { %1827 = vmatpush2.bf16.msra.mxu1 %v7800_v43  ;;  %1853 = vmatprep.subr.bf16.mxu0 %v7811_v46  ;;  %v7851_v43 = vld [vmem:[#allocation4 + $0xf0] ss:$12 sps:$4 sm:$0xff]  }
 0x13a   :  { %1828 = vmatprep.subr.bf16.mxu1 %v7808_v45  ;;  %v7856_v45 = vld [vmem:[#allocation4 + $0xdc] ss:$12 sps:$4 sm:$0xff]   ;;  %v7911_v46 = vld [vmem:[#allocation4 + $0x2a4] ss:$12 sps:$4 sm:$0xff]  }
 0x13c   :  { %1854 = vmatpush1.bf16.msra.mxu0 %v7809_v49  ;;  %v7909_v49 = vld [vmem:[#allocation4 + $0x2a0] ss:$12 sps:$4 sm:$0xff]  }
 0x13d   :  { %1829 = vmatpush2.bf16.msra.mxu1 %v7806_v48  ;;  %2545 = vmatprep.subr.bf16.mxu0 %v7814_v50  ;;  %v7854_v48 = vld [vmem:[#allocation4 + $0xd8] ss:$12 sps:$4 sm:$0xff]  }
 0x13e   :  { %2586 = vmatprep.subr.bf16.mxu1 %v7878_v62  ;;  %v7859_v50 = vld [vmem:[#allocation4 + $0xc4] ss:$12 sps:$4 sm:$0xff]  }
 0x13f   :  { %1872 = vmatmul.mubr.bf16.vlgmr.msra.gmra.mxu0 %v8628_v55  ;;  %v7860_v55 = vld [vmem:[#allocation4 + $0x170] ss:$12 sps:$4 sm:$0xff]  }
 0x140   :  { %1831 = vmatmul.mubr.bf16.vlgmr.msra.gmra.mxu1 %v8961_v15  ;;  %2546 = vmatpush1.bf16.msra.mxu0 %v7812_v52  ;;  %v7879_v15 = vld [vmem:[#allocation4 + $0x210] ss:$12 sps:$4 sm:$0xff]   ;;  %v7914_v52 = vld [vmem:[#allocation4 + $0x28c] ss:$12 sps:$4 sm:$0xff]  }
 0x141   :  { %2547 = vmatprep.subr.bf16.mxu0 %v7817_v53  ;;  %2587 = vmatpush1.bf16.msra.mxu1 %v7876_v61  ;;  %v7857_v53 = vld [vmem:[#allocation4 + $0xc0] ss:$12 sps:$4 sm:$0xff]   ;;  %v7918_v61 = vld [vmem:[#allocation4 + $0x258] ss:$12 sps:$4 sm:$0xff]  }
 0x142   :  { %2588 = vmatprep.subr.bf16.mxu1 %v7881_v47  ;;  %v7923_v47 = vld [vmem:[#allocation4 + $0x244] ss:$12 sps:$4 sm:$0xff]  }
 0x144   :  { %2548 = vmatpush1.bf16.msra.mxu0 %v7815_v54  ;;  %v7912_v54 = vld [vmem:[#allocation4 + $0x288] ss:$12 sps:$4 sm:$0xff]  }
 0x145   :  { %2549 = vmatprep.subr.bf16.mxu0 %v7820_v56  ;;  %2589 = vmatpush1.bf16.msra.mxu1 %v7879_v15  ;;  %v7917_v56 = vld [vmem:[#allocation4 + $0x274] ss:$12 sps:$4 sm:$0xff]  }
 0x146   :  { %2590 = vmatprep.subr.bf16.mxu1 %v7884_v63  ;;  %v7924_v63 = vld [vmem:[#allocation4 + $0x2f0] ss:$12 sps:$4 sm:$0xff]  }
 0x148   :  { %2550 = vmatpush1.bf16.msra.mxu0 %v7818_v57  ;;  %v7915_v57 = vld [vmem:[#allocation4 + $0x270] ss:$12 sps:$4 sm:$0xff]  }
 0x149   :  { %2551 = vmatprep.subr.bf16.mxu0 %v7823_v58  ;;  %2591 = vmatpush1.bf16.msra.mxu1 %v7882_v1 }
 0x14a   :  { %2592 = vmatprep.subr.bf16.mxu1 %v7887_v3 }
 0x14c   :  { %2552 = vmatpush1.bf16.msra.mxu0 %v7821_v59 }
 0x14d   :  { %2553 = vmatprep.subr.bf16.mxu0 %v7826_v60  ;;  %2593 = vmatpush1.bf16.msra.mxu1 %v7885_v35  ;;  %v7920_v60 = vld [vmem:[#allocation4 + $0x25c] ss:$12 sps:$4 sm:$0xff]  }
 0x14e   :  { %2594 = vmatprep.subr.bf16.mxu1 %v7890_v8 }
 0x150   :  { %2554 = vmatpush1.bf16.msra.mxu0 %v7824_v6  ;;  %v7921_v6 = vld [vmem:[#allocation4 + $0x240] ss:$12 sps:$4 sm:$0xff]  }
 0x151   :  { %2555 = vmatprep.subr.bf16.mxu0 %v7829_v0  ;;  %2595 = vmatpush1.bf16.msra.mxu1 %v7888_v10  ;;  %v387_v0 = vlaneseq }
 0x152   :  { %2596 = vmatprep.subr.bf16.mxu1 %v7893_v12 }
 0x153   :  { %v8981_v1 = vshrl.u32 %v387_v0, 7 }
 0x154   :  { %2556 = vmatpush1.bf16.msra.mxu0 %v7827_v2  ;;  %v8986_v2 = vld [vmem:[%s9207_s23] sm:$0xf] }
 0x155   :  { %2557 = vmatprep.subr.bf16.mxu0 %v7832_v4  ;;  %2597 = vmatpush1.bf16.msra.mxu1 %v7891_v14  ;;  %v8989_v3 = vsub.s32 0, %v8981_v1  ;;  %v8992_v4 = vsub.s32 1, %v8981_v1 }
 0x156   :  { %2598 = vmatprep.subr.bf16.mxu1 %v7896_v25 }
 0x157   :  { %v390_v35 = vrot.slane %v8986_v2, %v8989_v3 }
 0x158   :  { %2558 = vmatpush1.bf16.msra.mxu0 %v7830_v5  ;;  %v394_v5 = vrot.slane %v8986_v2, %v8992_v4 }
 0x159   :  { %2559 = vmatprep.subr.bf16.mxu0 %v7835_v9  ;;  %2599 = vmatpush1.bf16.msra.mxu1 %v7894_v27 }
 0x15a   :  { %2600 = vmatprep.subr.bf16.mxu1 %v7899_v7  ;;  %v7869_v7 = vld [vmem:[#allocation4 + $0x50] ss:$12 sps:$4 sm:$0xff]  }
 0x15c   :  { %2560 = vmatpush1.bf16.msra.mxu0 %v7833_v11 }
 0x15d   :  { %2561 = vmatprep.subr.bf16.mxu0 %v7838_v13  ;;  %2601 = vmatpush1.bf16.msra.mxu1 %v7897_v33  ;;  %v7868_v33 = vld [vmem:[#allocation4 + $0x110] ss:$12 sps:$4 sm:$0xff]  }
 0x15e   :  { %2602 = vmatprep.subr.bf16.mxu1 %v7902_v51  ;;  %v7870_v51 = vld [vmem:[#allocation4 + $0xf8] ss:$12 sps:$4 sm:$0xff]  }
 0x15f   :  { %v8973_v20 = vpop.f32.mrf.mxu0 }
 0x160   :  { %v8975_v21 = vpop.f32.mrf.mxu1  ;;  %2562 = vmatpush2.bf16.msra.mxu0 %v7836_v17  ;;  %v1587_v8 = vadd.f32 %v8973_v20, %v390_v35 }
 0x161   :  { %v8977_v23 = vpop.f32.mrf.mxu0  ;;  %2563 = vmatprep.subr.bf16.mxu0 %v7841_v18  ;;  %2603 = vmatpush2.bf16.msra.mxu1 %v7900_v36  ;;  %v7872_v36 = vld [vmem:[#allocation4 + $0xe0] ss:$12 sps:$4 sm:$0xff]  }
 0x162   :  { %v8979_v24 = vpop.f32.mrf.mxu1  ;;  %2604 = vmatprep.subr.bf16.mxu1 %v7905_v38  ;;  %v1589_v9 = vadd.f32 %v8977_v23, %v394_v5  ;;  %v1628_v10 = vadd.f32 %v8975_v21, %v1587_v8  ;;  %v7863_v23 = vld [vmem:[#allocation4 + $0x98] ss:$12 sps:$4 sm:$0xff]   ;;  %v7864_v21 = vld [vmem:[#allocation4 + $0x140] ss:$12 sps:$4 sm:$0xff]  }
 0x163   :  { %v1590_v28 = vpop.f32.mrf.mxu0 }
 0x164   :  { %v1631_v29 = vpop.f32.mrf.mxu1  ;;  %2564 = vmatpush2.bf16.msra.mxu0 %v7839_v19  ;;  %v1630_v12 = vadd.f32 %v8979_v24, %v1589_v9  ;;  %v7861_v28 = vld [vmem:[#allocation4 + $0xb0] ss:$12 sps:$4 sm:$0xff]   ;;  %v7865_v24 = vld [vmem:[#allocation4 + $0x80] ss:$12 sps:$4 sm:$0xff]  }
 0x165   :  { %v1591_v30 = vpop.f32.mrf.mxu0  ;;  %2565 = vmatprep.subr.bf16.mxu0 %v7844_v22  ;;  %2605 = vmatpush2.bf16.msra.mxu1 %v7903_v40  ;;  %v7862_v29 = vld [vmem:[#allocation4 + $0x158] ss:$12 sps:$4 sm:$0xff]  }
 0x166   :  { %v1632_v31 = vpop.f32.mrf.mxu1  ;;  %2606 = vmatprep.subr.bf16.mxu1 %v7908_v42 }
 0x167   :  { %v7866_v31 = vld [vmem:[#allocation4 + $0x128] ss:$12 sps:$4 sm:$0xff]  }
 0x168   :  { %2566 = vmatpush2.bf16.msra.mxu0 %v7842_v26 }
 0x169   :  { %2567 = vmatprep.subr.bf16.mxu0 %v7847_v32  ;;  %2607 = vmatpush2.bf16.msra.mxu1 %v7906_v44  ;;  %v7867_v32 = vld [vmem:[#allocation4 + $0x68] ss:$12 sps:$4 sm:$0xff]  }
 0x16a   :  { %2608 = vmatprep.subr.bf16.mxu1 %v7911_v46 }
 0x16c   :  { %2568 = vmatpush2.bf16.msra.mxu0 %v7845_v34  ;;  %v7871_v34 = vld [vmem:[#allocation4 + $0x38] ss:$12 sps:$4 sm:$0xff]  }
 0x16d   :  { %2569 = vmatprep.subr.bf16.mxu0 %v7850_v37  ;;  %2609 = vmatpush2.bf16.msra.mxu1 %v7909_v49  ;;  %v7873_v37 = vld [vmem:[#allocation4 + $0x20] ss:$12 sps:$4 sm:$0xff]   ;;  %v9003_v49 = vsub.s32 2, %v8981_v1 }
 0x16e   :  { %2610 = vmatprep.subr.bf16.mxu1 %v7914_v52 }
 0x16f   :  { %v398_v52 = vrot.slane %v8986_v2, %v9003_v49 }
 0x170   :  { %2570 = vmatpush2.bf16.msra.mxu0 %v7848_v39  ;;  %v7874_v39 = vld [vmem:[#allocation4 + $0xc8] ss:$12 sps:$4 sm:$0xff]  }
 0x171   :  { %2571 = vmatprep.subr.bf16.mxu0 %v7853_v41  ;;  %2611 = vmatpush2.bf16.msra.mxu1 %v7912_v54  ;;  %v7875_v41 = vld [vmem:[#allocation4 + $0x8] ss:$12 sps:$4 sm:$0xff]  }
 0x172   :  { %2612 = vmatprep.subr.bf16.mxu1 %v7917_v56 }
 0x174   :  { %2572 = vmatpush2.bf16.msra.mxu0 %v7851_v43 }
 0x175   :  { %2573 = vmatprep.subr.bf16.mxu0 %v7856_v45  ;;  %2613 = vmatpush2.bf16.msra.mxu1 %v7915_v57 }
 0x176   :  { %2614 = vmatprep.subr.bf16.mxu1 %v7920_v60 }
 0x178   :  { %2574 = vmatpush2.bf16.msra.mxu0 %v7854_v48 }
 0x179   :  { %2575 = vmatprep.subr.bf16.mxu0 %v7859_v50  ;;  %2615 = vmatpush2.bf16.msra.mxu1 %v7918_v61  ;;  %v9006_v50 = vsub.s32 3, %v8981_v1 }
 0x17a   :  { %2616 = vmatprep.subr.bf16.mxu1 %v7923_v47 }
 0x17c   :  { %2576 = vmatpush2.bf16.msra.mxu0 %v7857_v53  ;;  %v402_v53 = vrot.slane %v8986_v2, %v9006_v50  ;;  %v7925_v2 = vld [vmem:[#allocation4 + $0x230] ss:$12 sps:$4 sm:$0xff]  }
 0x17d   :  { %7343 = vmatprep.subr.bf16.mxu0 %v7860_v55  ;;  %2617 = vmatpush2.bf16.msra.mxu1 %v7921_v6 }
 0x17e   :  { %7365 = vmatprep.subr.bf16.mxu1 %v7924_v63 }
 0x180   :  { %v1709_v58 = vpop.f32.mrf.mxu1 }
 0x182   :  { %v1711_v59 = vpop.f32.mrf.mxu1 }
 0x184   :  { %v1713_v62 = vpop.f32.mrf.mxu1 }
 0x186   :  { %v1714_v15 = vpop.f32.mrf.mxu1 }
 0x19f   :  { %v1668_v11 = vpop.f32.mrf.mxu0 }
 0x1a0   :  { %v1669_v13 = vadd.f32 %v1668_v11, %v1628_v10 }
 0x1a1   :  { %v1670_v14 = vpop.f32.mrf.mxu0 }
 0x1a2   :  { %v1710_v17 = vadd.f32 %v1709_v58, %v1669_v13  ;;  %v1671_v18 = vadd.f32 %v1670_v14, %v1630_v12  ;;  %v7926_v12 = vld [vmem:[#allocation4 + $0x2d8] ss:$12 sps:$4 sm:$0xff]   ;;  %v7928_v14 = vld [vmem:[#allocation4 + $0x2c0] ss:$12 sps:$4 sm:$0xff]  }
 0x1a3   :  { %v1672_v19 = vpop.f32.mrf.mxu0  ;;  %v7927_v13 = vld [vmem:[#allocation4 + $0x218] ss:$12 sps:$4 sm:$0xff]  }
 0x1a4   :  { %v1712_v22 = vadd.f32 %v1711_v59, %v1671_v18  ;;  %v1880_v25 = vmax.f32 %v1710_v17, 0.0  ;;  %v7929_v17 = vld [vmem:[#allocation4 + $0x200] ss:$12 sps:$4 sm:$0xff]   ;;  %v7930_v18 = vld [vmem:[#allocation4 + $0x2a8] ss:$12 sps:$4 sm:$0xff]  }
 0x1a5   :  { %v1673_v26 = vpop.f32.mrf.mxu0  ;;  %v7940_v19 = vld [vmem:[#allocation6 + $0x70] ss:$8 sps:$4 sm:$0xff]  }
 0x1a6   :  { %v1881_v27 = vmax.f32 %v1712_v22, 0.0  ;;  %v1884_v20 = vpack.c.bf16 %v1880_v25, %v1880_v25  ;;  %v7942_v22 = vld [vmem:[#allocation6 + $0x74] ss:$8 sps:$4 sm:$0xff]   ;;  %v7945_v25 = vld [vmem:[#allocation6 + $0x64] ss:$8 sps:$4 sm:$0xff]  }
 0x1a7   :  { %v7931_v26 = vld [vmem:[#allocation4 + $0x1e8] ss:$12 sps:$4 sm:$0xff]  }
 0x1a8   :  { %v1885_v30 = vpack.c.bf16 %v1881_v27, %v1881_v27  ;;  %v7943_v27 = vld [vmem:[#allocation6 + $0x60] ss:$8 sps:$4 sm:$0xff]  }
 0x1aa   :  { %2577 = vmatprep.mubr.bf16.mxu0 %v1885_v30 }
 0x1ab   :  { %2578 = vmatmul.mubr.bf16.vlgmr.msra.gmra.mxu0 %v1884_v20 }
 0x1ac   :  { %7344 = vmatpush3.bf16.msra.mxu0 %v7861_v28  ;;  %2659 = vmatprep.mubr.bf16.mxu0 %v1885_v30  ;;  %v7932_v28 = vld [vmem:[#allocation4 + $0x290] ss:$12 sps:$4 sm:$0xff]  }
 0x1ad   :  { %7345 = vmatprep.subr.bf16.mxu0 %v7862_v29  ;;  %v7948_v29 = vld [vmem:[#allocation6 + $0x54] ss:$8 sps:$4 sm:$0xff]  }
 0x1ae   :  { %v7933_v30 = vld [vmem:[#allocation4 + $0x1d0] ss:$12 sps:$4 sm:$0xff]  }
 0x1b0   :  { %7346 = vmatpush3.bf16.msra.mxu0 %v7863_v23  ;;  %v7934_v23 = vld [vmem:[#allocation4 + $0x278] ss:$12 sps:$4 sm:$0xff]  }
 0x1b1   :  { %7347 = vmatprep.subr.bf16.mxu0 %v7864_v21  ;;  %v7951_v21 = vld [vmem:[#allocation6 + $0x44] ss:$8 sps:$4 sm:$0xff]  }
 0x1b4   :  { %7348 = vmatpush3.bf16.msra.mxu0 %v7865_v24  ;;  %v7935_v24 = vld [vmem:[#allocation4 + $0x1b8] ss:$12 sps:$4 sm:$0xff]  }
 0x1b5   :  { %7349 = vmatprep.subr.bf16.mxu0 %v7866_v31  ;;  %v7949_v31 = vld [vmem:[#allocation6 + $0x40] ss:$8 sps:$4 sm:$0xff]  }
 0x1b8   :  { %7350 = vmatpush3.bf16.msra.mxu0 %v7867_v32  ;;  %v7936_v32 = vld [vmem:[#allocation4 + $0x260] ss:$12 sps:$4 sm:$0xff]  }
 0x1b9   :  { %7351 = vmatprep.subr.bf16.mxu0 %v7868_v33  ;;  %v7954_v33 = vld [vmem:[#allocation6 + $0x34] ss:$8 sps:$4 sm:$0xff]  }
 0x1bc   :  { %7352 = vmatpush3.bf16.msra.mxu0 %v7869_v7  ;;  %v7937_v7 = vld [vmem:[#allocation4 + $0x1a0] ss:$12 sps:$4 sm:$0xff]  }
 0x1bd   :  { %7353 = vmatprep.subr.bf16.mxu0 %v7870_v51  ;;  %v7952_v51 = vld [vmem:[#allocation6 + $0x30] ss:$8 sps:$4 sm:$0xff]  }
 0x1c0   :  { %v1750_v38 = vpop.f32.mrf.mxu1  ;;  %7354 = vmatpush3.bf16.msra.mxu0 %v7871_v34  ;;  %v7938_v34 = vld [vmem:[#allocation4 + $0x248] ss:$12 sps:$4 sm:$0xff]  }
 0x1c1   :  { %7355 = vmatprep.subr.bf16.mxu0 %v7872_v36  ;;  %v1751_v54 = vadd.f32 %v1750_v38, %v398_v52  ;;  %v7957_v36 = vld [vmem:[#allocation6 + $0x24] ss:$8 sps:$4 sm:$0xff]   ;;  %v7955_v38 = vld [vmem:[#allocation6 + $0x20] ss:$8 sps:$4 sm:$0xff]   ;;  %v7970_v52 = vld [vmem:[#allocation6 + $0xd0] ss:$8 sps:$4 sm:$0xff]  }
 0x1c2   :  { %v1752_v40 = vpop.f32.mrf.mxu1 }
 0x1c3   :  { %v1753_v55 = vadd.f32 %v1752_v40, %v402_v53  ;;  %v7958_v40 = vld [vmem:[#allocation6 + $0x10] ss:$8 sps:$4 sm:$0xff]   ;;  %v7975_v53 = vld [vmem:[#allocation6 + $0xc4] ss:$8 sps:$4 sm:$0xff]  }
 0x1c4   :  { %v1754_v42 = vpop.f32.mrf.mxu1  ;;  %7356 = vmatpush3.bf16.msra.mxu0 %v7873_v37  ;;  %v7939_v37 = vld [vmem:[#allocation4 + $0x188] ss:$12 sps:$4 sm:$0xff]  }
 0x1c5   :  { %7357 = vmatprep.subr.bf16.mxu0 %v7874_v39  ;;  %v7960_v39 = vld [vmem:[#allocation6 + $0x14] ss:$8 sps:$4 sm:$0xff]   ;;  %v7961_v42 = vld [vmem:[#allocation6] ss:$8 sps:$4 sm:$0xff]  }
 0x1c6   :  { %v1755_v43 = vpop.f32.mrf.mxu1 }
 0x1c7   :  { %v7966_v43 = vld [vmem:[#allocation6 + $0xf4] ss:$8 sps:$4 sm:$0xff]  }
 0x1c8   :  { %7358 = vmatpush3.bf16.msra.mxu0 %v7875_v41  ;;  %v7963_v41 = vld [vmem:[#allocation6 + $0x4] ss:$8 sps:$4 sm:$0xff]  }
 0x1c9   :  { %3013 = vmatprep.subr.bf16.mxu0 %v7942_v22 }
 0x1cb   :  { %2660 = vmatmul.mubr.bf16.vlgmr.msra.gmra.mxu0 %v1884_v20  ;;  %v7946_v20 = vld [vmem:[#allocation6 + $0x50] ss:$8 sps:$4 sm:$0xff]  }
 0x1cc   :  { %3014 = vmatpush1.bf16.msra.mxu0 %v7940_v19  ;;  %v8011_v19 = vld [vmem:[#allocation6 + $0x104] ss:$8 sps:$4 sm:$0xff]  }
 0x1cd   :  { %3015 = vmatprep.subr.bf16.mxu0 %v7945_v25  ;;  %v8009_v25 = vld [vmem:[#allocation6 + $0x100] ss:$8 sps:$4 sm:$0xff]  }
 0x1d0   :  { %3016 = vmatpush1.bf16.msra.mxu0 %v7943_v27 }
 0x1d1   :  { %3017 = vmatprep.subr.bf16.mxu0 %v7948_v29 }
 0x1d4   :  { %3018 = vmatpush1.bf16.msra.mxu0 %v7946_v20 }
 0x1d5   :  { %3019 = vmatprep.subr.bf16.mxu0 %v7951_v21 }
 0x1d8   :  { %3020 = vmatpush1.bf16.msra.mxu0 %v7949_v31 }
 0x1d9   :  { %3021 = vmatprep.subr.bf16.mxu0 %v7954_v33 }
 0x1dc   :  { %3022 = vmatpush1.bf16.msra.mxu0 %v7952_v51 }
 0x1dd   :  { %3023 = vmatprep.subr.bf16.mxu0 %v7957_v36 }
 0x1df   :  { %v1791_v44 = vpop.f32.mrf.mxu0 }
 0x1e0   :  { %v1792_v56 = vadd.f32 %v1791_v44, %v1751_v54  ;;  %3024 = vmatpush1.bf16.msra.mxu0 %v7955_v38  ;;  %v7964_v44 = vld [vmem:[#allocation6 + $0xf0] ss:$8 sps:$4 sm:$0xff]   ;;  %v7973_v54 = vld [vmem:[#allocation6 + $0xc0] ss:$8 sps:$4 sm:$0xff]  }
 0x1e1   :  { %v1793_v45 = vpop.f32.mrf.mxu0  ;;  %3025 = vmatprep.subr.bf16.mxu0 %v7960_v39 }
 0x1e2   :  { %v1794_v59 = vadd.f32 %v1793_v45, %v1753_v55  ;;  %v7969_v45 = vld [vmem:[#allocation6 + $0xe4] ss:$8 sps:$4 sm:$0xff]   ;;  %v7978_v55 = vld [vmem:[#allocation6 + $0xb4] ss:$8 sps:$4 sm:$0xff]  }
 0x1e3   :  { %v1795_v46 = vpop.f32.mrf.mxu0 }
 0x1e4   :  { %3026 = vmatpush1.bf16.msra.mxu0 %v7958_v40  ;;  %v7967_v46 = vld [vmem:[#allocation6 + $0xe0] ss:$8 sps:$4 sm:$0xff]  }
 0x1e5   :  { %v1796_v48 = vpop.f32.mrf.mxu0  ;;  %3027 = vmatprep.subr.bf16.mxu0 %v7963_v41 }
 0x1e6   :  { %v7972_v48 = vld [vmem:[#allocation6 + $0xd4] ss:$8 sps:$4 sm:$0xff]  }
 0x1e8   :  { %3028 = vmatpush1.bf16.msra.mxu0 %v7961_v42 }
 0x1e9   :  { %3029 = vmatprep.subr.bf16.mxu0 %v7966_v43 }
 0x1ec   :  { %3030 = vmatpush2.bf16.msra.mxu0 %v7964_v44 }
 0x1ed   :  { %3031 = vmatprep.subr.bf16.mxu0 %v7969_v45 }
 0x1f0   :  { %3032 = vmatpush2.bf16.msra.mxu0 %v7967_v46 }
 0x1f1   :  { %3033 = vmatprep.subr.bf16.mxu0 %v7972_v48 }
 0x1f4   :  { %3034 = vmatpush2.bf16.msra.mxu0 %v7970_v52 }
 0x1f5   :  { %3035 = vmatprep.subr.bf16.mxu0 %v7975_v53 }
 0x1f8   :  { %3036 = vmatpush2.bf16.msra.mxu0 %v7973_v54 }
 0x1f9   :  { %3037 = vmatprep.subr.bf16.mxu0 %v7978_v55  ;;  %v8012_v55 = vld [vmem:[#allocation7 + $0x70] ss:$8 sps:$4 sm:$0xff]  }
 0x1ff   :  { %v1873_v58 = vpop.f32.mrf.mxu0 }
 0x200   :  { %v1832_v57 = vpop.f32.mrf.mxu1 }
 0x201   :  { %v1833_v60 = vadd.f32 %v1832_v57, %v1792_v56  ;;  %v1875_v62 = vpop.f32.mrf.mxu0  ;;  %v7976_v56 = vld [vmem:[#allocation6 + $0xb0] ss:$8 sps:$4 sm:$0xff]   ;;  %v7981_v57 = vld [vmem:[#allocation6 + $0xa4] ss:$8 sps:$4 sm:$0xff]  }
 0x202   :  { %v1834_v61 = vpop.f32.mrf.mxu1  ;;  %3038 = vmatpush2.bf16.msra.mxu0 %v7976_v56 }
 0x203   :  { %v1874_v15 = vadd.f32 %v1873_v58, %v1833_v60  ;;  %v1835_v47 = vadd.f32 %v1834_v61, %v1794_v59  ;;  %v1877_v63 = vpop.f32.mrf.mxu0  ;;  %v7979_v58 = vld [vmem:[#allocation6 + $0xa0] ss:$8 sps:$4 sm:$0xff]   ;;  %3039 = vmatprep.subr.bf16.mxu0 %v7981_v57  ;;  %v7984_v59 = vld [vmem:[#allocation6 + $0x94] ss:$8 sps:$4 sm:$0xff]   ;;  %v7982_v60 = vld [vmem:[#allocation6 + $0x90] ss:$8 sps:$4 sm:$0xff]  }
 0x204   :  { %v1836_v6 = vpop.f32.mrf.mxu1  ;;  %v7987_v61 = vld [vmem:[#allocation6 + $0x84] ss:$8 sps:$4 sm:$0xff]   ;;  %v7991_v63 = vld [vmem:[#allocation6 + $0x160] ss:$8 sps:$4 sm:$0xff]  }
 0x205   :  { %v1876_v0 = vadd.f32 %v1875_v62, %v1835_v47  ;;  %v1882_v35 = vmax.f32 %v1874_v15, 0.0  ;;  %v1878_v8 = vpop.f32.mrf.mxu0  ;;  %v7985_v62 = vld [vmem:[#allocation6 + $0x80] ss:$8 sps:$4 sm:$0xff]   ;;  %v7990_v15 = vld [vmem:[#allocation6 + $0x174] ss:$8 sps:$4 sm:$0xff]  }
 0x206   :  { %v1837_v5 = vpop.f32.mrf.mxu1  ;;  %3040 = vmatpush2.bf16.msra.mxu0 %v7979_v58  ;;  %v7988_v47 = vld [vmem:[#allocation6 + $0x170] ss:$8 sps:$4 sm:$0xff]   ;;  %v7993_v6 = vld [vmem:[#allocation6 + $0x164] ss:$8 sps:$4 sm:$0xff]   ;;  %v7997_v8 = vld [vmem:[#allocation6 + $0x140] ss:$8 sps:$4 sm:$0xff]  }
 0x207   :  { %v1883_v9 = vmax.f32 %v1876_v0, 0.0  ;;  %v1886_v11 = vpack.c.bf16 %v1882_v35, %v1882_v35  ;;  %3041 = vmatprep.subr.bf16.mxu0 %v7984_v59  ;;  %v7996_v0 = vld [vmem:[#allocation6 + $0x154] ss:$8 sps:$4 sm:$0xff]   ;;  %v7994_v35 = vld [vmem:[#allocation6 + $0x150] ss:$8 sps:$4 sm:$0xff]  }
 0x208   :  { %v7999_v5 = vld [vmem:[#allocation6 + $0x144] ss:$8 sps:$4 sm:$0xff]   ;;  %v8015_v58 = vld [vmem:[#allocation7 + $0x60] ss:$8 sps:$4 sm:$0xff]   ;;  %v8020_v59 = vld [vmem:[#allocation7 + $0x54] ss:$8 sps:$4 sm:$0xff]  }
 0x209   :  { %v1887_v10 = vpack.c.bf16 %v1883_v9, %v1883_v9  ;;  %v8002_v9 = vld [vmem:[#allocation6 + $0x134] ss:$8 sps:$4 sm:$0xff]   ;;  %v8017_v57 = vld [vmem:[#allocation7 + $0x64] ss:$8 sps:$4 sm:$0xff]  }
 0x20a   :  { %3042 = vmatpush2.bf16.msra.mxu0 %v7982_v60  ;;  %v8018_v60 = vld [vmem:[#allocation7 + $0x50] ss:$8 sps:$4 sm:$0xff]  }
 0x20b   :  { %2618 = vmatprep.mubr.bf16.mxu1 %v1887_v10  ;;  %3043 = vmatprep.subr.bf16.mxu0 %v7987_v61  ;;  %v8023_v61 = vld [vmem:[#allocation7 + $0x44] ss:$8 sps:$4 sm:$0xff]  }
 0x20c   :  { %2619 = vmatmul.mubr.bf16.vlgmr.msra.gmra.mxu1 %v1886_v11 }
 0x20d   :  { %7366 = vmatpush3.bf16.msra.mxu1 %v7925_v2  ;;  %2699 = vmatprep.mubr.bf16.mxu1 %v1887_v10  ;;  %v8000_v10 = vld [vmem:[#allocation6 + $0x130] ss:$8 sps:$4 sm:$0xff]   ;;  %v8005_v2 = vld [vmem:[#allocation6 + $0x124] ss:$8 sps:$4 sm:$0xff]  }
 0x20e   :  { %7367 = vmatprep.subr.bf16.mxu1 %v7926_v12  ;;  %3044 = vmatpush2.bf16.msra.mxu0 %v7985_v62  ;;  %v8021_v62 = vld [vmem:[#allocation7 + $0x40] ss:$8 sps:$4 sm:$0xff]  }
 0x211   :  { %7368 = vmatpush3.bf16.msra.mxu1 %v7927_v13  ;;  %v8008_v13 = vld [vmem:[#allocation6 + $0x114] ss:$8 sps:$4 sm:$0xff]  }
 0x212   :  { %7369 = vmatprep.subr.bf16.mxu1 %v7928_v14 }
 0x215   :  { %7370 = vmatpush3.bf16.msra.mxu1 %v7929_v17  ;;  %v8006_v17 = vld [vmem:[#allocation6 + $0x110] ss:$8 sps:$4 sm:$0xff]  }
 0x216   :  { %7371 = vmatprep.subr.bf16.mxu1 %v7930_v18 }
 0x219   :  { %7372 = vmatpush3.bf16.msra.mxu1 %v7931_v26  ;;  %v8014_v26 = vld [vmem:[#allocation7 + $0x74] ss:$8 sps:$4 sm:$0xff]  }
 0x21a   :  { %7373 = vmatprep.subr.bf16.mxu1 %v7932_v28 }
 0x21d   :  { %7374 = vmatpush3.bf16.msra.mxu1 %v7933_v30 }
 0x21e   :  { %7375 = vmatprep.subr.bf16.mxu1 %v7934_v23  ;;  %v2016_v23 = vld [vmem:[%s9181_s5] sm:$0x7] }
 0x21f   :  { %v2021_v21 = vrot.slane %v2016_v23, %v8989_v3  ;;  %v2029_v42 = vrot.slane %v2016_v23, %v9003_v49 }
 0x221   :  { %7376 = vmatpush3.bf16.msra.mxu1 %v7935_v24  ;;  %v2025_v24 = vrot.slane %v2016_v23, %v8992_v4 }
 0x222   :  { %7377 = vmatprep.subr.bf16.mxu1 %v7936_v32 }
 0x225   :  { %7378 = vmatpush3.bf16.msra.mxu1 %v7937_v7 }
 0x226   :  { %7379 = vmatprep.subr.bf16.mxu1 %v7938_v34 }
 0x229   :  { %7380 = vmatpush3.bf16.msra.mxu1 %v7939_v37 }
 0x22a   :  { %3054 = vmatprep.subr.bf16.mxu1 %v7990_v15  ;;  %v8026_v15 = vld [vmem:[#allocation7 + $0x34] ss:$8 sps:$4 sm:$0xff]  }
 0x22c   :  { %2700 = vmatmul.mubr.bf16.vlgmr.msra.gmra.mxu1 %v1886_v11  ;;  %v8003_v11 = vld [vmem:[#allocation6 + $0x120] ss:$8 sps:$4 sm:$0xff]  }
 0x22d   :  { %3086 = vmatprep.mubr.bf16.mxu1 %v8792_v16  ;;  %3055 = vmatpush1.bf16.msra.mxu1 %v7988_v47  ;;  %v8024_v47 = vld [vmem:[#allocation7 + $0x30] ss:$8 sps:$4 sm:$0xff]  }
 0x22e   :  { %3056 = vmatprep.subr.bf16.mxu1 %v7993_v6  ;;  %v8029_v6 = vld [vmem:[#allocation7 + $0x24] ss:$8 sps:$4 sm:$0xff]  }
 0x231   :  { %3057 = vmatpush1.bf16.msra.mxu1 %v7991_v63  ;;  %v8027_v63 = vld [vmem:[#allocation7 + $0x20] ss:$8 sps:$4 sm:$0xff]  }
 0x232   :  { %3058 = vmatprep.subr.bf16.mxu1 %v7996_v0  ;;  %v8032_v0 = vld [vmem:[#allocation7 + $0x14] ss:$8 sps:$4 sm:$0xff]  }
 0x235   :  { %3059 = vmatpush1.bf16.msra.mxu1 %v7994_v35  ;;  %v8030_v35 = vld [vmem:[#allocation7 + $0x10] ss:$8 sps:$4 sm:$0xff]  }
 0x236   :  { %3060 = vmatprep.subr.bf16.mxu1 %v7999_v5  ;;  %v8035_v5 = vld [vmem:[#allocation7 + $0x4] ss:$8 sps:$4 sm:$0xff]  }
 0x239   :  { %3061 = vmatpush1.bf16.msra.mxu1 %v7997_v8  ;;  %v8033_v8 = vld [vmem:[#allocation7] ss:$8 sps:$4 sm:$0xff]  }
 0x23a   :  { %3062 = vmatprep.subr.bf16.mxu1 %v8002_v9  ;;  %v8038_v9 = vld [vmem:[#allocation7 + $0xf4] ss:$8 sps:$4 sm:$0xff]  }
 0x23d   :  { %3063 = vmatpush1.bf16.msra.mxu1 %v8000_v10  ;;  %v8036_v10 = vld [vmem:[#allocation7 + $0xf0] ss:$8 sps:$4 sm:$0xff]  }
 0x23e   :  { %3064 = vmatprep.subr.bf16.mxu1 %v8005_v2  ;;  %v8041_v2 = vld [vmem:[#allocation7 + $0xe4] ss:$8 sps:$4 sm:$0xff]  }
 0x241   :  { %3065 = vmatpush1.bf16.msra.mxu1 %v8003_v11  ;;  %v8039_v11 = vld [vmem:[#allocation7 + $0xe0] ss:$8 sps:$4 sm:$0xff]  }
 0x242   :  { %3066 = vmatprep.subr.bf16.mxu1 %v8008_v13  ;;  %v8042_v13 = vld [vmem:[#allocation7 + $0xd0] ss:$8 sps:$4 sm:$0xff]  }
 0x245   :  { %3067 = vmatpush1.bf16.msra.mxu1 %v8006_v17  ;;  %v8045_v17 = vld [vmem:[#allocation7 + $0xc0] ss:$8 sps:$4 sm:$0xff]  }
 0x246   :  { %3068 = vmatprep.subr.bf16.mxu1 %v8011_v19  ;;  %v8048_v19 = vld [vmem:[#allocation7 + $0xb0] ss:$8 sps:$4 sm:$0xff]  }
 0x249   :  { %3069 = vmatpush1.bf16.msra.mxu1 %v8009_v25  ;;  %v8051_v25 = vld [vmem:[#allocation7 + $0xa0] ss:$8 sps:$4 sm:$0xff]  }
 0x24a   :  { %3303 = vmatprep.subr.bf16.mxu1 %v8014_v26  ;;  %v8056_v26 = vld [vmem:[#allocation7 + $0x94] ss:$8 sps:$4 sm:$0xff]  }
 0x26b   :  { %v2579_v12 = vpop.f32.mrf.mxu0 }
 0x26c   :  { %v2580_v31 = vadd.f32 %v2579_v12, %v2021_v21  ;;  %v8044_v12 = vld [vmem:[#allocation7 + $0xd4] ss:$8 sps:$4 sm:$0xff]  }
 0x26d   :  { %v2581_v14 = vpop.f32.mrf.mxu0 }
 0x26e   :  { %v2582_v33 = vadd.f32 %v2581_v14, %v2025_v24  ;;  %v8047_v14 = vld [vmem:[#allocation7 + $0xc4] ss:$8 sps:$4 sm:$0xff]  }
 0x26f   :  { %v2583_v18 = vpop.f32.mrf.mxu0 }
 0x270   :  { %v8050_v18 = vld [vmem:[#allocation7 + $0xb4] ss:$8 sps:$4 sm:$0xff]  }
 0x271   :  { %v2584_v22 = vpop.f32.mrf.mxu0 }
 0x272   :  { %v8053_v22 = vld [vmem:[#allocation7 + $0xa4] ss:$8 sps:$4 sm:$0xff]  }
 0x28b   :  { %v7359_v27 = vpop.f32.mrf.mxu0 }
 0x28d   :  { %v7360_v28 = vpop.f32.mrf.mxu0 }
 0x28e   :  { %v7361_v29 = vadd.f32 %v7360_v28, %v7359_v27  ;;  %v8054_v27 = vld [vmem:[#allocation7 + $0x90] ss:$8 sps:$4 sm:$0xff]   ;;  %v8059_v28 = vld [vmem:[#allocation7 + $0x84] ss:$8 sps:$4 sm:$0xff]  }
 0x28f   :  { %v7362_v30 = vpop.f32.mrf.mxu0 }
 0x290   :  { %v2662_v45 = vadd.f32 %v7361_v29, %v2029_v42  ;;  %v8057_v29 = vld [vmem:[#allocation7 + $0x80] ss:$8 sps:$4 sm:$0xff]   ;;  %v8060_v30 = vld [vmem:[%s9186_s10 + $0x70] ss:$8 sps:$4 sm:$0xff]  }
 0x291   :  { %v7363_v20 = vpop.f32.mrf.mxu0 }
 0x292   :  { %v8062_v20 = vld [vmem:[%s9186_s10 + $0x74] ss:$8 sps:$4 sm:$0xff]  }
 0x293   :  { %3461 = vmatprep.subr.bf16.mxu0 %v8062_v20  ;;  %v3349_v20 = vld [vmem:[%s9208_s22] sm:$0xff] }
 0x2cc   :  { %v2620_v32 = vpop.f32.mrf.mxu1 }
 0x2cd   :  { %v2621_v7 = vadd.f32 %v2620_v32, %v2580_v31  ;;  %v2761_v32 = vld [vmem:[%s9183_s7] sm:$0x3] }
 0x2ce   :  { %v2622_v51 = vpop.f32.mrf.mxu1 }
 0x2cf   :  { %v2623_v34 = vadd.f32 %v2622_v51, %v2582_v33  ;;  %v2707_v36 = vmax.f32 %v2621_v7, 0.0  ;;  %v2766_v33 = vrot.slane %v2761_v32, %v8989_v3  ;;  %v2770_v7 = vrot.slane %v2761_v32, %v8992_v4 }
 0x2d0   :  { %v2624_v37 = vpop.f32.mrf.mxu1 }
 0x2d1   :  { %v2708_v38 = vmax.f32 %v2623_v34, 0.0  ;;  %v2710_v41 = vpack.c.bf16 %v2707_v36, %v2707_v36 }
 0x2d2   :  { %v2625_v39 = vpop.f32.mrf.mxu1 }
 0x2d3   :  { %v2711_v40 = vpack.c.bf16 %v2708_v38, %v2708_v38 }
 0x2d5   :  { %3045 = vmatprep.mubr.bf16.mxu0 %v2711_v40 }
 0x2d6   :  { %3046 = vmatmul.mubr.bf16.vlgmr.msra.gmra.mxu0 %v2710_v41 }
 0x2d7   :  { %3493 = vmatprep.mubr.bf16.mxu0 %v8792_v16  ;;  %3462 = vmatpush1.bf16.msra.mxu0 %v8060_v30 }
 0x2ec   :  { %v7381_v43 = vpop.f32.mrf.mxu1 }
 0x2ee   :  { %v7382_v44 = vpop.f32.mrf.mxu1 }
 0x2ef   :  { %v7383_v46 = vadd.f32 %v7382_v44, %v7381_v43 }
 0x2f0   :  { %v7384_v48 = vpop.f32.mrf.mxu1 }
 0x2f1   :  { %v2702_v52 = vadd.f32 %v7383_v46, %v2662_v45  ;;  %v8065_v46 = vld [vmem:[%s9186_s10 + $0x64] ss:$8 sps:$4 sm:$0xff]   ;;  %v8063_v48 = vld [vmem:[%s9186_s10 + $0x60] ss:$8 sps:$4 sm:$0xff]  }
 0x2f2   :  { %v7385_v53 = vpop.f32.mrf.mxu1  ;;  %3463 = vmatprep.subr.bf16.mxu0 %v8065_v46  ;;  %v8110_v46 = vld [vmem:[#allocation9 + $0x16c] ss:$12 sps:$4 sm:$0xff]  }
 0x2f3   :  { %v2709_v54 = vmax.f32 %v2702_v52, 0.0  ;;  %3464 = vmatpush1.bf16.msra.mxu0 %v8063_v48  ;;  %v8068_v52 = vld [vmem:[%s9186_s10 + $0x54] ss:$8 sps:$4 sm:$0xff]   ;;  %v8066_v53 = vld [vmem:[%s9186_s10 + $0x50] ss:$8 sps:$4 sm:$0xff]  }
 0x2f4   :  { %3465 = vmatprep.subr.bf16.mxu0 %v8068_v52  ;;  %v8108_v48 = vld [vmem:[#allocation9 + $0x168] ss:$12 sps:$4 sm:$0xff]  }
 0x2f5   :  { %v2712_v56 = vpack.c.bf16 %v2709_v54, %v2709_v54  ;;  %v8071_v54 = vld [vmem:[%s9186_s10 + $0x44] ss:$8 sps:$4 sm:$0xff]   ;;  %v8115_v52 = vld [vmem:[#allocation9 + $0x154] ss:$12 sps:$4 sm:$0xff]  }
 0x2f7   :  { %3087 = vmatmul.mubr.bf16.vlgmr.msra.gmra.mxu1 %v2712_v56  ;;  %3466 = vmatpush1.bf16.msra.mxu0 %v8066_v53  ;;  %v8074_v56 = vld [vmem:[%s9186_s10 + $0x34] ss:$8 sps:$4 sm:$0xff]  }
 0x2f8   :  { %3304 = vmatpush1.bf16.msra.mxu1 %v8012_v55  ;;  %v8069_v55 = vld [vmem:[%s9186_s10 + $0x40] ss:$8 sps:$4 sm:$0xff]   ;;  %3467 = vmatprep.subr.bf16.mxu0 %v8071_v54  ;;  %v8113_v53 = vld [vmem:[#allocation9 + $0x150] ss:$12 sps:$4 sm:$0xff]  }
 0x2f9   :  { %3305 = vmatprep.subr.bf16.mxu1 %v8017_v57  ;;  %v8072_v57 = vld [vmem:[%s9186_s10 + $0x30] ss:$8 sps:$4 sm:$0xff]   ;;  %v8120_v54 = vld [vmem:[#allocation9 + $0x13c] ss:$12 sps:$4 sm:$0xff]  }
 0x2fb   :  { %3468 = vmatpush1.bf16.msra.mxu0 %v8069_v55  ;;  %v8118_v55 = vld [vmem:[#allocation9 + $0x138] ss:$12 sps:$4 sm:$0xff]  }
 0x2fc   :  { %3306 = vmatpush1.bf16.msra.mxu1 %v8015_v58  ;;  %3469 = vmatprep.subr.bf16.mxu0 %v8074_v56  ;;  %v8077_v58 = vld [vmem:[%s9186_s10 + $0x24] ss:$8 sps:$4 sm:$0xff]  }
 0x2fd   :  { %3307 = vmatprep.subr.bf16.mxu1 %v8020_v59  ;;  %v8075_v59 = vld [vmem:[%s9186_s10 + $0x20] ss:$8 sps:$4 sm:$0xff]   ;;  %v8125_v56 = vld [vmem:[#allocation9 + $0x124] ss:$12 sps:$4 sm:$0xff]  }
 0x2ff   :  { %3470 = vmatpush1.bf16.msra.mxu0 %v8072_v57  ;;  %v8123_v57 = vld [vmem:[#allocation9 + $0x120] ss:$12 sps:$4 sm:$0xff]  }
 0x300   :  { %3308 = vmatpush1.bf16.msra.mxu1 %v8018_v60  ;;  %3471 = vmatprep.subr.bf16.mxu0 %v8077_v58  ;;  %v8080_v60 = vld [vmem:[%s9186_s10 + $0x14] ss:$8 sps:$4 sm:$0xff]   ;;  %v8130_v58 = vld [vmem:[#allocation9 + $0x10c] ss:$12 sps:$4 sm:$0xff]  }
 0x301   :  { %3309 = vmatprep.subr.bf16.mxu1 %v8023_v61  ;;  %v8078_v61 = vld [vmem:[%s9186_s10 + $0x10] ss:$8 sps:$4 sm:$0xff]  }
 0x303   :  { %3472 = vmatpush1.bf16.msra.mxu0 %v8075_v59  ;;  %v8128_v59 = vld [vmem:[#allocation9 + $0x108] ss:$12 sps:$4 sm:$0xff]  }
 0x304   :  { %3310 = vmatpush1.bf16.msra.mxu1 %v8021_v62  ;;  %3473 = vmatprep.subr.bf16.mxu0 %v8080_v60  ;;  %v8083_v62 = vld [vmem:[%s9186_s10 + $0x4] ss:$8 sps:$4 sm:$0xff]   ;;  %v8135_v60 = vld [vmem:[#allocation9 + $0xf4] ss:$12 sps:$4 sm:$0xff]  }
 0x305   :  { %3311 = vmatprep.subr.bf16.mxu1 %v8026_v15  ;;  %v8081_v15 = vld [vmem:[%s9186_s10] ss:$8 sps:$4 sm:$0xff]  }
 0x307   :  { %3474 = vmatpush1.bf16.msra.mxu0 %v8078_v61  ;;  %v8133_v61 = vld [vmem:[#allocation9 + $0xf0] ss:$12 sps:$4 sm:$0xff]  }
 0x308   :  { %3312 = vmatpush1.bf16.msra.mxu1 %v8024_v47  ;;  %3475 = vmatprep.subr.bf16.mxu0 %v8083_v62  ;;  %v8086_v47 = vld [vmem:[#allocation9 + $0xac] ss:$12 sps:$4 sm:$0xff]   ;;  %v8140_v62 = vld [vmem:[#allocation9 + $0xdc] ss:$12 sps:$4 sm:$0xff]  }
 0x309   :  { %3313 = vmatprep.subr.bf16.mxu1 %v8029_v6  ;;  %v8111_v6 = vld [vmem:[#allocation9 + $0x170] ss:$12 sps:$4 sm:$0xff]  }
 0x30b   :  { %3476 = vmatpush1.bf16.msra.mxu0 %v8081_v15  ;;  %v8141_v15 = vld [vmem:[#allocation9 + $0xe0] ss:$12 sps:$4 sm:$0xff]  }
 0x30c   :  { %3314 = vmatpush1.bf16.msra.mxu1 %v8027_v63  ;;  %3843 = vmatprep.subr.bf16.mxu0 %v8086_v47  ;;  %v8112_v63 = vld [vmem:[#allocation9 + $0xb0] ss:$12 sps:$4 sm:$0xff]   ;;  %v8138_v47 = vld [vmem:[#allocation9 + $0xd8] ss:$12 sps:$4 sm:$0xff]  }
 0x30d   :  { %3315 = vmatprep.subr.bf16.mxu1 %v8032_v0  ;;  %v8116_v0 = vld [vmem:[#allocation9 + $0x158] ss:$12 sps:$4 sm:$0xff]  }
 0x310   :  { %3316 = vmatpush1.bf16.msra.mxu1 %v8030_v35  ;;  %v8117_v35 = vld [vmem:[#allocation9 + $0x98] ss:$12 sps:$4 sm:$0xff]  }
 0x311   :  { %3317 = vmatprep.subr.bf16.mxu1 %v8035_v5  ;;  %v8121_v5 = vld [vmem:[#allocation9 + $0x140] ss:$12 sps:$4 sm:$0xff]  }
 0x314   :  { %3318 = vmatpush1.bf16.msra.mxu1 %v8033_v8  ;;  %v8122_v8 = vld [vmem:[#allocation9 + $0x80] ss:$12 sps:$4 sm:$0xff]  }
 0x315   :  { %3319 = vmatprep.subr.bf16.mxu1 %v8038_v9  ;;  %v8126_v9 = vld [vmem:[#allocation9 + $0x128] ss:$12 sps:$4 sm:$0xff]  }
 0x318   :  { %3320 = vmatpush2.bf16.msra.mxu1 %v8036_v10  ;;  %v8127_v10 = vld [vmem:[#allocation9 + $0x68] ss:$12 sps:$4 sm:$0xff]  }
 0x319   :  { %3321 = vmatprep.subr.bf16.mxu1 %v8041_v2  ;;  %v8131_v2 = vld [vmem:[#allocation9 + $0x110] ss:$12 sps:$4 sm:$0xff]  }
 0x31c   :  { %3322 = vmatpush2.bf16.msra.mxu1 %v8039_v11  ;;  %v8132_v11 = vld [vmem:[#allocation9 + $0x50] ss:$12 sps:$4 sm:$0xff]  }
 0x31d   :  { %3323 = vmatprep.subr.bf16.mxu1 %v8044_v12  ;;  %v8136_v12 = vld [vmem:[#allocation9 + $0xf8] ss:$12 sps:$4 sm:$0xff]  }
 0x320   :  { %3324 = vmatpush2.bf16.msra.mxu1 %v8042_v13  ;;  %v8137_v13 = vld [vmem:[#allocation9 + $0x38] ss:$12 sps:$4 sm:$0xff]  }
 0x321   :  { %3325 = vmatprep.subr.bf16.mxu1 %v8047_v14  ;;  %v3131_v14 = vld [vmem:[%s9185_s9] sm:$0x3] }
 0x324   :  { %3326 = vmatpush2.bf16.msra.mxu1 %v8045_v17  ;;  %v3136_v17 = vrot.slane %v3131_v14, %v8989_v3 }
 0x325   :  { %3327 = vmatprep.subr.bf16.mxu1 %v8050_v18  ;;  %v3140_v18 = vrot.slane %v3131_v14, %v8992_v4 }
 0x328   :  { %3328 = vmatpush2.bf16.msra.mxu1 %v8048_v19 }
 0x329   :  { %3329 = vmatprep.subr.bf16.mxu1 %v8053_v22 }
 0x32c   :  { %3330 = vmatpush2.bf16.msra.mxu1 %v8051_v25 }
 0x32d   :  { %3331 = vmatprep.subr.bf16.mxu1 %v8056_v26 }
 0x330   :  { %3332 = vmatpush2.bf16.msra.mxu1 %v8054_v27 }
 0x331   :  { %3333 = vmatprep.subr.bf16.mxu1 %v8059_v28 }
 0x334   :  { %3334 = vmatpush2.bf16.msra.mxu1 %v8057_v29 }
 0x335   :  { %7387 = vmatprep.subr.bf16.mxu1 %v8111_v6  ;;  %v8142_v6 = vld [vmem:[#allocation9 + $0x20] ss:$12 sps:$4 sm:$0xff]  }
 0x396   :  { %v3047_v23 = vpop.f32.mrf.mxu0 }
 0x397   :  { %v3048_v51 = vadd.f32 %v3047_v23, %v2766_v33  ;;  %v8089_v33 = vld [vmem:[#allocation9 + $0x94] ss:$12 sps:$4 sm:$0xff]  }
 0x398   :  { %v3049_v21 = vpop.f32.mrf.mxu0 }
 0x399   :  { %v3050_v36 = vadd.f32 %v3049_v21, %v2770_v7  ;;  %v8087_v7 = vld [vmem:[#allocation9 + $0x90] ss:$12 sps:$4 sm:$0xff]  }
 0x39a   :  { %v3051_v24 = vpop.f32.mrf.mxu0 }
 0x39c   :  { %v3052_v31 = vpop.f32.mrf.mxu0 }
 0x39d   :  { %v8084_v31 = vld [vmem:[#allocation9 + $0xa8] ss:$12 sps:$4 sm:$0xff]  }
 0x3b7   :  { %v3088_v34 = vpop.f32.mrf.mxu1 }
 0x3b8   :  { %v3089_v37 = vadd.f32 %v3088_v34, %v3048_v51  ;;  %v8092_v51 = vld [vmem:[#allocation9 + $0x7c] ss:$12 sps:$4 sm:$0xff]   ;;  %v8090_v34 = vld [vmem:[#allocation9 + $0x78] ss:$12 sps:$4 sm:$0xff]  }
 0x3b9   :  { %v3090_v38 = vpop.f32.mrf.mxu1 }
 0x3ba   :  { %v3091_v39 = vadd.f32 %v3090_v38, %v3050_v36  ;;  %v3095_v40 = vmax.f32 %v3089_v37, 0.0  ;;  %v8095_v36 = vld [vmem:[#allocation9 + $0x64] ss:$12 sps:$4 sm:$0xff]   ;;  %v8093_v37 = vld [vmem:[#allocation9 + $0x60] ss:$12 sps:$4 sm:$0xff]  }
 0x3bb   :  { %v3092_v41 = vpop.f32.mrf.mxu1  ;;  %v8098_v38 = vld [vmem:[#allocation9 + $0x4c] ss:$12 sps:$4 sm:$0xff]  }
 0x3bc   :  { %v3096_v42 = vmax.f32 %v3091_v39, 0.0  ;;  %v3097_v45 = vpack.c.bf16 %v3095_v40, %v3095_v40  ;;  %v8096_v39 = vld [vmem:[#allocation9 + $0x48] ss:$12 sps:$4 sm:$0xff]   ;;  %v8099_v41 = vld [vmem:[#allocation9 + $0x30] ss:$12 sps:$4 sm:$0xff]  }
 0x3bd   :  { %v3093_v43 = vpop.f32.mrf.mxu1  ;;  %v8101_v40 = vld [vmem:[#allocation9 + $0x34] ss:$12 sps:$4 sm:$0xff]  }
 0x3be   :  { %v3098_v44 = vpack.c.bf16 %v3096_v42, %v3096_v42  ;;  %v8104_v42 = vld [vmem:[#allocation9 + $0x1c] ss:$12 sps:$4 sm:$0xff]   ;;  %v8102_v43 = vld [vmem:[#allocation9 + $0x18] ss:$12 sps:$4 sm:$0xff]  }
 0x3c0   :  { %3335 = vmatprep.mubr.bf16.mxu1 %v3098_v44  ;;  %v8107_v44 = vld [vmem:[#allocation9 + $0x4] ss:$12 sps:$4 sm:$0xff]  }
 0x3c1   :  { %3336 = vmatmul.mubr.bf16.vlgmr.msra.gmra.mxu1 %v3097_v45  ;;  %v8105_v45 = vld [vmem:[#allocation9] ss:$12 sps:$4 sm:$0xff]  }
 0x3c2   :  { %7388 = vmatpush3.bf16.msra.mxu1 %v8112_v63  ;;  %v8145_v63 = vld [vmem:[#allocation9 + $0xc4] ss:$12 sps:$4 sm:$0xff]  }
 0x3c3   :  { %7389 = vmatprep.subr.bf16.mxu1 %v8116_v0  ;;  %v8146_v0 = vld [vmem:[#allocation9 + $0xc8] ss:$12 sps:$4 sm:$0xff]  }
 0x3c6   :  { %7390 = vmatpush3.bf16.msra.mxu1 %v8117_v35  ;;  %v8143_v35 = vld [vmem:[#allocation9 + $0xc0] ss:$12 sps:$4 sm:$0xff]  }
 0x3c7   :  { %7391 = vmatprep.subr.bf16.mxu1 %v8121_v5  ;;  %v8147_v5 = vld [vmem:[#allocation9 + $0x8] ss:$12 sps:$4 sm:$0xff]  }
 0x3ca   :  { %7392 = vmatpush3.bf16.msra.mxu1 %v8122_v8  ;;  %v8150_v8 = vld [vmem:[#allocation10 + $0xe4] ss:$16 sps:$4 sm:$0xff]  }
 0x3cb   :  { %7393 = vmatprep.subr.bf16.mxu1 %v8126_v9  ;;  %v8177_v9 = vld [vmem:[#allocation10 + $0x2e4] ss:$16 sps:$4 sm:$0xff]  }
 0x3ce   :  { %7394 = vmatpush3.bf16.msra.mxu1 %v8127_v10  ;;  %v3369_v10 = vld [vmem:[%s9187_s11] sm:$0x3] }
 0x3cf   :  { %7395 = vmatprep.subr.bf16.mxu1 %v8131_v2  ;;  %v3374_v2 = vrot.slane %v3369_v10, %v8989_v3 }
 0x3d2   :  { %7396 = vmatpush3.bf16.msra.mxu1 %v8132_v11  ;;  %v3378_v11 = vrot.slane %v3369_v10, %v8992_v4  ;;  %v8217_v10 = vld [vmem:[#allocation10 + $0x200] ss:$16 sps:$4 sm:$0xff]  }
 0x3d3   :  { %7397 = vmatprep.subr.bf16.mxu1 %v8136_v12 }
 0x3d6   :  { %7398 = vmatpush3.bf16.msra.mxu1 %v8137_v13 }
 0x3d7   :  { %7399 = vmatprep.subr.bf16.mxu1 %v8141_v15  ;;  %v8204_v15 = vld [vmem:[#allocation10 + $0x144] ss:$16 sps:$4 sm:$0xff]  }
 0x3da   :  { %7400 = vmatpush3.bf16.msra.mxu1 %v8142_v6  ;;  %v8210_v6 = vld [vmem:[#allocation10 + $0x124] ss:$16 sps:$4 sm:$0xff]  }
 0x3db   :  { %7401 = vmatprep.subr.bf16.mxu1 %v8146_v0  ;;  %v8213_v0 = vld [vmem:[#allocation10 + $0x224] ss:$16 sps:$4 sm:$0xff]  }
 0x3de   :  { %7402 = vmatpush3.bf16.msra.mxu1 %v8147_v5  ;;  %v8216_v5 = vld [vmem:[#allocation10 + $0x104] ss:$16 sps:$4 sm:$0xff]  }
 0x3df   :  { %4528 = vmatprep.subr.bf16.mxu1 %v8150_v8  ;;  %v8214_v8 = vld [vmem:[#allocation10 + $0x100] ss:$16 sps:$4 sm:$0xff]  }
 0x481   :  { %v3337_v19 = vpop.f32.mrf.mxu1 }
 0x482   :  { %v3338_v22 = vadd.f32 %v3337_v19, %v3136_v17 }
 0x483   :  { %v3339_v25 = vpop.f32.mrf.mxu1 }
 0x484   :  { %3344 = vst [vmem:[%s9194_s18] sm:$0xff] %v3338_v22  ;;  %v3340_v26 = vadd.f32 %v3339_v25, %v3140_v18 }
 0x485   :  { %v3341_v27 = vpop.f32.mrf.mxu1 }
 0x486   :  { %3345 = vst [vmem:[%s9194_s18 + $0x8] sm:$0xff] %v3340_v26  ;;  %v3346_v28 = vmul.f32 0.5, %v3340_v26  ;;  %v8148_v27 = vld [vmem:[#allocation10 + $0xe0] ss:$16 sps:$4 sm:$0xff]  }
 0x487   :  { %v3342_v29 = vpop.f32.mrf.mxu1 }
 0x488   :  { %v3347_v30 = vmul.f32 1.442695, %v3346_v28  ;;  %v8175_v28 = vld [vmem:[#allocation10 + $0x2e0] ss:$16 sps:$4 sm:$0xff]  }
 0x48a   :  { %8612 = vpow2.f32 %v3347_v30  ;;  %v8153_v30 = vld [vmem:[#allocation10 + $0xc4] ss:$16 sps:$4 sm:$0xff]  }
 0x497   :  { %v8613_v23 = vpop.eup %8612 }
 0x498   :  { %v3350_v21 = vmul.f32 %v8613_v23, %v3349_v20  ;;  %v8183_v20 = vld [vmem:[#allocation10 + $0x2c4] ss:$16 sps:$4 sm:$0xff]   ;;  %v8151_v23 = vld [vmem:[#allocation10 + $0xc0] ss:$16 sps:$4 sm:$0xff]  }
 0x49a   :  { %v3351_v24 = vadd.f32 %v3350_v21, %v3338_v22  ;;  %v8181_v21 = vld [vmem:[#allocation10 + $0x2c0] ss:$16 sps:$4 sm:$0xff]  }
 0x49c   :  { %v3352_v32 = vpack.c.bf16 %v3351_v24, %v3351_v24  ;;  %v8156_v24 = vld [vmem:[#allocation10 + $0xa4] ss:$16 sps:$4 sm:$0xff]  }
 0x49e   :  { %3494 = vmatmul.mubr.bf16.vlgmr.msra.gmra.mxu0 %v3352_v32  ;;  %v8154_v32 = vld [vmem:[#allocation10 + $0xa0] ss:$16 sps:$4 sm:$0xff]  }
 0x49f   :  { %3844 = vmatpush1.bf16.msra.mxu0 %v8084_v31  ;;  %v8189_v31 = vld [vmem:[#allocation10 + $0x2a4] ss:$16 sps:$4 sm:$0xff]  }
 0x4a0   :  { %3845 = vmatprep.subr.bf16.mxu0 %v8089_v33  ;;  %v8187_v33 = vld [vmem:[#allocation10 + $0x2a0] ss:$16 sps:$4 sm:$0xff]  }
 0x4a3   :  { %3846 = vmatpush1.bf16.msra.mxu0 %v8087_v7  ;;  %v8159_v7 = vld [vmem:[#allocation10 + $0x84] ss:$16 sps:$4 sm:$0xff]  }
 0x4a4   :  { %3847 = vmatprep.subr.bf16.mxu0 %v8092_v51  ;;  %v8195_v51 = vld [vmem:[#allocation10 + $0x284] ss:$16 sps:$4 sm:$0xff]  }
 0x4a7   :  { %3848 = vmatpush1.bf16.msra.mxu0 %v8090_v34  ;;  %v8157_v34 = vld [vmem:[#allocation10 + $0x80] ss:$16 sps:$4 sm:$0xff]  }
 0x4a8   :  { %3849 = vmatprep.subr.bf16.mxu0 %v8095_v36  ;;  %v8193_v36 = vld [vmem:[#allocation10 + $0x280] ss:$16 sps:$4 sm:$0xff]  }
 0x4ab   :  { %3850 = vmatpush1.bf16.msra.mxu0 %v8093_v37  ;;  %v8162_v37 = vld [vmem:[#allocation10 + $0x64] ss:$16 sps:$4 sm:$0xff]  }
 0x4ac   :  { %3851 = vmatprep.subr.bf16.mxu0 %v8098_v38  ;;  %v8201_v38 = vld [vmem:[#allocation10 + $0x264] ss:$16 sps:$4 sm:$0xff]  }
 0x4af   :  { %3852 = vmatpush1.bf16.msra.mxu0 %v8096_v39  ;;  %v8160_v39 = vld [vmem:[#allocation10 + $0x60] ss:$16 sps:$4 sm:$0xff]  }
 0x4b0   :  { %3853 = vmatprep.subr.bf16.mxu0 %v8101_v40  ;;  %v8199_v40 = vld [vmem:[#allocation10 + $0x260] ss:$16 sps:$4 sm:$0xff]  }
 0x4b3   :  { %3854 = vmatpush1.bf16.msra.mxu0 %v8099_v41  ;;  %v8165_v41 = vld [vmem:[#allocation10 + $0x44] ss:$16 sps:$4 sm:$0xff]  }
 0x4b4   :  { %3855 = vmatprep.subr.bf16.mxu0 %v8104_v42  ;;  %v8207_v42 = vld [vmem:[#allocation10 + $0x244] ss:$16 sps:$4 sm:$0xff]  }
 0x4b7   :  { %3856 = vmatpush1.bf16.msra.mxu0 %v8102_v43  ;;  %v8163_v43 = vld [vmem:[#allocation10 + $0x40] ss:$16 sps:$4 sm:$0xff]  }
 0x4b8   :  { %3857 = vmatprep.subr.bf16.mxu0 %v8107_v44  ;;  %v8205_v44 = vld [vmem:[#allocation10 + $0x240] ss:$16 sps:$4 sm:$0xff]  }
 0x4bb   :  { %3858 = vmatpush1.bf16.msra.mxu0 %v8105_v45  ;;  %v8168_v45 = vld [vmem:[#allocation10 + $0x24] ss:$16 sps:$4 sm:$0xff]  }
 0x4bc   :  { %3859 = vmatprep.subr.bf16.mxu0 %v8110_v46  ;;  %v8166_v46 = vld [vmem:[#allocation10 + $0x20] ss:$16 sps:$4 sm:$0xff]  }
 0x4bf   :  { %3860 = vmatpush2.bf16.msra.mxu0 %v8108_v48  ;;  %v8171_v48 = vld [vmem:[#allocation10 + $0x4] ss:$16 sps:$4 sm:$0xff]  }
 0x4c0   :  { %3861 = vmatprep.subr.bf16.mxu0 %v8115_v52  ;;  %v8169_v52 = vld [vmem:[#allocation10] ss:$16 sps:$4 sm:$0xff]  }
 0x4c3   :  { %3862 = vmatpush2.bf16.msra.mxu0 %v8113_v53  ;;  %v8174_v53 = vld [vmem:[#allocation10 + $0x1e4] ss:$16 sps:$4 sm:$0xff]  }
 0x4c4   :  { %3863 = vmatprep.subr.bf16.mxu0 %v8120_v54  ;;  %v8172_v54 = vld [vmem:[#allocation10 + $0x1e0] ss:$16 sps:$4 sm:$0xff]  }
 0x4c7   :  { %3864 = vmatpush2.bf16.msra.mxu0 %v8118_v55  ;;  %v8180_v55 = vld [vmem:[#allocation10 + $0x1c4] ss:$16 sps:$4 sm:$0xff]  }
 0x4c8   :  { %3865 = vmatprep.subr.bf16.mxu0 %v8125_v56  ;;  %v8178_v56 = vld [vmem:[#allocation10 + $0x1c0] ss:$16 sps:$4 sm:$0xff]  }
 0x4cb   :  { %3866 = vmatpush2.bf16.msra.mxu0 %v8123_v57  ;;  %v8186_v57 = vld [vmem:[#allocation10 + $0x1a4] ss:$16 sps:$4 sm:$0xff]  }
 0x4cc   :  { %3867 = vmatprep.subr.bf16.mxu0 %v8130_v58  ;;  %v8184_v58 = vld [vmem:[#allocation10 + $0x1a0] ss:$16 sps:$4 sm:$0xff]  }
 0x4cf   :  { %3868 = vmatpush2.bf16.msra.mxu0 %v8128_v59  ;;  %v8192_v59 = vld [vmem:[#allocation10 + $0x184] ss:$16 sps:$4 sm:$0xff]  }
 0x4d0   :  { %3869 = vmatprep.subr.bf16.mxu0 %v8135_v60  ;;  %v8190_v60 = vld [vmem:[#allocation10 + $0x180] ss:$16 sps:$4 sm:$0xff]  }
 0x4d3   :  { %3870 = vmatpush2.bf16.msra.mxu0 %v8133_v61  ;;  %v8198_v61 = vld [vmem:[#allocation10 + $0x164] ss:$16 sps:$4 sm:$0xff]  }
 0x4d4   :  { %3871 = vmatprep.subr.bf16.mxu0 %v8140_v62  ;;  %v8196_v62 = vld [vmem:[#allocation10 + $0x160] ss:$16 sps:$4 sm:$0xff]  }
 0x4d7   :  { %3872 = vmatpush2.bf16.msra.mxu0 %v8138_v47  ;;  %v8202_v47 = vld [vmem:[#allocation10 + $0x140] ss:$16 sps:$4 sm:$0xff]  }
 0x4d8   :  { %3873 = vmatprep.subr.bf16.mxu0 %v8145_v63  ;;  %v8208_v63 = vld [vmem:[#allocation10 + $0x120] ss:$16 sps:$4 sm:$0xff]  }
 0x4db   :  { %3874 = vmatpush2.bf16.msra.mxu0 %v8143_v35  ;;  %v8211_v35 = vld [vmem:[#allocation10 + $0x220] ss:$16 sps:$4 sm:$0xff]  }
 0x4dc   :  { %4569 = vmatprep.subr.bf16.mxu0 %v8177_v9  ;;  %v8219_v9 = vld [vmem:[#allocation10 + $0x204] ss:$16 sps:$4 sm:$0xff]  }
 0x55e   :  { %v3495_v12 = vpop.f32.mrf.mxu0 }
 0x55f   :  { %v3496_v13 = vadd.f32 %v3495_v12, %v3374_v2  ;;  %v8222_v2 = vld [vmem:[#allocation10 + $0x2ec] ss:$16 sps:$4 sm:$0xff]   ;;  %v3570_v12 = vld [vmem:[%s9189_s13] sm:$0x7] }
 0x560   :  { %v3497_v14 = vpop.f32.mrf.mxu0 }
 0x561   :  { %v3498_v17 = vadd.f32 %v3497_v14, %v3378_v11  ;;  %v3502_v18 = vmax.f32 %v3496_v13, 0.0  ;;  %v8225_v11 = vld [vmem:[#allocation10 + $0xec] ss:$16 sps:$4 sm:$0xff]   ;;  %v3575_v13 = vrot.slane %v3570_v12, %v8989_v3  ;;  %v3579_v14 = vrot.slane %v3570_v12, %v8992_v4 }
 0x562   :  { %v3499_v19 = vpop.f32.mrf.mxu0 }
 0x563   :  { %v3503_v22 = vmax.f32 %v3498_v17, 0.0  ;;  %v3504_v29 = vpack.c.bf16 %v3502_v18, %v3502_v18 }
 0x564   :  { %v3500_v25 = vpop.f32.mrf.mxu0 }
 0x565   :  { %v3505_v26 = vpack.c.bf16 %v3503_v22, %v3503_v22  ;;  %v3583_v22 = vrot.slane %v3570_v12, %v9003_v49  ;;  %v8271_v12 = vld [vmem:[#allocation10 + $0x1c8] ss:$16 sps:$4 sm:$0xff]  }
 0x567   :  { %3875 = vmatprep.mubr.bf16.mxu0 %v3505_v26  ;;  %3916 = vmatprep.mubr.bf16.mxu1 %v3505_v26 }
 0x568   :  { %3876 = vmatmul.mubr.bf16.vlgmr.msra.gmra.mxu0 %v3504_v29  ;;  %3917 = vmatmul.mubr.bf16.vlgmr.msra.gmra.mxu1 %v3504_v29 }
 0x569   :  { %4529 = vmatpush1.bf16.msra.mxu1 %v8148_v27  ;;  %4570 = vmatpush1.bf16.msra.mxu0 %v8175_v28 }
 0x56a   :  { %4530 = vmatprep.subr.bf16.mxu1 %v8153_v30  ;;  %4571 = vmatprep.subr.bf16.mxu0 %v8183_v20 }
 0x56b   :  { %4601 = vmatprep.mubr.bf16.mxu0 %v8792_v16 }
 0x56d   :  { %4531 = vmatpush1.bf16.msra.mxu1 %v8151_v23  ;;  %4572 = vmatpush1.bf16.msra.mxu0 %v8181_v21 }
 0x56e   :  { %4532 = vmatprep.subr.bf16.mxu1 %v8156_v24  ;;  %4573 = vmatprep.subr.bf16.mxu0 %v8189_v31 }
 0x571   :  { %4533 = vmatpush1.bf16.msra.mxu1 %v8154_v32  ;;  %4574 = vmatpush1.bf16.msra.mxu0 %v8187_v33 }
 0x572   :  { %4534 = vmatprep.subr.bf16.mxu1 %v8159_v7  ;;  %4575 = vmatprep.subr.bf16.mxu0 %v8195_v51  ;;  %v8220_v7 = vld [vmem:[#allocation10 + $0x2e8] ss:$16 sps:$4 sm:$0xff]  }
 0x575   :  { %4535 = vmatpush1.bf16.msra.mxu1 %v8157_v34  ;;  %4576 = vmatpush1.bf16.msra.mxu0 %v8193_v36  ;;  %v8223_v34 = vld [vmem:[#allocation10 + $0xe8] ss:$16 sps:$4 sm:$0xff]  }
 0x576   :  { %4536 = vmatprep.subr.bf16.mxu1 %v8162_v37  ;;  %4577 = vmatprep.subr.bf16.mxu0 %v8201_v38  ;;  %v8228_v37 = vld [vmem:[#allocation10 + $0x2cc] ss:$16 sps:$4 sm:$0xff]  }
 0x577   :  { %v8231_v38 = vld [vmem:[#allocation10 + $0xcc] ss:$16 sps:$4 sm:$0xff]  }
 0x579   :  { %4537 = vmatpush1.bf16.msra.mxu1 %v8160_v39  ;;  %4578 = vmatpush1.bf16.msra.mxu0 %v8199_v40  ;;  %v8226_v39 = vld [vmem:[#allocation10 + $0x2c8] ss:$16 sps:$4 sm:$0xff]  }
 0x57a   :  { %4538 = vmatprep.subr.bf16.mxu1 %v8165_v41  ;;  %4579 = vmatprep.subr.bf16.mxu0 %v8207_v42  ;;  %v8229_v40 = vld [vmem:[#allocation10 + $0xc8] ss:$16 sps:$4 sm:$0xff]   ;;  %v8234_v41 = vld [vmem:[#allocation10 + $0x2ac] ss:$16 sps:$4 sm:$0xff]  }
 0x57b   :  { %v8237_v42 = vld [vmem:[#allocation10 + $0xac] ss:$16 sps:$4 sm:$0xff]  }
 0x57d   :  { %4539 = vmatpush1.bf16.msra.mxu1 %v8163_v43  ;;  %4580 = vmatpush1.bf16.msra.mxu0 %v8205_v44  ;;  %v8232_v43 = vld [vmem:[#allocation10 + $0x2a8] ss:$16 sps:$4 sm:$0xff]  }
 0x57e   :  { %4540 = vmatprep.subr.bf16.mxu1 %v8168_v45  ;;  %4581 = vmatprep.subr.bf16.mxu0 %v8213_v0  ;;  %v8235_v44 = vld [vmem:[#allocation10 + $0xa8] ss:$16 sps:$4 sm:$0xff]   ;;  %v8240_v45 = vld [vmem:[#allocation10 + $0x28c] ss:$16 sps:$4 sm:$0xff]  }
 0x57f   :  { %v8265_v0 = vld [vmem:[#allocation10 + $0x8] ss:$16 sps:$4 sm:$0xff]  }
 0x581   :  { %4541 = vmatpush1.bf16.msra.mxu1 %v8166_v46  ;;  %4582 = vmatpush1.bf16.msra.mxu0 %v8211_v35  ;;  %v8243_v46 = vld [vmem:[#allocation10 + $0x8c] ss:$16 sps:$4 sm:$0xff]  }
 0x582   :  { %4542 = vmatprep.subr.bf16.mxu1 %v8171_v48  ;;  %4583 = vmatprep.subr.bf16.mxu0 %v8219_v9  ;;  %v8238_v48 = vld [vmem:[#allocation10 + $0x288] ss:$16 sps:$4 sm:$0xff]  }
 0x583   :  { %v8294_v35 = vld [vmem:[#allocation12 + $0x18c] ss:$28 sps:$4 sm:$0xff]  }
 0x584   :  { %v8268_v9 = vld [vmem:[#allocation10 + $0x1e8] ss:$16 sps:$4 sm:$0xff]  }
 0x585   :  { %4543 = vmatpush1.bf16.msra.mxu1 %v8169_v52  ;;  %4584 = vmatpush1.bf16.msra.mxu0 %v8217_v10  ;;  %v8241_v52 = vld [vmem:[#allocation10 + $0x88] ss:$16 sps:$4 sm:$0xff]   ;;  %v8297_v10 = vld [vmem:[#allocation12 + $0x154] ss:$28 sps:$4 sm:$0xff]  }
 0x586   :  { %4544 = vmatprep.subr.bf16.mxu1 %v8174_v53  ;;  %4610 = vmatprep.subr.bf16.mxu0 %v8225_v11  ;;  %v8246_v53 = vld [vmem:[#allocation10 + $0x26c] ss:$16 sps:$4 sm:$0xff]  }
 0x587   :  { %v8295_v11 = vld [vmem:[#allocation12 + $0x150] ss:$28 sps:$4 sm:$0xff]  }
 0x589   :  { %4545 = vmatpush2.bf16.msra.mxu1 %v8172_v54  ;;  %v8249_v54 = vld [vmem:[#allocation10 + $0x6c] ss:$16 sps:$4 sm:$0xff]  }
 0x58a   :  { %4546 = vmatprep.subr.bf16.mxu1 %v8180_v55  ;;  %v8244_v55 = vld [vmem:[#allocation10 + $0x268] ss:$16 sps:$4 sm:$0xff]  }
 0x58d   :  { %4547 = vmatpush2.bf16.msra.mxu1 %v8178_v56  ;;  %v8252_v56 = vld [vmem:[#allocation10 + $0x24c] ss:$16 sps:$4 sm:$0xff]  }
 0x58e   :  { %4548 = vmatprep.subr.bf16.mxu1 %v8186_v57  ;;  %v8255_v57 = vld [vmem:[#allocation10 + $0x4c] ss:$16 sps:$4 sm:$0xff]  }
 0x591   :  { %4549 = vmatpush2.bf16.msra.mxu1 %v8184_v58  ;;  %v8250_v58 = vld [vmem:[#allocation10 + $0x248] ss:$16 sps:$4 sm:$0xff]  }
 0x592   :  { %4550 = vmatprep.subr.bf16.mxu1 %v8192_v59  ;;  %v8253_v59 = vld [vmem:[#allocation10 + $0x48] ss:$16 sps:$4 sm:$0xff]  }
 0x595   :  { %4551 = vmatpush2.bf16.msra.mxu1 %v8190_v60  ;;  %v8258_v60 = vld [vmem:[#allocation10 + $0x22c] ss:$16 sps:$4 sm:$0xff]  }
 0x596   :  { %4552 = vmatprep.subr.bf16.mxu1 %v8198_v61  ;;  %v8261_v61 = vld [vmem:[#allocation10 + $0x2c] ss:$16 sps:$4 sm:$0xff]  }
 0x599   :  { %4553 = vmatpush2.bf16.msra.mxu1 %v8196_v62  ;;  %v8256_v62 = vld [vmem:[#allocation10 + $0x228] ss:$16 sps:$4 sm:$0xff]  }
 0x59a   :  { %4554 = vmatprep.subr.bf16.mxu1 %v8204_v15  ;;  %v8259_v15 = vld [vmem:[#allocation10 + $0x28] ss:$16 sps:$4 sm:$0xff]  }
 0x59d   :  { %4555 = vmatpush2.bf16.msra.mxu1 %v8202_v47  ;;  %v8264_v47 = vld [vmem:[#allocation10 + $0x20c] ss:$16 sps:$4 sm:$0xff]  }
 0x59e   :  { %4556 = vmatprep.subr.bf16.mxu1 %v8210_v6  ;;  %v8267_v6 = vld [vmem:[#allocation10 + $0xc] ss:$16 sps:$4 sm:$0xff]  }
 0x5a1   :  { %4557 = vmatpush2.bf16.msra.mxu1 %v8208_v63  ;;  %v8262_v63 = vld [vmem:[#allocation10 + $0x208] ss:$16 sps:$4 sm:$0xff]  }
 0x5a2   :  { %4558 = vmatprep.subr.bf16.mxu1 %v8216_v5  ;;  %v8270_v5 = vld [vmem:[#allocation10 + $0x1ec] ss:$16 sps:$4 sm:$0xff]  }
 0x5a5   :  { %4559 = vmatpush2.bf16.msra.mxu1 %v8214_v8  ;;  %v8292_v8 = vld [vmem:[#allocation12 + $0x188] ss:$28 sps:$4 sm:$0xff]  }
 0x5a6   :  { %4651 = vmatprep.subr.bf16.mxu1 %v8222_v2  ;;  %v8273_v2 = vld [vmem:[#allocation10 + $0x1cc] ss:$16 sps:$4 sm:$0xff]  }
 0x628   :  { %v3877_v17 = vpop.f32.mrf.mxu0  ;;  %v7403_v18 = vpop.f32.mrf.mxu1 }
 0x629   :  { %v3878_v19 = vadd.f32 %v3877_v17, %v3575_v13  ;;  %v8300_v13 = vld [vmem:[#allocation12 + $0x11c] ss:$28 sps:$4 sm:$0xff]  }
 0x62a   :  { %v3879_v25 = vpop.f32.mrf.mxu0  ;;  %v7404_v26 = vpop.f32.mrf.mxu1  ;;  %v8298_v17 = vld [vmem:[#allocation12 + $0x118] ss:$28 sps:$4 sm:$0xff]  }
 0x62b   :  { %v3880_v27 = vadd.f32 %v3879_v25, %v3579_v14  ;;  %v7405_v28 = vadd.f32 %v7404_v26, %v7403_v18  ;;  %v3924_v29 = vmax.f32 %v3878_v19, 0.0  ;;  %v8276_v14 = vld [vmem:[#allocation10 + $0x1ac] ss:$16 sps:$4 sm:$0xff]   ;;  %v8274_v18 = vld [vmem:[#allocation10 + $0x1a8] ss:$16 sps:$4 sm:$0xff]  }
 0x62c   :  { %v3881_v30 = vpop.f32.mrf.mxu0  ;;  %v7406_v20 = vpop.f32.mrf.mxu1  ;;  %v8303_v19 = vld [vmem:[#allocation12 + $0xe4] ss:$28 sps:$4 sm:$0xff]   ;;  %v8277_v26 = vld [vmem:[#allocation10 + $0x188] ss:$16 sps:$4 sm:$0xff]  }
 0x62d   :  { %v3925_v23 = vmax.f32 %v3880_v27, 0.0  ;;  %v3919_v21 = vadd.f32 %v7405_v28, %v3583_v22  ;;  %v9099_v51 = vpack.c.bf16 %v3924_v29, %v3924_v29  ;;  %v8279_v22 = vld [vmem:[#allocation10 + $0x18c] ss:$16 sps:$4 sm:$0xff]   ;;  %v8304_v29 = vld [vmem:[#allocation12 + $0xa8] ss:$28 sps:$4 sm:$0xff]  }
 0x62e   :  { %v3882_v24 = vpop.f32.mrf.mxu0  ;;  %v7407_v31 = vpop.f32.mrf.mxu1  ;;  %v8301_v25 = vld [vmem:[#allocation12 + $0xe0] ss:$28 sps:$4 sm:$0xff]   ;;  %v8306_v27 = vld [vmem:[#allocation12 + $0xac] ss:$28 sps:$4 sm:$0xff]   ;;  %v8309_v20 = vld [vmem:[#allocation12 + $0x74] ss:$28 sps:$4 sm:$0xff]  }
 0x62f   :  { %v3928_v32 = vpack.c.bf16 %v3925_v23, %v3925_v23  ;;  %v3926_v33 = vmax.f32 %v3919_v21, 0.0  ;;  %v8282_v28 = vld [vmem:[#allocation10 + $0x16c] ss:$16 sps:$4 sm:$0xff]   ;;  %v8280_v30 = vld [vmem:[#allocation10 + $0x168] ss:$16 sps:$4 sm:$0xff]  }
 0x630   :  { %v8285_v23 = vld [vmem:[#allocation10 + $0x14c] ss:$16 sps:$4 sm:$0xff]   ;;  %v8283_v24 = vld [vmem:[#allocation10 + $0x148] ss:$16 sps:$4 sm:$0xff]  }
 0x631   :  { %v9101_v36 = vpack.c.bf16 %v3926_v33, %v3926_v33  ;;  %4560 = vmatprep.mubr.bf16.mxu1 %v3928_v32  ;;  %v8307_v21 = vld [vmem:[#allocation12 + $0x70] ss:$28 sps:$4 sm:$0xff]   ;;  %v8312_v31 = vld [vmem:[#allocation12 + $0x3c] ss:$28 sps:$4 sm:$0xff]  }
 0x632   :  { %4561 = vmatmul.mubr.bf16.vlgmr.msra.gmra.mxu1 %v9099_v51  ;;  %v8310_v33 = vld [vmem:[#allocation12 + $0x38] ss:$28 sps:$4 sm:$0xff]  }
 0x633   :  { %4652 = vmatpush1.bf16.msra.mxu1 %v8220_v7  ;;  %4602 = vmatmul.mubr.bf16.vlgmr.msra.gmra.mxu0 %v9101_v36  ;;  %v8286_v7 = vld [vmem:[#allocation10 + $0x128] ss:$16 sps:$4 sm:$0xff]  }
 0x634   :  { %4611 = vmatpush1.bf16.msra.mxu0 %v8223_v34  ;;  %4642 = vmatprep.mubr.bf16.mxu0 %v3928_v32  ;;  %v8288_v32 = vld [vmem:[#allocation10 + $0x12c] ss:$16 sps:$4 sm:$0xff]   ;;  %v8315_v34 = vld [vmem:[#allocation12 + $0x4] ss:$28 sps:$4 sm:$0xff]  }
 0x635   :  { %4653 = vmatprep.subr.bf16.mxu1 %v8228_v37  ;;  %4612 = vmatprep.subr.bf16.mxu0 %v8231_v38  ;;  %v8313_v37 = vld [vmem:[#allocation12] ss:$28 sps:$4 sm:$0xff]   ;;  %v8289_v38 = vld [vmem:[#allocation10 + $0x108] ss:$16 sps:$4 sm:$0xff]  }
 0x636   :  { %4683 = vmatprep.mubr.bf16.mxu1 %v8792_v16  ;;  %v8247_v16 = vld [vmem:[#allocation10 + $0x68] ss:$16 sps:$4 sm:$0xff]  }
 0x637   :  { %4654 = vmatpush1.bf16.msra.mxu1 %v8226_v39  ;;  %v8318_v39 = vld [vmem:[#allocation12 + $0x34c] ss:$28 sps:$4 sm:$0xff]  }
 0x638   :  { %4613 = vmatpush1.bf16.msra.mxu0 %v8229_v40  ;;  %4655 = vmatprep.subr.bf16.mxu1 %v8234_v41  ;;  %v8316_v40 = vld [vmem:[#allocation12 + $0x348] ss:$28 sps:$4 sm:$0xff]   ;;  %v8321_v41 = vld [vmem:[#allocation12 + $0x314] ss:$28 sps:$4 sm:$0xff]  }
 0x639   :  { %4614 = vmatprep.subr.bf16.mxu0 %v8237_v42  ;;  %v8319_v42 = vld [vmem:[#allocation12 + $0x310] ss:$28 sps:$4 sm:$0xff]  }
 0x63b   :  { %4656 = vmatpush1.bf16.msra.mxu1 %v8232_v43  ;;  %v8324_v43 = vld [vmem:[#allocation12 + $0x2dc] ss:$28 sps:$4 sm:$0xff]  }
 0x63c   :  { %4615 = vmatpush1.bf16.msra.mxu0 %v8235_v44  ;;  %4657 = vmatprep.subr.bf16.mxu1 %v8240_v45  ;;  %v8322_v44 = vld [vmem:[#allocation12 + $0x2d8] ss:$28 sps:$4 sm:$0xff]   ;;  %v8327_v45 = vld [vmem:[#allocation12 + $0x2a4] ss:$28 sps:$4 sm:$0xff]  }
 0x63d   :  { %4616 = vmatprep.subr.bf16.mxu0 %v8243_v46  ;;  %v8325_v46 = vld [vmem:[#allocation12 + $0x2a0] ss:$28 sps:$4 sm:$0xff]  }
 0x63f   :  { %4658 = vmatpush1.bf16.msra.mxu1 %v8238_v48  ;;  %v8330_v48 = vld [vmem:[#allocation12 + $0x26c] ss:$28 sps:$4 sm:$0xff]  }
 0x640   :  { %4617 = vmatpush1.bf16.msra.mxu0 %v8241_v52  ;;  %4659 = vmatprep.subr.bf16.mxu1 %v8246_v53  ;;  %v8342_v52 = vld [vmem:[#allocation12 + $0x50c] ss:$28 sps:$4 sm:$0xff]  }
 0x641   :  { %4618 = vmatprep.subr.bf16.mxu0 %v8249_v54  ;;  %v8340_v53 = vld [vmem:[#allocation12 + $0x508] ss:$28 sps:$4 sm:$0xff]  }
 0x642   :  { %v8328_v54 = vld [vmem:[#allocation12 + $0x268] ss:$28 sps:$4 sm:$0xff]  }
 0x643   :  { %4660 = vmatpush1.bf16.msra.mxu1 %v8244_v55  ;;  %v8346_v55 = vld [vmem:[#allocation12 + $0x4d0] ss:$28 sps:$4 sm:$0xff]  }
 0x644   :  { %4619 = vmatpush1.bf16.msra.mxu0 %v8247_v16  ;;  %4661 = vmatprep.subr.bf16.mxu1 %v8252_v56  ;;  %v8333_v16 = vld [vmem:[#allocation12 + $0x234] ss:$28 sps:$4 sm:$0xff]  }
 0x645   :  { %4620 = vmatprep.subr.bf16.mxu0 %v8255_v57  ;;  %v8331_v56 = vld [vmem:[#allocation12 + $0x230] ss:$28 sps:$4 sm:$0xff]   ;;  %v8352_v57 = vld [vmem:[#allocation12 + $0x498] ss:$28 sps:$4 sm:$0xff]  }
 0x647   :  { %4662 = vmatpush1.bf16.msra.mxu1 %v8250_v58  ;;  %v8354_v58 = vld [vmem:[#allocation12 + $0x49c] ss:$28 sps:$4 sm:$0xff]  }
 0x648   :  { %4621 = vmatpush1.bf16.msra.mxu0 %v8253_v59  ;;  %4663 = vmatprep.subr.bf16.mxu1 %v8258_v60  ;;  %v8336_v59 = vld [vmem:[#allocation12 + $0x1fc] ss:$28 sps:$4 sm:$0xff]  }
 0x649   :  { %4622 = vmatprep.subr.bf16.mxu0 %v8261_v61  ;;  %v8334_v60 = vld [vmem:[#allocation12 + $0x1f8] ss:$28 sps:$4 sm:$0xff]   ;;  %v8358_v61 = vld [vmem:[#allocation12 + $0x460] ss:$28 sps:$4 sm:$0xff]  }
 0x64b   :  { %4664 = vmatpush1.bf16.msra.mxu1 %v8256_v62  ;;  %v8360_v62 = vld [vmem:[#allocation12 + $0x464] ss:$28 sps:$4 sm:$0xff]  }
 0x64c   :  { %4623 = vmatpush1.bf16.msra.mxu0 %v8259_v15  ;;  %4665 = vmatprep.subr.bf16.mxu1 %v8264_v47  ;;  %v8339_v15 = vld [vmem:[#allocation12 + $0x1c4] ss:$28 sps:$4 sm:$0xff]  }
 0x64d   :  { %4624 = vmatprep.subr.bf16.mxu0 %v8267_v6  ;;  %v8337_v47 = vld [vmem:[#allocation12 + $0x1c0] ss:$28 sps:$4 sm:$0xff]   ;;  %v8364_v6 = vld [vmem:[#allocation12 + $0x428] ss:$28 sps:$4 sm:$0xff]  }
 0x64f   :  { %4666 = vmatpush1.bf16.msra.mxu1 %v8262_v63  ;;  %v8366_v63 = vld [vmem:[#allocation12 + $0x42c] ss:$28 sps:$4 sm:$0xff]  }
 0x650   :  { %4625 = vmatpush1.bf16.msra.mxu0 %v8265_v0  ;;  %6145 = vmatprep.subr.bf16.mxu1 %v8294_v35  ;;  %v8345_v0 = vld [vmem:[#allocation12 + $0x194] ss:$28 sps:$4 sm:$0xff]  }
 0x651   :  { %4626 = vmatprep.subr.bf16.mxu0 %v8270_v5  ;;  %v8372_v35 = vld [vmem:[#allocation12 + $0x3f4] ss:$28 sps:$4 sm:$0xff]  }
 0x652   :  { %4684 = vmatmul.mubr.bf16.vlgmr.msra.gmra.mxu1 %v9101_v36  ;;  %v8291_v36 = vld [vmem:[#allocation10 + $0x10c] ss:$16 sps:$4 sm:$0xff]  }
 0x653   :  { %6146 = vmatpush1.bf16.msra.mxu1 %v8292_v8  ;;  %v8370_v5 = vld [vmem:[#allocation12 + $0x3f0] ss:$28 sps:$4 sm:$0xff]   ;;  %v8378_v8 = vld [vmem:[#allocation12 + $0x3bc] ss:$28 sps:$4 sm:$0xff]  }
 0x654   :  { %4627 = vmatpush2.bf16.msra.mxu0 %v8268_v9  ;;  %6147 = vmatprep.subr.bf16.mxu1 %v8297_v10  ;;  %v8376_v9 = vld [vmem:[#allocation12 + $0x3b8] ss:$28 sps:$4 sm:$0xff]   ;;  %v8382_v10 = vld [vmem:[#allocation12 + $0x380] ss:$28 sps:$4 sm:$0xff]  }
 0x655   :  { %4628 = vmatprep.subr.bf16.mxu0 %v8273_v2  ;;  %v8384_v2 = vld [vmem:[#allocation12 + $0x384] ss:$28 sps:$4 sm:$0xff]  }
 0x657   :  { %6148 = vmatpush1.bf16.msra.mxu1 %v8295_v11  ;;  %v8388_v11 = vld [vmem:[#allocation12 + $0x6c8] ss:$28 sps:$4 sm:$0xff]  }
 0x658   :  { %4629 = vmatpush2.bf16.msra.mxu0 %v8271_v12  ;;  %6149 = vmatprep.subr.bf16.mxu1 %v8300_v13  ;;  %v8390_v12 = vld [vmem:[#allocation12 + $0x6cc] ss:$28 sps:$4 sm:$0xff]  }
 0x659   :  { %4630 = vmatprep.subr.bf16.mxu0 %v8276_v14  ;;  %v8394_v13 = vld [vmem:[#allocation12 + $0x690] ss:$28 sps:$4 sm:$0xff]  }
 0x65a   :  { %v8396_v14 = vld [vmem:[#allocation12 + $0x694] ss:$28 sps:$4 sm:$0xff]  }
 0x65b   :  { %6150 = vmatpush1.bf16.msra.mxu1 %v8298_v17  ;;  %v8400_v17 = vld [vmem:[#allocation12 + $0x658] ss:$28 sps:$4 sm:$0xff]  }
 0x65c   :  { %4631 = vmatpush2.bf16.msra.mxu0 %v8274_v18  ;;  %6151 = vmatprep.subr.bf16.mxu1 %v8303_v19  ;;  %v8402_v18 = vld [vmem:[#allocation12 + $0x65c] ss:$28 sps:$4 sm:$0xff]  }
 0x65d   :  { %4632 = vmatprep.subr.bf16.mxu0 %v8279_v22  ;;  %v8406_v19 = vld [vmem:[#allocation12 + $0x620] ss:$28 sps:$4 sm:$0xff]  }
 0x65e   :  { %v8408_v22 = vld [vmem:[#allocation12 + $0x624] ss:$28 sps:$4 sm:$0xff]  }
 0x65f   :  { %6152 = vmatpush1.bf16.msra.mxu1 %v8301_v25  ;;  %v8412_v25 = vld [vmem:[#allocation12 + $0x5e8] ss:$28 sps:$4 sm:$0xff]  }
 0x660   :  { %4633 = vmatpush2.bf16.msra.mxu0 %v8277_v26  ;;  %6153 = vmatprep.subr.bf16.mxu1 %v8306_v27  ;;  %v8414_v26 = vld [vmem:[#allocation12 + $0x5ec] ss:$28 sps:$4 sm:$0xff]  }
 0x661   :  { %4634 = vmatprep.subr.bf16.mxu0 %v8282_v28  ;;  %v8418_v27 = vld [vmem:[#allocation12 + $0x5b0] ss:$28 sps:$4 sm:$0xff]  }
 0x662   :  { %v8420_v28 = vld [vmem:[#allocation12 + $0x5b4] ss:$28 sps:$4 sm:$0xff]  }
 0x663   :  { %6154 = vmatpush1.bf16.msra.mxu1 %v8304_v29  ;;  %v8426_v29 = vld [vmem:[#allocation12 + $0x57c] ss:$28 sps:$4 sm:$0xff]  }
 0x664   :  { %4635 = vmatpush2.bf16.msra.mxu0 %v8280_v30  ;;  %6155 = vmatprep.subr.bf16.mxu1 %v8309_v20  ;;  %v8424_v30 = vld [vmem:[#allocation12 + $0x578] ss:$28 sps:$4 sm:$0xff]   ;;  %v8432_v20 = vld [vmem:[#allocation12 + $0x544] ss:$28 sps:$4 sm:$0xff]  }
 0x665   :  { %4636 = vmatprep.subr.bf16.mxu0 %v8285_v23  ;;  %v8430_v23 = vld [vmem:[#allocation12 + $0x540] ss:$28 sps:$4 sm:$0xff]  }
 0x667   :  { %6156 = vmatpush1.bf16.msra.mxu1 %v8307_v21  ;;  %v8438_v21 = vld [vmem:[#allocation12 + $0x514] ss:$28 sps:$4 sm:$0xff]  }
 0x668   :  { %4637 = vmatpush2.bf16.msra.mxu0 %v8283_v24  ;;  %6157 = vmatprep.subr.bf16.mxu1 %v8312_v31  ;;  %v9111_v24 = vld [vmem:[%s9191_s15] sm:$0xf] }
 0x669   :  { %4638 = vmatprep.subr.bf16.mxu0 %v8288_v32  ;;  %v4031_v31 = vrot.slane %v9111_v24, %v8989_v3  ;;  %v4035_v32 = vrot.slane %v9111_v24, %v8992_v4 }
 0x66b   :  { %6158 = vmatpush1.bf16.msra.mxu1 %v8310_v33 }
 0x66c   :  { %4639 = vmatpush2.bf16.msra.mxu0 %v8286_v7  ;;  %6159 = vmatprep.subr.bf16.mxu1 %v8315_v34 }
 0x66d   :  { %4640 = vmatprep.subr.bf16.mxu0 %v8291_v36 }
 0x66f   :  { %6160 = vmatpush1.bf16.msra.mxu1 %v8313_v37 }
 0x670   :  { %4641 = vmatpush2.bf16.msra.mxu0 %v8289_v38  ;;  %6161 = vmatprep.subr.bf16.mxu1 %v8318_v39 }
 0x671   :  { %6186 = vmatprep.subr.bf16.mxu0 %v8342_v52  ;;  %v8343_v52 = vld [vmem:[#allocation12 + $0x190] ss:$28 sps:$4 sm:$0xff]  }
 0x673   :  { %4643 = vmatmul.mubr.bf16.vlgmr.msra.gmra.mxu0 %v9099_v51  ;;  %6162 = vmatpush2.bf16.msra.mxu1 %v8316_v40  ;;  %v8348_v51 = vld [vmem:[#allocation12 + $0x4d4] ss:$28 sps:$4 sm:$0xff]  }
 0x674   :  { %6163 = vmatprep.subr.bf16.mxu1 %v8321_v41  ;;  %6187 = vmatpush1.bf16.msra.mxu0 %v8340_v53 }
 0x675   :  { %6188 = vmatprep.subr.bf16.mxu0 %v8348_v51  ;;  %v8357_v51 = vld [vmem:[#allocation12 + $0x124] ss:$28 sps:$4 sm:$0xff]  }
 0x677   :  { %6164 = vmatpush2.bf16.msra.mxu1 %v8319_v42 }
 0x678   :  { %6165 = vmatprep.subr.bf16.mxu1 %v8324_v43  ;;  %6189 = vmatpush1.bf16.msra.mxu0 %v8346_v55  ;;  %v8349_v55 = vld [vmem:[#allocation12 + $0x158] ss:$28 sps:$4 sm:$0xff]  }
 0x679   :  { %6190 = vmatprep.subr.bf16.mxu0 %v8354_v58  ;;  %v8369_v58 = vld [vmem:[#allocation12 + $0xb4] ss:$28 sps:$4 sm:$0xff]  }
 0x67b   :  { %6166 = vmatpush2.bf16.msra.mxu1 %v8322_v44 }
 0x67c   :  { %6167 = vmatprep.subr.bf16.mxu1 %v8327_v45  ;;  %6191 = vmatpush1.bf16.msra.mxu0 %v8352_v57  ;;  %v8361_v57 = vld [vmem:[#allocation12 + $0xe8] ss:$28 sps:$4 sm:$0xff]  }
 0x67d   :  { %6192 = vmatprep.subr.bf16.mxu0 %v8360_v62  ;;  %v8381_v62 = vld [vmem:[#allocation12 + $0x44] ss:$28 sps:$4 sm:$0xff]  }
 0x67f   :  { %6168 = vmatpush2.bf16.msra.mxu1 %v8325_v46 }
 0x680   :  { %6169 = vmatprep.subr.bf16.mxu1 %v8330_v48  ;;  %6193 = vmatpush1.bf16.msra.mxu0 %v8358_v61  ;;  %v8373_v61 = vld [vmem:[#allocation12 + $0x78] ss:$28 sps:$4 sm:$0xff]  }
 0x681   :  { %6194 = vmatprep.subr.bf16.mxu0 %v8366_v63  ;;  %v8387_v63 = vld [vmem:[#allocation12 + $0xc] ss:$28 sps:$4 sm:$0xff]  }
 0x683   :  { %6170 = vmatpush2.bf16.msra.mxu1 %v8328_v54  ;;  %v8351_v54 = vld [vmem:[#allocation12 + $0x15c] ss:$28 sps:$4 sm:$0xff]  }
 0x684   :  { %6171 = vmatprep.subr.bf16.mxu1 %v8333_v16  ;;  %6195 = vmatpush1.bf16.msra.mxu0 %v8364_v6  ;;  %v8355_v16 = vld [vmem:[#allocation12 + $0x120] ss:$28 sps:$4 sm:$0xff]  }
 0x685   :  { %6196 = vmatprep.subr.bf16.mxu0 %v8372_v35  ;;  %v8385_v35 = vld [vmem:[#allocation12 + $0x8] ss:$28 sps:$4 sm:$0xff]  }
 0x687   :  { %6172 = vmatpush2.bf16.msra.mxu1 %v8331_v56  ;;  %v8363_v56 = vld [vmem:[#allocation12 + $0xec] ss:$28 sps:$4 sm:$0xff]  }
 0x688   :  { %6173 = vmatprep.subr.bf16.mxu1 %v8336_v59  ;;  %6197 = vmatpush1.bf16.msra.mxu0 %v8370_v5  ;;  %v8367_v59 = vld [vmem:[#allocation12 + $0xb0] ss:$28 sps:$4 sm:$0xff]  }
 0x689   :  { %6198 = vmatprep.subr.bf16.mxu0 %v8378_v8  ;;  %v8393_v8 = vld [vmem:[#allocation12 + $0x354] ss:$28 sps:$4 sm:$0xff]  }
 0x68b   :  { %6174 = vmatpush2.bf16.msra.mxu1 %v8334_v60  ;;  %v8375_v60 = vld [vmem:[#allocation12 + $0x7c] ss:$28 sps:$4 sm:$0xff]  }
 0x68c   :  { %6175 = vmatprep.subr.bf16.mxu1 %v8339_v15  ;;  %6199 = vmatpush1.bf16.msra.mxu0 %v8376_v9  ;;  %v8391_v9 = vld [vmem:[#allocation12 + $0x350] ss:$28 sps:$4 sm:$0xff]  }
 0x68d   :  { %6200 = vmatprep.subr.bf16.mxu0 %v8384_v2  ;;  %v8397_v2 = vld [vmem:[#allocation12 + $0x318] ss:$28 sps:$4 sm:$0xff]  }
 0x68f   :  { %6176 = vmatpush2.bf16.msra.mxu1 %v8337_v47  ;;  %v8379_v47 = vld [vmem:[#allocation12 + $0x40] ss:$28 sps:$4 sm:$0xff]  }
 0x690   :  { %6227 = vmatprep.subr.bf16.mxu1 %v8345_v0  ;;  %6201 = vmatpush1.bf16.msra.mxu0 %v8382_v10  ;;  %v8399_v10 = vld [vmem:[#allocation12 + $0x31c] ss:$28 sps:$4 sm:$0xff]  }
 0x691   :  { %6202 = vmatprep.subr.bf16.mxu0 %v8390_v12  ;;  %v8403_v12 = vld [vmem:[#allocation12 + $0x2e0] ss:$28 sps:$4 sm:$0xff]  }
 0x694   :  { %6203 = vmatpush2.bf16.msra.mxu0 %v8388_v11  ;;  %v8405_v11 = vld [vmem:[#allocation12 + $0x2e4] ss:$28 sps:$4 sm:$0xff]  }
 0x695   :  { %6204 = vmatprep.subr.bf16.mxu0 %v8396_v14  ;;  %v8409_v14 = vld [vmem:[#allocation12 + $0x2a8] ss:$28 sps:$4 sm:$0xff]  }
 0x698   :  { %6205 = vmatpush2.bf16.msra.mxu0 %v8394_v13  ;;  %v8411_v13 = vld [vmem:[#allocation12 + $0x2ac] ss:$28 sps:$4 sm:$0xff]  }
 0x699   :  { %6206 = vmatprep.subr.bf16.mxu0 %v8402_v18  ;;  %v8415_v18 = vld [vmem:[#allocation12 + $0x270] ss:$28 sps:$4 sm:$0xff]  }
 0x69c   :  { %6207 = vmatpush2.bf16.msra.mxu0 %v8400_v17  ;;  %v8417_v17 = vld [vmem:[#allocation12 + $0x274] ss:$28 sps:$4 sm:$0xff]  }
 0x69d   :  { %6208 = vmatprep.subr.bf16.mxu0 %v8408_v22  ;;  %v8421_v22 = vld [vmem:[#allocation12 + $0x238] ss:$28 sps:$4 sm:$0xff]  }
 0x6a0   :  { %6209 = vmatpush2.bf16.msra.mxu0 %v8406_v19  ;;  %v8423_v19 = vld [vmem:[#allocation12 + $0x23c] ss:$28 sps:$4 sm:$0xff]  }
 0x6a1   :  { %6210 = vmatprep.subr.bf16.mxu0 %v8414_v26  ;;  %v8429_v26 = vld [vmem:[#allocation12 + $0x204] ss:$28 sps:$4 sm:$0xff]  }
 0x6a4   :  { %6211 = vmatpush2.bf16.msra.mxu0 %v8412_v25  ;;  %v4039_v25 = vrot.slane %v9111_v24, %v9003_v49 }
 0x6a5   :  { %6212 = vmatprep.subr.bf16.mxu0 %v8420_v28 }
 0x6a8   :  { %6213 = vmatpush2.bf16.msra.mxu0 %v8418_v27  ;;  %v4043_v27 = vrot.slane %v9111_v24, %v9006_v50  ;;  %v8439_v24 = vld [vmem:[#allocation12 + $0x198] ss:$28 sps:$4 sm:$0xff]  }
 0x6a9   :  { %6214 = vmatprep.subr.bf16.mxu0 %v8426_v29  ;;  %v8427_v29 = vld [vmem:[#allocation12 + $0x200] ss:$28 sps:$4 sm:$0xff]  }
 0x6ac   :  { %6215 = vmatpush2.bf16.msra.mxu0 %v8424_v30 }
 0x6ad   :  { %6216 = vmatprep.subr.bf16.mxu0 %v8432_v20  ;;  %v8435_v20 = vld [vmem:[#allocation12 + $0x1cc] ss:$28 sps:$4 sm:$0xff]  }
 0x6b0   :  { %6217 = vmatpush2.bf16.msra.mxu0 %v8430_v23 }
 0x6b1   :  { %6268 = vmatprep.subr.bf16.mxu0 %v8438_v21 }
 0x6f2   :  { %v4562_v33 = vpop.f32.mrf.mxu1 }
 0x6f3   :  { %v4563_v7 = vadd.f32 %v4562_v33, %v4031_v31  ;;  %v4603_v34 = vpop.f32.mrf.mxu0  ;;  %v8433_v33 = vld [vmem:[#allocation12 + $0x1c8] ss:$28 sps:$4 sm:$0xff]  }
 0x6f4   :  { %v4564_v36 = vpop.f32.mrf.mxu1 }
 0x6f5   :  { %v4604_v37 = vadd.f32 %v4603_v34, %v4563_v7  ;;  %v4565_v38 = vadd.f32 %v4564_v36, %v4035_v32  ;;  %v4605_v39 = vpop.f32.mrf.mxu0  ;;  %v8441_v34 = vld [vmem:[#allocation12 + $0x19c] ss:$28 sps:$4 sm:$0xff]  }
 0x6f6   :  { %v4566_v40 = vpop.f32.mrf.mxu1 }
 0x6f7   :  { %v4606_v41 = vadd.f32 %v4605_v39, %v4565_v38  ;;  %v4607_v42 = vpop.f32.mrf.mxu0  ;;  %v4692_v43 = vmax.f32 %v4604_v37, 0.0  ;;  %v8436_v40 = vld [vmem:[#allocation12 + $0x510] ss:$28 sps:$4 sm:$0xff]  }
 0x6f8   :  { %v4567_v44 = vpop.f32.mrf.mxu1  ;;  %v8444_v42 = vld [vmem:[#allocation12 + $0x4dc] ss:$28 sps:$4 sm:$0xff]  }
 0x6f9   :  { %v4693_v45 = vmax.f32 %v4606_v41, 0.0  ;;  %v4608_v46 = vpop.f32.mrf.mxu0  ;;  %v9119_v53 = vpack.c.bf16 %v4692_v43, %v4692_v43  ;;  %v8447_v43 = vld [vmem:[#allocation12 + $0x164] ss:$28 sps:$4 sm:$0xff]  }
 0x6fa   :  { %v8445_v44 = vld [vmem:[#allocation12 + $0x160] ss:$28 sps:$4 sm:$0xff]   ;;  %v8453_v46 = vld [vmem:[#allocation12 + $0x12c] ss:$28 sps:$4 sm:$0xff]  }
 0x6fb   :  { %v9117_v48 = vpack.c.bf16 %v4693_v45, %v4693_v45  ;;  %v8442_v45 = vld [vmem:[#allocation12 + $0x4d8] ss:$28 sps:$4 sm:$0xff]  }
 0x6fd   :  { %6177 = vmatprep.mubr.bf16.mxu1 %v9117_v48 }
 0x6fe   :  { %6178 = vmatmul.mubr.bf16.vlgmr.msra.gmra.mxu1 %v9119_v53 }
 0x6ff   :  { %6228 = vmatpush1.bf16.msra.mxu1 %v8343_v52  ;;  %6259 = vmatprep.mubr.bf16.mxu1 %v9117_v48  ;;  %v8450_v52 = vld [vmem:[#allocation12 + $0x4a4] ss:$28 sps:$4 sm:$0xff]  }
 0x700   :  { %6229 = vmatprep.subr.bf16.mxu1 %v8351_v54  ;;  %v8451_v54 = vld [vmem:[#allocation12 + $0x128] ss:$28 sps:$4 sm:$0xff]  }
 0x703   :  { %6230 = vmatpush1.bf16.msra.mxu1 %v8349_v55  ;;  %v8448_v55 = vld [vmem:[#allocation12 + $0x4a0] ss:$28 sps:$4 sm:$0xff]  }
 0x704   :  { %6231 = vmatprep.subr.bf16.mxu1 %v8357_v51  ;;  %v8459_v51 = vld [vmem:[#allocation12 + $0xf4] ss:$28 sps:$4 sm:$0xff]  }
 0x707   :  { %6232 = vmatpush1.bf16.msra.mxu1 %v8355_v16  ;;  %v8456_v16 = vld [vmem:[#allocation12 + $0x46c] ss:$28 sps:$4 sm:$0xff]  }
 0x708   :  { %6233 = vmatprep.subr.bf16.mxu1 %v8363_v56  ;;  %v8457_v56 = vld [vmem:[#allocation12 + $0xf0] ss:$28 sps:$4 sm:$0xff]  }
 0x70b   :  { %6234 = vmatpush1.bf16.msra.mxu1 %v8361_v57  ;;  %v8454_v57 = vld [vmem:[#allocation12 + $0x468] ss:$28 sps:$4 sm:$0xff]  }
 0x70c   :  { %6235 = vmatprep.subr.bf16.mxu1 %v8369_v58  ;;  %v8465_v58 = vld [vmem:[#allocation12 + $0xbc] ss:$28 sps:$4 sm:$0xff]  }
 0x70f   :  { %6236 = vmatpush1.bf16.msra.mxu1 %v8367_v59  ;;  %v8462_v59 = vld [vmem:[#allocation12 + $0x434] ss:$28 sps:$4 sm:$0xff]  }
 0x710   :  { %6237 = vmatprep.subr.bf16.mxu1 %v8375_v60  ;;  %v8463_v60 = vld [vmem:[#allocation12 + $0xb8] ss:$28 sps:$4 sm:$0xff]  }
 0x712   :  { %v4685_v15 = vpop.f32.mrf.mxu1 }
 0x713   :  { %6238 = vmatpush1.bf16.msra.mxu1 %v8373_v61  ;;  %v8460_v61 = vld [vmem:[#allocation12 + $0x430] ss:$28 sps:$4 sm:$0xff]  }
 0x714   :  { %v4687_v6 = vpop.f32.mrf.mxu1  ;;  %6239 = vmatprep.subr.bf16.mxu1 %v8381_v62  ;;  %v8471_v62 = vld [vmem:[#allocation12 + $0x84] ss:$28 sps:$4 sm:$0xff]  }
 0x716   :  { %v4689_v0 = vpop.f32.mrf.mxu1 }
 0x717   :  { %6240 = vmatpush1.bf16.msra.mxu1 %v8379_v47  ;;  %v8469_v47 = vld [vmem:[#allocation12 + $0x80] ss:$28 sps:$4 sm:$0xff]  }
 0x718   :  { %v4690_v5 = vpop.f32.mrf.mxu1  ;;  %6241 = vmatprep.subr.bf16.mxu1 %v8387_v63  ;;  %v8477_v63 = vld [vmem:[#allocation12 + $0x4c] ss:$28 sps:$4 sm:$0xff]   ;;  %v8474_v0 = vld [vmem:[#allocation12 + $0x3c4] ss:$28 sps:$4 sm:$0xff]  }
 0x719   :  { %v8472_v5 = vld [vmem:[#allocation12 + $0x3c0] ss:$28 sps:$4 sm:$0xff]  }
 0x71b   :  { %6242 = vmatpush1.bf16.msra.mxu1 %v8385_v35  ;;  %v8475_v35 = vld [vmem:[#allocation12 + $0x48] ss:$28 sps:$4 sm:$0xff]  }
 0x71c   :  { %6243 = vmatprep.subr.bf16.mxu1 %v8393_v8  ;;  %v8483_v8 = vld [vmem:[#allocation12 + $0x14] ss:$28 sps:$4 sm:$0xff]  }
 0x71f   :  { %6244 = vmatpush2.bf16.msra.mxu1 %v8391_v9  ;;  %v8480_v9 = vld [vmem:[#allocation12 + $0x38c] ss:$28 sps:$4 sm:$0xff]  }
 0x720   :  { %6245 = vmatprep.subr.bf16.mxu1 %v8399_v10  ;;  %v8481_v10 = vld [vmem:[#allocation12 + $0x10] ss:$28 sps:$4 sm:$0xff]  }
 0x723   :  { %6246 = vmatpush2.bf16.msra.mxu1 %v8397_v2  ;;  %v8478_v2 = vld [vmem:[#allocation12 + $0x388] ss:$28 sps:$4 sm:$0xff]  }
 0x724   :  { %6247 = vmatprep.subr.bf16.mxu1 %v8405_v11  ;;  %v8489_v11 = vld [vmem:[#allocation12 + $0x35c] ss:$28 sps:$4 sm:$0xff]  }
 0x727   :  { %6248 = vmatpush2.bf16.msra.mxu1 %v8403_v12  ;;  %v8486_v12 = vld [vmem:[#allocation12 + $0x6d4] ss:$28 sps:$4 sm:$0xff]  }
 0x728   :  { %6249 = vmatprep.subr.bf16.mxu1 %v8411_v13  ;;  %v8487_v13 = vld [vmem:[#allocation12 + $0x358] ss:$28 sps:$4 sm:$0xff]  }
 0x72b   :  { %6250 = vmatpush2.bf16.msra.mxu1 %v8409_v14  ;;  %v8484_v14 = vld [vmem:[#allocation12 + $0x6d0] ss:$28 sps:$4 sm:$0xff]  }
 0x72c   :  { %6251 = vmatprep.subr.bf16.mxu1 %v8417_v17  ;;  %v8495_v17 = vld [vmem:[#allocation12 + $0x324] ss:$28 sps:$4 sm:$0xff]  }
 0x72f   :  { %6252 = vmatpush2.bf16.msra.mxu1 %v8415_v18  ;;  %v8492_v18 = vld [vmem:[#allocation12 + $0x69c] ss:$28 sps:$4 sm:$0xff]  }
 0x730   :  { %6253 = vmatprep.subr.bf16.mxu1 %v8423_v19  ;;  %v8493_v19 = vld [vmem:[#allocation12 + $0x320] ss:$28 sps:$4 sm:$0xff]  }
 0x733   :  { %v4644_v28 = vpop.f32.mrf.mxu0  ;;  %6254 = vmatpush2.bf16.msra.mxu1 %v8421_v22  ;;  %v8490_v22 = vld [vmem:[#allocation12 + $0x698] ss:$28 sps:$4 sm:$0xff]  }
 0x734   :  { %v4645_v30 = vadd.f32 %v4644_v28, %v4039_v25  ;;  %6255 = vmatprep.subr.bf16.mxu1 %v8429_v26  ;;  %v8501_v25 = vld [vmem:[#allocation12 + $0x2ec] ss:$28 sps:$4 sm:$0xff]   ;;  %v8498_v26 = vld [vmem:[#allocation12 + $0x664] ss:$28 sps:$4 sm:$0xff]  }
 0x735   :  { %v4646_v23 = vpop.f32.mrf.mxu0  ;;  %v8496_v28 = vld [vmem:[#allocation12 + $0x660] ss:$28 sps:$4 sm:$0xff]  }
 0x736   :  { %v4686_v21 = vadd.f32 %v4685_v15, %v4645_v30  ;;  %v4647_v31 = vadd.f32 %v4646_v23, %v4043_v27  ;;  %v8468_v15 = vld [vmem:[#allocation12 + $0x3fc] ss:$28 sps:$4 sm:$0xff]   ;;  %v8499_v27 = vld [vmem:[#allocation12 + $0x2e8] ss:$28 sps:$4 sm:$0xff]  }
 0x737   :  { %v4648_v32 = vpop.f32.mrf.mxu0  ;;  %6256 = vmatpush2.bf16.msra.mxu1 %v8427_v29  ;;  %v8507_v29 = vld [vmem:[#allocation12 + $0x2b4] ss:$28 sps:$4 sm:$0xff]   ;;  %v8504_v30 = vld [vmem:[#allocation12 + $0x62c] ss:$28 sps:$4 sm:$0xff]  }
 0x738   :  { %v4688_v7 = vadd.f32 %v4687_v6, %v4647_v31  ;;  %6257 = vmatprep.subr.bf16.mxu1 %v8435_v20  ;;  %v4694_v36 = vmax.f32 %v4686_v21, 0.0  ;;  %v8466_v6 = vld [vmem:[#allocation12 + $0x3f8] ss:$28 sps:$4 sm:$0xff]   ;;  %v8505_v20 = vld [vmem:[#allocation12 + $0x2b0] ss:$28 sps:$4 sm:$0xff]  }
 0x739   :  { %v4649_v37 = vpop.f32.mrf.mxu0  ;;  %v8502_v23 = vld [vmem:[#allocation12 + $0x628] ss:$28 sps:$4 sm:$0xff]   ;;  %v8513_v21 = vld [vmem:[#allocation12 + $0x27c] ss:$28 sps:$4 sm:$0xff]   ;;  %v8510_v31 = vld [vmem:[#allocation12 + $0x5f4] ss:$28 sps:$4 sm:$0xff]  }
 0x73a   :  { %v4695_v38 = vmax.f32 %v4688_v7, 0.0  ;;  %v9130_v41 = vpack.c.bf16 %v4694_v36, %v4694_v36  ;;  %v8511_v32 = vld [vmem:[#allocation12 + $0x278] ss:$28 sps:$4 sm:$0xff]   ;;  %v8519_v7 = vld [vmem:[#allocation12 + $0x244] ss:$28 sps:$4 sm:$0xff]  }
 0x73b   :  { %6258 = vmatpush2.bf16.msra.mxu1 %v8433_v33  ;;  %v8508_v33 = vld [vmem:[#allocation12 + $0x5f0] ss:$28 sps:$4 sm:$0xff]   ;;  %v8517_v36 = vld [vmem:[#allocation12 + $0x240] ss:$28 sps:$4 sm:$0xff]   ;;  %v8514_v37 = vld [vmem:[#allocation12 + $0x5b8] ss:$28 sps:$4 sm:$0xff]  }
 0x73c   :  { %v9128_v39 = vpack.c.bf16 %v4695_v38, %v4695_v38  ;;  %6309 = vmatprep.subr.bf16.mxu1 %v8441_v34  ;;  %v8516_v34 = vld [vmem:[#allocation12 + $0x5bc] ss:$28 sps:$4 sm:$0xff]   ;;  %v8525_v38 = vld [vmem:[#allocation12 + $0x20c] ss:$28 sps:$4 sm:$0xff]  }
 0x73e   :  { %6218 = vmatprep.mubr.bf16.mxu0 %v9128_v39  ;;  %6260 = vmatmul.mubr.bf16.vlgmr.msra.gmra.mxu1 %v9119_v53 }
 0x73f   :  { %6219 = vmatmul.mubr.bf16.vlgmr.msra.gmra.mxu0 %v9130_v41  ;;  %6310 = vmatpush1.bf16.msra.mxu1 %v8439_v24  ;;  %v8522_v24 = vld [vmem:[#allocation12 + $0x584] ss:$28 sps:$4 sm:$0xff]  }
 0x740   :  { %6269 = vmatpush1.bf16.msra.mxu0 %v8436_v40  ;;  %6341 = vmatprep.mubr.bf16.mxu1 %v9117_v48  ;;  %v8523_v40 = vld [vmem:[#allocation12 + $0x208] ss:$28 sps:$4 sm:$0xff]  }
 0x741   :  { %6300 = vmatprep.mubr.bf16.mxu0 %v9128_v39  ;;  %6270 = vmatprep.subr.bf16.mxu0 %v8444_v42  ;;  %v8520_v42 = vld [vmem:[#allocation12 + $0x580] ss:$28 sps:$4 sm:$0xff]  }
 0x742   :  { %6311 = vmatprep.subr.bf16.mxu1 %v8447_v43  ;;  %v8531_v43 = vld [vmem:[#allocation12 + $0x1d4] ss:$28 sps:$4 sm:$0xff]  }
 0x743   :  { %6312 = vmatpush1.bf16.msra.mxu1 %v8445_v44  ;;  %v8528_v44 = vld [vmem:[#allocation12 + $0x54c] ss:$28 sps:$4 sm:$0xff]  }
 0x744   :  { %6271 = vmatpush1.bf16.msra.mxu0 %v8442_v45  ;;  %6313 = vmatprep.subr.bf16.mxu1 %v8453_v46  ;;  %v8529_v45 = vld [vmem:[#allocation12 + $0x1d0] ss:$28 sps:$4 sm:$0xff]   ;;  %v8526_v46 = vld [vmem:[#allocation12 + $0x548] ss:$28 sps:$4 sm:$0xff]  }
 0x745   :  { %6272 = vmatprep.subr.bf16.mxu0 %v8450_v52  ;;  %v8535_v52 = vld [vmem:[#allocation12 + $0x360] ss:$28 sps:$4 sm:$0xff]  }
 0x747   :  { %6314 = vmatpush1.bf16.msra.mxu1 %v8451_v54  ;;  %v8534_v54 = vld [vmem:[#allocation12 + $0x51c] ss:$28 sps:$4 sm:$0xff]  }
 0x748   :  { %6273 = vmatpush1.bf16.msra.mxu0 %v8448_v55  ;;  %6315 = vmatprep.subr.bf16.mxu1 %v8459_v51  ;;  %v8536_v55 = vld [vmem:[#allocation12 + $0x1a0] ss:$28 sps:$4 sm:$0xff]   ;;  %v8532_v51 = vld [vmem:[#allocation12 + $0x518] ss:$28 sps:$4 sm:$0xff]  }
 0x749   :  { %6274 = vmatprep.subr.bf16.mxu0 %v8456_v16  ;;  %v8539_v16 = vld [vmem:[#allocation12 + $0x4e4] ss:$28 sps:$4 sm:$0xff]  }
 0x74b   :  { %6316 = vmatpush1.bf16.msra.mxu1 %v8457_v56  ;;  %v8540_v56 = vld [vmem:[#allocation12 + $0x328] ss:$28 sps:$4 sm:$0xff]  }
 0x74c   :  { %6275 = vmatpush1.bf16.msra.mxu0 %v8454_v57  ;;  %6317 = vmatprep.subr.bf16.mxu1 %v8465_v58  ;;  %v8541_v57 = vld [vmem:[#allocation12 + $0x168] ss:$28 sps:$4 sm:$0xff]   ;;  %v8537_v58 = vld [vmem:[#allocation12 + $0x4e0] ss:$28 sps:$4 sm:$0xff]  }
 0x74d   :  { %6276 = vmatprep.subr.bf16.mxu0 %v8462_v59  ;;  %v8545_v59 = vld [vmem:[#allocation12 + $0x2f0] ss:$28 sps:$4 sm:$0xff]  }
 0x74f   :  { %6318 = vmatpush1.bf16.msra.mxu1 %v8463_v60  ;;  %v8544_v60 = vld [vmem:[#allocation12 + $0x4ac] ss:$28 sps:$4 sm:$0xff]  }
 0x750   :  { %6277 = vmatpush1.bf16.msra.mxu0 %v8460_v61  ;;  %6319 = vmatprep.subr.bf16.mxu1 %v8471_v62  ;;  %v8546_v61 = vld [vmem:[#allocation12 + $0x130] ss:$28 sps:$4 sm:$0xff]   ;;  %v8542_v62 = vld [vmem:[#allocation12 + $0x4a8] ss:$28 sps:$4 sm:$0xff]  }
 0x751   :  { %6278 = vmatprep.subr.bf16.mxu0 %v8468_v15  ;;  %v8550_v15 = vld [vmem:[#allocation12 + $0x2b8] ss:$28 sps:$4 sm:$0xff]  }
 0x753   :  { %6320 = vmatpush1.bf16.msra.mxu1 %v8469_v47  ;;  %v8549_v47 = vld [vmem:[#allocation12 + $0x474] ss:$28 sps:$4 sm:$0xff]  }
 0x754   :  { %6279 = vmatpush1.bf16.msra.mxu0 %v8466_v6  ;;  %6321 = vmatprep.subr.bf16.mxu1 %v8477_v63  ;;  %v8551_v6 = vld [vmem:[#allocation12 + $0xf8] ss:$28 sps:$4 sm:$0xff]   ;;  %v8547_v63 = vld [vmem:[#allocation12 + $0x470] ss:$28 sps:$4 sm:$0xff]  }
 0x755   :  { %6280 = vmatprep.subr.bf16.mxu0 %v8474_v0  ;;  %v8555_v0 = vld [vmem:[#allocation12 + $0x280] ss:$28 sps:$4 sm:$0xff]  }
 0x757   :  { %6322 = vmatpush1.bf16.msra.mxu1 %v8475_v35  ;;  %v8554_v35 = vld [vmem:[#allocation12 + $0x43c] ss:$28 sps:$4 sm:$0xff]  }
 0x758   :  { %6281 = vmatpush1.bf16.msra.mxu0 %v8472_v5  ;;  %6323 = vmatprep.subr.bf16.mxu1 %v8483_v8  ;;  %v8552_v5 = vld [vmem:[#allocation12 + $0x438] ss:$28 sps:$4 sm:$0xff]   ;;  %v8560_v8 = vld [vmem:[#allocation12 + $0x248] ss:$28 sps:$4 sm:$0xff]  }
 0x759   :  { %6282 = vmatprep.subr.bf16.mxu0 %v8480_v9  ;;  %v8559_v9 = vld [vmem:[#allocation12 + $0x404] ss:$28 sps:$4 sm:$0xff]  }
 0x75b   :  { %6324 = vmatpush1.bf16.msra.mxu1 %v8481_v10  ;;  %v8561_v10 = vld [vmem:[#allocation12 + $0x88] ss:$28 sps:$4 sm:$0xff]  }
 0x75c   :  { %6283 = vmatpush1.bf16.msra.mxu0 %v8478_v2  ;;  %6325 = vmatprep.subr.bf16.mxu1 %v8489_v11  ;;  %v8557_v2 = vld [vmem:[#allocation12 + $0x400] ss:$28 sps:$4 sm:$0xff]   ;;  %v8565_v11 = vld [vmem:[#allocation12 + $0x210] ss:$28 sps:$4 sm:$0xff]  }
 0x75d   :  { %6284 = vmatprep.subr.bf16.mxu0 %v8486_v12  ;;  %v8564_v12 = vld [vmem:[#allocation12 + $0x3cc] ss:$28 sps:$4 sm:$0xff]  }
 0x75f   :  { %6326 = vmatpush2.bf16.msra.mxu1 %v8487_v13  ;;  %v8566_v13 = vld [vmem:[#allocation12 + $0x50] ss:$28 sps:$4 sm:$0xff]  }
 0x760   :  { %6285 = vmatpush2.bf16.msra.mxu0 %v8484_v14  ;;  %6327 = vmatprep.subr.bf16.mxu1 %v8495_v17  ;;  %v8562_v14 = vld [vmem:[#allocation12 + $0x3c8] ss:$28 sps:$4 sm:$0xff]   ;;  %v8570_v17 = vld [vmem:[#allocation12 + $0x1d8] ss:$28 sps:$4 sm:$0xff]  }
 0x761   :  { %6286 = vmatprep.subr.bf16.mxu0 %v8492_v18  ;;  %v8569_v18 = vld [vmem:[#allocation12 + $0x394] ss:$28 sps:$4 sm:$0xff]  }
 0x763   :  { %6328 = vmatpush2.bf16.msra.mxu1 %v8493_v19  ;;  %v8571_v19 = vld [vmem:[#allocation12 + $0x18] ss:$28 sps:$4 sm:$0xff]  }
 0x764   :  { %6287 = vmatpush2.bf16.msra.mxu0 %v8490_v22  ;;  %6329 = vmatprep.subr.bf16.mxu1 %v8501_v25  ;;  %v8567_v22 = vld [vmem:[#allocation12 + $0x390] ss:$28 sps:$4 sm:$0xff]   ;;  %v8574_v25 = vld [vmem:[#allocation12 + $0x6dc] ss:$28 sps:$4 sm:$0xff]  }
 0x765   :  { %6288 = vmatprep.subr.bf16.mxu0 %v8498_v26  ;;  %v8572_v26 = vld [vmem:[#allocation12 + $0x6d8] ss:$28 sps:$4 sm:$0xff]  }
 0x767   :  { %6330 = vmatpush2.bf16.msra.mxu1 %v8499_v27  ;;  %v8577_v27 = vld [vmem:[#allocation12 + $0x6a4] ss:$28 sps:$4 sm:$0xff]  }
 0x768   :  { %6289 = vmatpush2.bf16.msra.mxu0 %v8496_v28  ;;  %6331 = vmatprep.subr.bf16.mxu1 %v8507_v29  ;;  %v8575_v28 = vld [vmem:[#allocation12 + $0x6a0] ss:$28 sps:$4 sm:$0xff]   ;;  %v8580_v29 = vld [vmem:[#allocation12 + $0x66c] ss:$28 sps:$4 sm:$0xff]  }
 0x769   :  { %6290 = vmatprep.subr.bf16.mxu0 %v8504_v30  ;;  %v8578_v30 = vld [vmem:[#allocation12 + $0x668] ss:$28 sps:$4 sm:$0xff]  }
 0x76b   :  { %6332 = vmatpush2.bf16.msra.mxu1 %v8505_v20  ;;  %v8583_v20 = vld [vmem:[#allocation12 + $0x634] ss:$28 sps:$4 sm:$0xff]  }
 0x76c   :  { %6291 = vmatpush2.bf16.msra.mxu0 %v8502_v23  ;;  %6333 = vmatprep.subr.bf16.mxu1 %v8513_v21  ;;  %v8581_v23 = vld [vmem:[#allocation12 + $0x630] ss:$28 sps:$4 sm:$0xff]   ;;  %v8586_v21 = vld [vmem:[#allocation12 + $0x5fc] ss:$28 sps:$4 sm:$0xff]  }
 0x76d   :  { %6292 = vmatprep.subr.bf16.mxu0 %v8510_v31  ;;  %v8584_v31 = vld [vmem:[#allocation12 + $0x5f8] ss:$28 sps:$4 sm:$0xff]  }
 0x76f   :  { %6334 = vmatpush2.bf16.msra.mxu1 %v8511_v32  ;;  %v8589_v32 = vld [vmem:[#allocation12 + $0x5c4] ss:$28 sps:$4 sm:$0xff]  }
 0x770   :  { %6293 = vmatpush2.bf16.msra.mxu0 %v8508_v33  ;;  %6335 = vmatprep.subr.bf16.mxu1 %v8519_v7  ;;  %v8587_v33 = vld [vmem:[#allocation12 + $0x5c0] ss:$28 sps:$4 sm:$0xff]   ;;  %v8590_v7 = vld [vmem:[#allocation12 + $0x588] ss:$28 sps:$4 sm:$0xff]  }
 0x771   :  { %6294 = vmatprep.subr.bf16.mxu0 %v8516_v34  ;;  %v8595_v34 = vld [vmem:[#allocation12 + $0x554] ss:$28 sps:$4 sm:$0xff]  }
 0x773   :  { %6336 = vmatpush2.bf16.msra.mxu1 %v8517_v36  ;;  %v8593_v36 = vld [vmem:[#allocation12 + $0x550] ss:$28 sps:$4 sm:$0xff]  }
 0x774   :  { %6295 = vmatpush2.bf16.msra.mxu0 %v8514_v37  ;;  %6337 = vmatprep.subr.bf16.mxu1 %v8525_v38  ;;  %v8596_v37 = vld [vmem:[#allocation12 + $0x6e0] ss:$28 sps:$4 sm:$0xff]  }
 0x775   :  { %6296 = vmatprep.subr.bf16.mxu0 %v8522_v24  ;;  %v8597_v38 = vld [vmem:[#allocation12 + $0x520] ss:$28 sps:$4 sm:$0xff]   ;;  %v8598_v24 = vld [vmem:[#allocation12 + $0x6a8] ss:$28 sps:$4 sm:$0xff]  }
 0x777   :  { %6338 = vmatpush2.bf16.msra.mxu1 %v8523_v40 }
 0x778   :  { %6297 = vmatpush2.bf16.msra.mxu0 %v8520_v42  ;;  %6339 = vmatprep.subr.bf16.mxu1 %v8531_v43  ;;  %v8599_v43 = vld [vmem:[#allocation12 + $0x4e8] ss:$28 sps:$4 sm:$0xff]  }
 0x779   :  { %6298 = vmatprep.subr.bf16.mxu0 %v8528_v44  ;;  %v8600_v44 = vld [vmem:[#allocation12 + $0x670] ss:$28 sps:$4 sm:$0xff]  }
 0x77b   :  { %6340 = vmatpush2.bf16.msra.mxu1 %v8529_v45 }
 0x77c   :  { %6299 = vmatpush2.bf16.msra.mxu0 %v8526_v46  ;;  %7409 = vmatprep.subr.bf16.mxu1 %v8535_v52  ;;  %v8601_v52 = vld [vmem:[#allocation12 + $0x4b0] ss:$28 sps:$4 sm:$0xff]  }
 0x77d   :  { %6350 = vmatprep.subr.bf16.mxu0 %v8534_v54  ;;  %v8602_v54 = vld [vmem:[#allocation12 + $0x638] ss:$28 sps:$4 sm:$0xff]  }
 0x77e   :  { %6342 = vmatmul.mubr.bf16.vlgmr.msra.gmra.mxu1 %v9119_v53 }
 0x77f   :  { %6301 = vmatmul.mubr.bf16.vlgmr.msra.gmra.mxu0 %v9130_v41  ;;  %7410 = vmatpush3.bf16.msra.mxu1 %v8536_v55  ;;  %v8603_v55 = vld [vmem:[#allocation12 + $0x478] ss:$28 sps:$4 sm:$0xff]  }
 0x780   :  { %6351 = vmatpush1.bf16.msra.mxu0 %v8532_v51  ;;  %6382 = vmatprep.mubr.bf16.mxu0 %v9128_v39  ;;  %v8604_v51 = vld [vmem:[#allocation12 + $0x600] ss:$28 sps:$4 sm:$0xff]  }
 0x781   :  { %6423 = vmatprep.mubr.bf16.mxu1 %v9117_v48  ;;  %6352 = vmatprep.subr.bf16.mxu0 %v8539_v16  ;;  %v8556_v48 = vld [vmem:[#allocation12 + $0xc0] ss:$28 sps:$4 sm:$0xff]  }
 0x782   :  { %7411 = vmatprep.subr.bf16.mxu1 %v8540_v56  ;;  %v8605_v16 = vld [vmem:[#allocation12 + $0x440] ss:$28 sps:$4 sm:$0xff]   ;;  %v8606_v56 = vld [vmem:[#allocation12 + $0x5c8] ss:$28 sps:$4 sm:$0xff]  }
 0x783   :  { %7412 = vmatpush3.bf16.msra.mxu1 %v8541_v57  ;;  %v8608_v57 = vld [vmem:[#allocation12 + $0x590] ss:$28 sps:$4 sm:$0xff]  }
 0x784   :  { %6353 = vmatpush1.bf16.msra.mxu0 %v8537_v58  ;;  %7413 = vmatprep.subr.bf16.mxu1 %v8545_v59  ;;  %v8609_v58 = vld [vmem:[#allocation12 + $0x3d0] ss:$28 sps:$4 sm:$0xff]   ;;  %v8610_v59 = vld [vmem:[#allocation12 + $0x558] ss:$28 sps:$4 sm:$0xff]  }
 0x785   :  { %6354 = vmatprep.subr.bf16.mxu0 %v8544_v60  ;;  %v8611_v60 = vld [vmem:[#allocation12 + $0x398] ss:$28 sps:$4 sm:$0xff]  }
 0x787   :  { %7414 = vmatpush3.bf16.msra.mxu1 %v8546_v61  ;;  %v9148_v61 = vld [vmem:[%s9193_s17] sm:$0xff] }
 0x788   :  { %6355 = vmatpush1.bf16.msra.mxu0 %v8542_v62  ;;  %7415 = vmatprep.subr.bf16.mxu1 %v8550_v15  ;;  %v4961_v62 = vrot.slane %v9148_v61, %v8989_v3  ;;  %v4965_v15 = vrot.slane %v9148_v61, %v8992_v4 }
 0x789   :  { %6356 = vmatprep.subr.bf16.mxu0 %v8549_v47 }
 0x78b   :  { %7416 = vmatpush3.bf16.msra.mxu1 %v8551_v6 }
 0x78c   :  { %6357 = vmatpush1.bf16.msra.mxu0 %v8547_v63  ;;  %7417 = vmatprep.subr.bf16.mxu1 %v8555_v0 }
 0x78d   :  { %6358 = vmatprep.subr.bf16.mxu0 %v8554_v35 }
 0x78f   :  { %7418 = vmatpush3.bf16.msra.mxu1 %v8556_v48 }
 0x790   :  { %6359 = vmatpush1.bf16.msra.mxu0 %v8552_v5  ;;  %7419 = vmatprep.subr.bf16.mxu1 %v8560_v8 }
 0x791   :  { %6360 = vmatprep.subr.bf16.mxu0 %v8559_v9 }
 0x793   :  { %7420 = vmatpush3.bf16.msra.mxu1 %v8561_v10 }
 0x794   :  { %6361 = vmatpush1.bf16.msra.mxu0 %v8557_v2  ;;  %7421 = vmatprep.subr.bf16.mxu1 %v8565_v11 }
 0x795   :  { %6362 = vmatprep.subr.bf16.mxu0 %v8564_v12 }
 0x797   :  { %7422 = vmatpush3.bf16.msra.mxu1 %v8566_v13 }
 0x798   :  { %6363 = vmatpush1.bf16.msra.mxu0 %v8562_v14  ;;  %7423 = vmatprep.subr.bf16.mxu1 %v8570_v17 }
 0x799   :  { %6364 = vmatprep.subr.bf16.mxu0 %v8569_v18 }
 0x79b   :  { %7424 = vmatpush3.bf16.msra.mxu1 %v8571_v19 }
 0x79c   :  { %6365 = vmatpush1.bf16.msra.mxu0 %v8567_v22  ;;  %v4969_v22 = vrot.slane %v9148_v61, %v9003_v49 }
 0x79d   :  { %6366 = vmatprep.subr.bf16.mxu0 %v8574_v25  ;;  %v4973_v25 = vrot.slane %v9148_v61, %v9006_v50 }
 0x79e   :  { %6424 = vmatmul.mubr.bf16.vlgmr.msra.gmra.mxu1 %v9119_v53  ;;  %v8592_v53 = vld [vmem:[#allocation12 + $0x58c] ss:$28 sps:$4 sm:$0xff]  }
 0x7a0   :  { %6367 = vmatpush2.bf16.msra.mxu0 %v8572_v26 }
 0x7a1   :  { %6368 = vmatprep.subr.bf16.mxu0 %v8577_v27 }
 0x7a4   :  { %6369 = vmatpush2.bf16.msra.mxu0 %v8575_v28 }
 0x7a5   :  { %6370 = vmatprep.subr.bf16.mxu0 %v8580_v29 }
 0x7a8   :  { %6371 = vmatpush2.bf16.msra.mxu0 %v8578_v30 }
 0x7a9   :  { %6372 = vmatprep.subr.bf16.mxu0 %v8583_v20 }
 0x7ac   :  { %6373 = vmatpush2.bf16.msra.mxu0 %v8581_v23 }
 0x7ad   :  { %6374 = vmatprep.subr.bf16.mxu0 %v8586_v21 }
 0x7b0   :  { %6375 = vmatpush2.bf16.msra.mxu0 %v8584_v31 }
 0x7b1   :  { %6376 = vmatprep.subr.bf16.mxu0 %v8589_v32 }
 0x7b4   :  { %6377 = vmatpush2.bf16.msra.mxu0 %v8587_v33 }
 0x7b5   :  { %6378 = vmatprep.subr.bf16.mxu0 %v8592_v53 }
 0x7b8   :  { %6379 = vmatpush2.bf16.msra.mxu0 %v8590_v7 }
 0x7b9   :  { %6380 = vmatprep.subr.bf16.mxu0 %v8595_v34 }
 0x7bc   :  { %6381 = vmatpush2.bf16.msra.mxu0 %v8593_v36 }
 0x7bd   :  { %7431 = vmatprep.subr.bf16.mxu0 %v8596_v37 }
 0x7be   :  { %v6179_v40 = vpop.f32.mrf.mxu1 }
 0x7bf   :  { %6383 = vmatmul.mubr.bf16.vlgmr.msra.gmra.mxu0 %v9130_v41  ;;  %v6180_v47 = vadd.f32 %v6179_v40, %v4961_v62 }
 0x7c0   :  { %7432 = vmatpush3.bf16.msra.mxu0 %v8597_v38  ;;  %6463 = vmatprep.mubr.bf16.mxu0 %v9128_v39  ;;  %v6181_v42 = vpop.f32.mrf.mxu1  ;;  %v8607_v39 = vld [vmem:[#allocation12 + $0x408] ss:$28 sps:$4 sm:$0xff]  }
 0x7c1   :  { %7433 = vmatprep.subr.bf16.mxu0 %v8598_v24  ;;  %v6182_v0 = vadd.f32 %v6181_v42, %v4965_v15 }
 0x7c2   :  { %v6183_v45 = vpop.f32.mrf.mxu1 }
 0x7c4   :  { %7434 = vmatpush3.bf16.msra.mxu0 %v8599_v43  ;;  %v6184_v46 = vpop.f32.mrf.mxu1 }
 0x7c5   :  { %7435 = vmatprep.subr.bf16.mxu0 %v8600_v44  ;;  %v4976_v46 = vsub.s32 4, %v8981_v1 }
 0x7c8   :  { %7436 = vmatpush3.bf16.msra.mxu0 %v8601_v52  ;;  %v4980_v52 = vsub.s32 5, %v8981_v1 }
 0x7c9   :  { %7437 = vmatprep.subr.bf16.mxu0 %v8602_v54  ;;  %v4977_v54 = vrot.slane %v9148_v61, %v4976_v46 }
 0x7cc   :  { %7438 = vmatpush3.bf16.msra.mxu0 %v8603_v55  ;;  %v4981_v55 = vrot.slane %v9148_v61, %v4980_v52 }
 0x7cd   :  { %7439 = vmatprep.subr.bf16.mxu0 %v8604_v51 }
 0x7d0   :  { %7440 = vmatpush3.bf16.msra.mxu0 %v8605_v16 }
 0x7d1   :  { %7441 = vmatprep.subr.bf16.mxu0 %v8606_v56 }
 0x7d4   :  { %7442 = vmatpush3.bf16.msra.mxu0 %v8607_v39 }
 0x7d5   :  { %7443 = vmatprep.subr.bf16.mxu0 %v8608_v57 }
 0x7d8   :  { %7444 = vmatpush3.bf16.msra.mxu0 %v8609_v58 }
 0x7d9   :  { %7445 = vmatprep.subr.bf16.mxu0 %v8610_v59 }
 0x7dc   :  { %7446 = vmatpush3.bf16.msra.mxu0 %v8611_v60 }
 0x7df   :  { %6464 = vmatmul.mubr.bf16.vlgmr.msra.gmra.mxu0 %v9130_v41 }
 0x7fe   :  { %v6261_v6 = vpop.f32.mrf.mxu1 }
 0x7ff   :  { %v6220_v63 = vpop.f32.mrf.mxu0  ;;  %v6262_v26 = vadd.f32 %v6261_v6, %v4969_v22 }
 0x800   :  { %v6221_v35 = vadd.f32 %v6220_v63, %v6180_v47  ;;  %v6263_v48 = vpop.f32.mrf.mxu1 }
 0x801   :  { %v6222_v5 = vpop.f32.mrf.mxu0  ;;  %v6264_v29 = vadd.f32 %v6263_v48, %v4973_v25 }
 0x802   :  { %v6471_v8 = vmul.f32 0.5, %v6221_v35  ;;  %v6223_v41 = vadd.f32 %v6222_v5, %v6182_v0  ;;  %v6265_v9 = vpop.f32.mrf.mxu1 }
 0x803   :  { %v6224_v10 = vpop.f32.mrf.mxu0 }
 0x804   :  { %8614 = vtanh.f32 %v6471_v8  ;;  %v6472_v2 = vmul.f32 0.5, %v6223_v41  ;;  %v6266_v11 = vpop.f32.mrf.mxu1  ;;  %v4984_v8 = vsub.s32 6, %v8981_v1 }
 0x805   :  { %v6225_v12 = vpop.f32.mrf.mxu0 }
 0x806   :  { %8616 = vtanh.f32 %v6472_v2  ;;  %v4985_v41 = vrot.slane %v9148_v61, %v4984_v8 }
 0x811   :  { %v8615_v3 = vpop.eup %8614 }
 0x812   :  { %v6485_v13 = vmul.f32 0.5, %v8615_v3 }
 0x813   :  { %v8617_v14 = vpop.eup %8616 }
 0x814   :  { %v6486_v4 = vmul.f32 0.5, %v8617_v14  ;;  %v6492_v17 = vadd.f32 0.5, %v6485_v13 }
 0x816   :  { %v6493_v18 = vadd.f32 0.5, %v6486_v4 }
 0x818   :  { %v7339_v19 = vpack.c.bf16 %v6493_v18, %v6492_v17 }
 0x81a   :  { %6528 = vst [vmem:[%s9195_s19] sm:$0xff] %v7339_v19 }
 0x83e   :  { %v6343_v27 = vpop.f32.mrf.mxu1 }
 0x83f   :  { %v6302_v28 = vpop.f32.mrf.mxu0  ;;  %v6344_v51 = vadd.f32 %v6343_v27, %v4977_v54 }
 0x840   :  { %v6303_v30 = vadd.f32 %v6302_v28, %v6262_v26  ;;  %v6345_v20 = vpop.f32.mrf.mxu1 }
 0x841   :  { %v6304_v23 = vpop.f32.mrf.mxu0  ;;  %v6346_v56 = vadd.f32 %v6345_v20, %v4981_v55 }
 0x842   :  { %v6473_v21 = vmul.f32 0.5, %v6303_v30  ;;  %v6305_v31 = vadd.f32 %v6304_v23, %v6264_v29  ;;  %v6347_v32 = vpop.f32.mrf.mxu1 }
 0x843   :  { %v6306_v33 = vpop.f32.mrf.mxu0 }
 0x844   :  { %8618 = vtanh.f32 %v6473_v21  ;;  %v6474_v53 = vmul.f32 0.5, %v6305_v31  ;;  %v6348_v7 = vpop.f32.mrf.mxu1 }
 0x845   :  { %v6307_v34 = vpop.f32.mrf.mxu0 }
 0x846   :  { %8620 = vtanh.f32 %v6474_v53 }
 0x851   :  { %v8619_v49 = vpop.eup %8618 }
 0x852   :  { %v6487_v36 = vmul.f32 0.5, %v8619_v49 }
 0x853   :  { %v8621_v37 = vpop.eup %8620 }
 0x854   :  { %v6488_v50 = vmul.f32 0.5, %v8621_v37  ;;  %v6494_v38 = vadd.f32 0.5, %v6487_v36 }
 0x856   :  { %v6495_v24 = vadd.f32 0.5, %v6488_v50 }
 0x858   :  { %v7340_v40 = vpack.c.bf16 %v6495_v24, %v6494_v38 }
 0x85a   :  { %6529 = vst [vmem:[%s9195_s19 + $0x8] sm:$0xff] %v7340_v40 }
 0x85e   :  { %v7425_v42 = vpop.f32.mrf.mxu1 }
 0x860   :  { %v7426_v43 = vpop.f32.mrf.mxu1 }
 0x861   :  { %v7427_v9 = vadd.f32 %v7426_v43, %v7425_v42 }
 0x862   :  { %v7428_v44 = vpop.f32.mrf.mxu1 }
 0x863   :  { %v6426_v11 = vadd.f32 %v7427_v9, %v4985_v41 }
 0x864   :  { %v7429_v45 = vpop.f32.mrf.mxu1 }
 0x87f   :  { %v6384_v16 = vpop.f32.mrf.mxu0 }
 0x880   :  { %v6385_v39 = vadd.f32 %v6384_v16, %v6344_v51 }
 0x881   :  { %v6386_v57 = vpop.f32.mrf.mxu0 }
 0x882   :  { %v6475_v58 = vmul.f32 0.5, %v6385_v39  ;;  %v6387_v59 = vadd.f32 %v6386_v57, %v6346_v56 }
 0x883   :  { %v6388_v60 = vpop.f32.mrf.mxu0 }
 0x884   :  { %8622 = vtanh.f32 %v6475_v58  ;;  %v6476_v62 = vmul.f32 0.5, %v6387_v59 }
 0x885   :  { %v6389_v15 = vpop.f32.mrf.mxu0 }
 0x886   :  { %8624 = vtanh.f32 %v6476_v62 }
 0x891   :  { %v8623_v47 = vpop.eup %8622 }
 0x892   :  { %v6489_v6 = vmul.f32 0.5, %v8623_v47 }
 0x893   :  { %v8625_v63 = vpop.eup %8624 }
 0x894   :  { %v6490_v0 = vmul.f32 0.5, %v8625_v63  ;;  %v6496_v35 = vadd.f32 0.5, %v6489_v6 }
 0x896   :  { %v6497_v48 = vadd.f32 0.5, %v6490_v0 }
 0x898   :  { %v7341_v5 = vpack.c.bf16 %v6497_v48, %v6496_v35 }
 0x89a   :  { %6530 = vst [vmem:[%s9195_s19 + $0x10] sm:$0xff] %v7341_v5 }
 0x89f   :  { %v7447_v10 = vpop.f32.mrf.mxu0 }
 0x8a1   :  { %v7448_v2 = vpop.f32.mrf.mxu0 }
 0x8a2   :  { %v7449_v12 = vadd.f32 %v7448_v2, %v7447_v10 }
 0x8a3   :  { %v7450_v3 = vpop.f32.mrf.mxu0 }
 0x8a4   :  { %v6466_v13 = vadd.f32 %v7449_v12, %v6426_v11 }
 0x8a5   :  { %v7451_v14 = vpop.f32.mrf.mxu0 }
 0x8a6   :  { %v6477_v4 = vmul.f32 0.5, %v6466_v13 }
 0x8a8   :  { %8626 = vtanh.f32 %v6477_v4 }
 0x8b5   :  { %v8627_v17 = vpop.eup %8626 }
 0x8b6   :  { %v6491_v18 = vmul.f32 0.5, %v8627_v17 }
 0x8b8   :  { %v6498_v19 = vadd.f32 0.5, %v6491_v18 }
 0x8ba   :  { %v7342_v1 = vpack.c.bf16 %v6498_v19, %v6498_v19 }
 0x8bc   :  { %6531 = vst [vmem:[%s9195_s19 + $0x18] sm:$0xf] %v7342_v1 }
 0x8bd   :  { %6540 = vsyncpa [#allocation3], 1 }
 0x8be   :  { %6541 = vsyncpa [#allocation5], 1 }
 0x8bf   :  { %6542 = vsyncpa [#allocation8], 1 }
 0x8c0   :  { %6543 = vsyncpa [#allocation11], 1 }

</bundles_post_ra>
